<compile_context>
chip_gen: v7x
topology: tpu7x:2x2x1
jax: 0.10.0
libtpu: 0.0.40
codegen_flags: <defaults>
</compile_context>

<pallas_src>
import functools
import numpy as np
import jax
import jax.numpy as jnp
from jax.experimental import pallas as pl
from jax.experimental.pallas import tpu as pltpu

# ----------------------------- config -----------------------------
EMBED_DIMS = 32
NUM_HEADS = 4
FFN_CHANNELS = 64
WINDOW = 4
B, H, W = 2, 8, 8
EPS = 1e-5
INV_SQRT2 = np.float32(1.0 / np.sqrt(2.0))


# --------------------------- fused Pallas kernel ---------------------------
def swin_kernel(x_ref, g1_ref, b1_ref, wq_ref, bq_ref, wk_ref, bk_ref,
                wv_ref, bv_ref, hmask_ref, mbias_ref, wp_ref, bp_ref,
                g2_ref, b2_ref, w1_ref, bb1_ref, w2_ref, bb2_ref,
                o_ref, *, num_heads):
    x = x_ref[...]                                     # (T, C) tokens, row-major NHWC order
    T, C = x.shape

    # ---- LayerNorm1 (per token over channels) ----
    mu = jnp.mean(x, axis=-1, keepdims=True)
    var = jnp.mean((x - mu) ** 2, axis=-1, keepdims=True)
    xn = (x - mu) * jax.lax.rsqrt(var + EPS) * g1_ref[...] + b1_ref[...]

    # ---- Q/K/V projections (scale pre-folded into wq/bq); 3 matmuls so each
    #      result lands natively at lanes 0..C-1 (no lane-slice relayouts) ----
    q = jnp.dot(xn, wq_ref[...], preferred_element_type=jnp.float32) + bq_ref[...]
    k = jnp.dot(xn, wk_ref[...], preferred_element_type=jnp.float32) + bk_ref[...]
    v = jnp.dot(xn, wv_ref[...], preferred_element_type=jnp.float32) + bv_ref[...]

    # ---- head-batched, window-masked full-slab attention ----
    hmask = hmask_ref[...]                             # (nH, 1, C) 0/1 head-channel mask
    q_m = q[None, :, :] * hmask                        # (nH, T, C); zeros add exactly
    s = jnp.einsum('nc,mc->nm', q_m.reshape(num_heads * T, C), k,
                   preferred_element_type=jnp.float32)           # (nH*T, T) dense lanes
    s = s.reshape(num_heads, T, T) + mbias_ref[...]    # rel-pos bias + window/batch mask
    s = s - jnp.max(s, axis=-1, keepdims=True)
    e = jnp.exp(s)                                     # masked entries underflow to 0.0
    p = e * pl.reciprocal(jnp.sum(e, axis=-1, keepdims=True), approx=True)
    v_m = v[None, :, :] * hmask                        # (nH, T, C)
    o = jnp.einsum('hnm,hmc->hnc', p, v_m,
                   preferred_element_type=jnp.float32)           # (nH, T, C)
    attn = o[0]
    for hh in range(1, num_heads):                     # heads occupy disjoint channel
        attn = attn + o[hh]                            # blocks -> sum == concat (exact)

    # ---- output projection + residual 1 ----
    attn = jnp.dot(attn, wp_ref[...], preferred_element_type=jnp.float32) + bp_ref[...]
    x1 = x + attn

    # ---- LayerNorm2 ----
    mu2 = jnp.mean(x1, axis=-1, keepdims=True)
    var2 = jnp.mean((x1 - mu2) ** 2, axis=-1, keepdims=True)
    x2 = (x1 - mu2) * jax.lax.rsqrt(var2 + EPS) * g2_ref[...] + b2_ref[...]

    # ---- FFN: Linear -> GELU(erf) -> Linear, + residual 2 ----
    h1 = jnp.dot(x2, w1_ref[...], preferred_element_type=jnp.float32) + bb1_ref[...]
    # exact-erf GELU kept for fidelity with nn.GELU(); tanh-GELU (EUP) is a known trade-off.
    h1 = 0.5 * h1 * (1.0 + jax.lax.erf(h1 * INV_SQRT2))
    out = jnp.dot(h1, w2_ref[...], preferred_element_type=jnp.float32) + bb2_ref[...]

    o_ref[...] = x1 + out


# --------------------------- wrapper ---------------------------
def fused_swin_pallas(x_tokens, prep):
    """x_tokens: (T, C) tokens in row-major NHWC order. Returns (T, C)."""
    T, C = x_tokens.shape
    operands = (x_tokens, prep["g1"], prep["b1"],
                prep["wq_t"], prep["bq"], prep["wk_t"], prep["bk"],
                prep["wv_t"], prep["bv"], prep["hmask"], prep["mask_bias"],
                prep["wproj_t"], prep["bproj"], prep["g2"], prep["b2"],
                prep["w1_t"], prep["bb1"], prep["w2_t"], prep["bb2"])

    def full_spec(a):
        r = a.ndim
        return pl.BlockSpec(a.shape, lambda i, _r=r: (0,) * _r)

    kernel = functools.partial(swin_kernel, num_heads=NUM_HEADS)
    return pl.pallas_call(
        kernel,
        out_shape=jax.ShapeDtypeStruct((T, C), jnp.float32),
        grid=(1,),
        in_specs=[full_spec(a) for a in operands],
        out_specs=pl.BlockSpec((T, C), lambda i: (0, 0)),
        compiler_params=pltpu.CompilerParams(dimension_semantics=("arbitrary",)),
    )(*operands)


def relative_position_bias(params):
    """Reproduces WindowMSA's relative-position-bias construction: (nH, N, N)."""
    ws = WINDOW
    Wh = Ww = ws
    N = ws * ws

    def double_step_seq(step1, len1, step2, len2):
        seq1 = jnp.arange(0, step1 * len1, step1)
        seq2 = jnp.arange(0, step2 * len2, step2)
        return (seq1[:, None] + seq2[None, :]).reshape(1, -1)

    rel_index_coords = double_step_seq(2 * Ww - 1, Wh, 1, Ww)          # (1, N)
    rel_position_index = rel_index_coords + rel_index_coords.T         # (N, N)
    rel_position_index = rel_position_index[:, ::-1]                   # flip(1)
    table = params["rel_bias_table"]                                   # ((2Wh-1)(2Ww-1), nH)
    bias = table[rel_position_index.reshape(-1)].reshape(N, N, NUM_HEADS)
    return jnp.transpose(bias, (2, 0, 1))                              # (nH, N, N)


def prepare_params(params, Bq, Hq, Wq):
    """One-time glue: transposed/split/scaled weights, 2-D biases, head mask,
    and the (nH, T, T) window-structure + rel-pos-bias additive mask."""
    C, nH, ws = EMBED_DIMS, NUM_HEADS, WINDOW
    hd = C // nH
    scale = np.float32(hd ** -0.5)

    wqkv = jnp.asarray(params["wqkv"], jnp.float32)                    # (3C, C), torch (out,in)
    bqkv = jnp.asarray(params["bqkv"], jnp.float32)                    # (3C,)
    wq_t = (wqkv[:C] * scale).T                                        # fold qk scale into Q
    bq = (bqkv[:C] * scale)[None, :]
    wk_t = wqkv[C:2 * C].T
    bk = bqkv[C:2 * C][None, :]
    wv_t = wqkv[2 * C:].T
    bv = bqkv[2 * C:][None, :]

    # 0/1 head-channel mask (nH, 1, C)
    hmask = np.zeros((nH, 1, C), np.float32)
    for h in range(nH):
        hmask[h, 0, h * hd:(h + 1) * hd] = 1.0

    # window/batch structure + relative-position bias folded into one additive
    # (nH, T, T) tensor over the row-major NHWC token order.
    bias = relative_position_bias(params)                              # (nH, N, N)
    hh, ww = np.meshgrid(np.arange(Hq), np.arange(Wq), indexing="ij")
    win = ((hh // ws) * (Wq // ws) + (ww // ws)).reshape(-1)           # window id per token
    pos = ((hh % ws) * ws + (ww % ws)).reshape(-1)                     # pos-in-window per token
    win = np.tile(win, Bq)
    pos = np.tile(pos, Bq)
    bat = np.repeat(np.arange(Bq), Hq * Wq)
    same = (bat[:, None] == bat[None, :]) & (win[:, None] == win[None, :])
    gathered = bias[:, pos[:, None], pos[None, :]]                     # (nH, T, T)
    mask_bias = jnp.where(jnp.asarray(same)[None, :, :], gathered, jnp.float32(-1e9))

    prep = {
        "g1": params["g1"][None, :], "b1": params["b1"][None, :],
        "g2": params["g2"][None, :], "b2": params["b2"][None, :],
        "wq_t": wq_t, "bq": bq, "wk_t": wk_t, "bk": bk, "wv_t": wv_t, "bv": bv,
        "hmask": hmask, "mask_bias": mask_bias,
        "wproj_t": params["wproj"].T, "bproj": params["bproj"][None, :],
        "w1_t": params["w1"].T, "bb1": params["bb1"][None, :],
        "w2_t": params["w2"].T, "bb2": params["bb2"][None, :],
    }
    return jax.tree_util.tree_map(jnp.asarray, prep)


def swin_block_forward(x_nchw, prep):
    Bq, C, Hq, Wq = x_nchw.shape
    # Only the module's own NCHW<->NHWC permutes remain in XLA; the window
    # partition/reverse chains are absorbed into the precomputed mask_bias.
    xt = jnp.transpose(x_nchw, (0, 2, 3, 1)).reshape(Bq * Hq * Wq, C)
    out = fused_swin_pallas(xt, prep)                                  # (T, C)
    return jnp.transpose(out.reshape(Bq, Hq, Wq, C), (0, 3, 1, 2))


# --------------------------- pure-JAX reference ---------------------------
def _layernorm(x, g, b):
    mu = x.mean(-1, keepdims=True)
    var = ((x - mu) ** 2).mean(-1, keepdims=True)
    return (x - mu) / jnp.sqrt(var + EPS) * g + b


def reference_forward(x_nchw, params):
    Bq, C, Hq, Wq = x_nchw.shape
    ws, nH = WINDOW, NUM_HEADS
    hd = C // nH
    x = jnp.transpose(x_nchw, (0, 2, 3, 1)).reshape(Bq, Hq * Wq, C)
    identity = x
    xn = _layernorm(x, params["g1"], params["b1"])
    xw = xn.reshape(Bq, Hq // ws, ws, Wq // ws, ws, C)
    xw = jnp.transpose(xw, (0, 1, 3, 2, 4, 5)).reshape(-1, ws * ws, C)
    BW, N, _ = xw.shape
    qkv = xw @ params["wqkv"].T + params["bqkv"]
    qkv = qkv.reshape(BW, N, 3, nH, hd).transpose(2, 0, 3, 1, 4)
    q, k, v = qkv[0] * (hd ** -0.5), qkv[1], qkv[2]
    attn = jnp.einsum("bhnd,bhmd->bhnm", q, k)
    attn = attn + relative_position_bias(params)[None]
    attn = jax.nn.softmax(attn, axis=-1)
    out = jnp.einsum("bhnm,bhmd->bhnd", attn, v)
    out = out.transpose(0, 2, 1, 3).reshape(BW, N, C)
    out = out @ params["wproj"].T + params["bproj"]
    out = out.reshape(Bq, Hq // ws, Wq // ws, ws, ws, C)
    out = jnp.transpose(out, (0, 1, 3, 2, 4, 5)).reshape(Bq, Hq * Wq, C)
    x = identity + out
    identity = x
    xn = _layernorm(x, params["g2"], params["b2"])
    h = xn @ params["w1"].T + params["bb1"]
    h = 0.5 * h * (1.0 + jax.lax.erf(h / np.sqrt(2.0)))
    out = h @ params["w2"].T + params["bb2"]
    x = identity + out
    return jnp.transpose(x.reshape(Bq, Hq, Wq, C), (0, 3, 1, 2))


# --------------------------- main ---------------------------
def make_params(key):
    C, Fc, nH, ws = EMBED_DIMS, FFN_CHANNELS, NUM_HEADS, WINDOW
    ks = jax.random.split(key, 8)
    p = {
        "g1": jnp.ones((C,), jnp.float32),
        "b1": jnp.zeros((C,), jnp.float32),
        "g2": jnp.ones((C,), jnp.float32),
        "b2": jnp.zeros((C,), jnp.float32),
        "wqkv": 0.02 * jax.random.normal(ks[0], (3 * C, C), jnp.float32),
        "bqkv": 0.02 * jax.random.normal(ks[1], (3 * C,), jnp.float32),
        "wproj": 0.02 * jax.random.normal(ks[2], (C, C), jnp.float32),
        "bproj": 0.02 * jax.random.normal(ks[3], (C,), jnp.float32),
        "w1": 0.02 * jax.random.normal(ks[4], (Fc, C), jnp.float32),
        "bb1": 0.02 * jax.random.normal(ks[5], (Fc,), jnp.float32),
        "w2": 0.02 * jax.random.normal(ks[6], (C, Fc), jnp.float32),
        "bb2": 0.02 * jax.random.normal(ks[7], (C,), jnp.float32),
        # zeros in PyTorch init; small random here to exercise the bias path
        "rel_bias_table": 0.02 * jax.random.normal(
            jax.random.PRNGKey(42), ((2 * ws - 1) * (2 * ws - 1), nH), jnp.float32),
    }
    return p


if __name__ == "__main__":
    key = jax.random.PRNGKey(0)
    kx, kp = jax.random.split(key)
    x = jax.random.normal(kx, (B, EMBED_DIMS, H, W), jnp.float32)   # NCHW, like PyTorch
    params = make_params(kp)
    prep = prepare_params(params, B, H, W)                          # one-time glue

    out = jax.jit(swin_block_forward)(x, prep)
    out = jax.block_until_ready(out)

    ref = reference_forward(x, params)
    assert out.shape == (B, EMBED_DIMS, H, W)
    np.testing.assert_allclose(np.asarray(out), np.asarray(ref), atol=1e-3, rtol=1e-3)
    print("KERNEL_OK")
</pallas_src>

<mosaic_0001>
module attributes {stable_mosaic.version = 11 : i64} {
  func.func @swin_kernel(%arg0: i32, %arg1: memref<128x32xf32, #tpu.memory_space<vmem>>, %arg2: memref<1x32xf32, #tpu.memory_space<vmem>>, %arg3: memref<1x32xf32, #tpu.memory_space<vmem>>, %arg4: memref<32x32xf32, #tpu.memory_space<vmem>>, %arg5: memref<1x32xf32, #tpu.memory_space<vmem>>, %arg6: memref<32x32xf32, #tpu.memory_space<vmem>>, %arg7: memref<1x32xf32, #tpu.memory_space<vmem>>, %arg8: memref<32x32xf32, #tpu.memory_space<vmem>>, %arg9: memref<1x32xf32, #tpu.memory_space<vmem>>, %arg10: memref<4x1x32xf32, #tpu.memory_space<vmem>>, %arg11: memref<4x128x128xf32, #tpu.memory_space<vmem>>, %arg12: memref<32x32xf32, #tpu.memory_space<vmem>>, %arg13: memref<1x32xf32, #tpu.memory_space<vmem>>, %arg14: memref<1x32xf32, #tpu.memory_space<vmem>>, %arg15: memref<1x32xf32, #tpu.memory_space<vmem>>, %arg16: memref<32x64xf32, #tpu.memory_space<vmem>>, %arg17: memref<1x64xf32, #tpu.memory_space<vmem>>, %arg18: memref<64x32xf32, #tpu.memory_space<vmem>>, %arg19: memref<1x32xf32, #tpu.memory_space<vmem>>, %arg20: memref<128x32xf32, #tpu.memory_space<vmem>>) attributes {dimension_semantics = [#tpu.dimension_semantics<arbitrary>], iteration_bounds = array<i64: 1>, scalar_prefetch = 0 : i64, scratch_operands = 0 : i64, tpu.core_type = #tpu.core_type<tc>, window_params = [{pipeline_mode = #tpu.pipeline_mode<synchronous>, transform_indices = @transform_0, window_bounds = array<i64: 128, 32>}, {pipeline_mode = #tpu.pipeline_mode<synchronous>, transform_indices = @transform_1, window_bounds = array<i64: 1, 32>}, {pipeline_mode = #tpu.pipeline_mode<synchronous>, transform_indices = @transform_2, window_bounds = array<i64: 1, 32>}, {pipeline_mode = #tpu.pipeline_mode<synchronous>, transform_indices = @transform_3, window_bounds = array<i64: 32, 32>}, {pipeline_mode = #tpu.pipeline_mode<synchronous>, transform_indices = @transform_4, window_bounds = array<i64: 1, 32>}, {pipeline_mode = #tpu.pipeline_mode<synchronous>, transform_indices = @transform_5, window_bounds = array<i64: 32, 32>}, {pipeline_mode = #tpu.pipeline_mode<synchronous>, transform_indices = @transform_6, window_bounds = array<i64: 1, 32>}, {pipeline_mode = #tpu.pipeline_mode<synchronous>, transform_indices = @transform_7, window_bounds = array<i64: 32, 32>}, {pipeline_mode = #tpu.pipeline_mode<synchronous>, transform_indices = @transform_8, window_bounds = array<i64: 1, 32>}, {pipeline_mode = #tpu.pipeline_mode<synchronous>, transform_indices = @transform_9, window_bounds = array<i64: 4, 1, 32>}, {pipeline_mode = #tpu.pipeline_mode<synchronous>, transform_indices = @transform_10, window_bounds = array<i64: 4, 128, 128>}, {pipeline_mode = #tpu.pipeline_mode<synchronous>, transform_indices = @transform_11, window_bounds = array<i64: 32, 32>}, {pipeline_mode = #tpu.pipeline_mode<synchronous>, transform_indices = @transform_12, window_bounds = array<i64: 1, 32>}, {pipeline_mode = #tpu.pipeline_mode<synchronous>, transform_indices = @transform_13, window_bounds = array<i64: 1, 32>}, {pipeline_mode = #tpu.pipeline_mode<synchronous>, transform_indices = @transform_14, window_bounds = array<i64: 1, 32>}, {pipeline_mode = #tpu.pipeline_mode<synchronous>, transform_indices = @transform_15, window_bounds = array<i64: 32, 64>}, {pipeline_mode = #tpu.pipeline_mode<synchronous>, transform_indices = @transform_16, window_bounds = array<i64: 1, 64>}, {pipeline_mode = #tpu.pipeline_mode<synchronous>, transform_indices = @transform_17, window_bounds = array<i64: 64, 32>}, {pipeline_mode = #tpu.pipeline_mode<synchronous>, transform_indices = @transform_18, window_bounds = array<i64: 1, 32>}, {pipeline_mode = #tpu.pipeline_mode<synchronous>, transform_indices = @transform_19, window_bounds = array<i64: 128, 32>}]} {
    %c0 = arith.constant 0 : index
    %c0_0 = arith.constant 0 : index
    %0 = vector.load %arg1[%c0, %c0_0] : memref<128x32xf32, #tpu.memory_space<vmem>>, vector<128x32xf32>
    %cst = arith.constant dense<0.000000e+00> : vector<128xf32>
    %1 = vector.multi_reduction <add>, %0, %cst [1] : vector<128x32xf32> to vector<128xf32>
    %2 = vector.shape_cast %1 : vector<128xf32> to vector<128x1xf32>
    %cst_1 = arith.constant 3.200000e+01 : f32
    %3 = vector.broadcast %cst_1 : f32 to vector<128x1xf32>
    %4 = arith.divf %2, %3 : vector<128x1xf32>
    %5 = vector.broadcast %4 : vector<128x1xf32> to vector<128x32xf32>
    %6 = arith.subf %0, %5 : vector<128x32xf32>
    %7 = arith.mulf %6, %6 : vector<128x32xf32>
    %cst_2 = arith.constant dense<0.000000e+00> : vector<128xf32>
    %8 = vector.multi_reduction <add>, %7, %cst_2 [1] : vector<128x32xf32> to vector<128xf32>
    %9 = vector.shape_cast %8 : vector<128xf32> to vector<128x1xf32>
    %cst_3 = arith.constant 3.200000e+01 : f32
    %10 = vector.broadcast %cst_3 : f32 to vector<128x1xf32>
    %11 = arith.divf %9, %10 : vector<128x1xf32>
    %12 = vector.broadcast %4 : vector<128x1xf32> to vector<128x32xf32>
    %13 = arith.subf %0, %12 : vector<128x32xf32>
    %cst_4 = arith.constant 9.99999974E-6 : f32
    %14 = vector.broadcast %cst_4 : f32 to vector<128x1xf32>
    %15 = arith.addf %11, %14 : vector<128x1xf32>
    %16 = math.rsqrt %15 : vector<128x1xf32>
    %17 = vector.broadcast %16 : vector<128x1xf32> to vector<128x32xf32>
    %18 = arith.mulf %13, %17 : vector<128x32xf32>
    %c0_5 = arith.constant 0 : index
    %c0_6 = arith.constant 0 : index
    %19 = vector.load %arg2[%c0_5, %c0_6] : memref<1x32xf32, #tpu.memory_space<vmem>>, vector<1x32xf32>
    %20 = vector.broadcast %19 : vector<1x32xf32> to vector<128x32xf32>
    %21 = arith.mulf %18, %20 : vector<128x32xf32>
    %c0_7 = arith.constant 0 : index
    %c0_8 = arith.constant 0 : index
    %22 = vector.load %arg3[%c0_7, %c0_8] : memref<1x32xf32, #tpu.memory_space<vmem>>, vector<1x32xf32>
    %23 = vector.broadcast %22 : vector<1x32xf32> to vector<128x32xf32>
    %24 = arith.addf %21, %23 : vector<128x32xf32>
    %c0_9 = arith.constant 0 : index
    %c0_10 = arith.constant 0 : index
    %25 = vector.load %arg4[%c0_9, %c0_10] : memref<32x32xf32, #tpu.memory_space<vmem>>, vector<32x32xf32>
    %cst_11 = arith.constant dense<0.000000e+00> : vector<128x32xf32>
    %26 = tpu.matmul %24, %25, %cst_11 {dimension_numbers = #tpu.dot_dimension_numbers<[1], [0], [0], [1], [0, 0, 1, 1], [], []>} : vector<128x32xf32>, vector<32x32xf32>, vector<128x32xf32> -> vector<128x32xf32>
    %c0_12 = arith.constant 0 : index
    %c0_13 = arith.constant 0 : index
    %27 = vector.load %arg5[%c0_12, %c0_13] : memref<1x32xf32, #tpu.memory_space<vmem>>, vector<1x32xf32>
    %28 = vector.broadcast %27 : vector<1x32xf32> to vector<128x32xf32>
    %29 = arith.addf %26, %28 : vector<128x32xf32>
    %c0_14 = arith.constant 0 : index
    %c0_15 = arith.constant 0 : index
    %30 = vector.load %arg6[%c0_14, %c0_15] : memref<32x32xf32, #tpu.memory_space<vmem>>, vector<32x32xf32>
    %cst_16 = arith.constant dense<0.000000e+00> : vector<128x32xf32>
    %31 = tpu.matmul %24, %30, %cst_16 {dimension_numbers = #tpu.dot_dimension_numbers<[1], [0], [0], [1], [0, 0, 1, 1], [], []>} : vector<128x32xf32>, vector<32x32xf32>, vector<128x32xf32> -> vector<128x32xf32>
    %c0_17 = arith.constant 0 : index
    %c0_18 = arith.constant 0 : index
    %32 = vector.load %arg7[%c0_17, %c0_18] : memref<1x32xf32, #tpu.memory_space<vmem>>, vector<1x32xf32>
    %33 = vector.broadcast %32 : vector<1x32xf32> to vector<128x32xf32>
    %34 = arith.addf %31, %33 : vector<128x32xf32>
    %c0_19 = arith.constant 0 : index
    %c0_20 = arith.constant 0 : index
    %35 = vector.load %arg8[%c0_19, %c0_20] : memref<32x32xf32, #tpu.memory_space<vmem>>, vector<32x32xf32>
    %cst_21 = arith.constant dense<0.000000e+00> : vector<128x32xf32>
    %36 = tpu.matmul %24, %35, %cst_21 {dimension_numbers = #tpu.dot_dimension_numbers<[1], [0], [0], [1], [0, 0, 1, 1], [], []>} : vector<128x32xf32>, vector<32x32xf32>, vector<128x32xf32> -> vector<128x32xf32>
    %c0_22 = arith.constant 0 : index
    %c0_23 = arith.constant 0 : index
    %37 = vector.load %arg9[%c0_22, %c0_23] : memref<1x32xf32, #tpu.memory_space<vmem>>, vector<1x32xf32>
    %38 = vector.broadcast %37 : vector<1x32xf32> to vector<128x32xf32>
    %39 = arith.addf %36, %38 : vector<128x32xf32>
    %c0_24 = arith.constant 0 : index
    %c0_25 = arith.constant 0 : index
    %c0_26 = arith.constant 0 : index
    %40 = vector.load %arg10[%c0_24, %c0_25, %c0_26] : memref<4x1x32xf32, #tpu.memory_space<vmem>>, vector<4x1x32xf32>
    %41 = vector.shape_cast %29 : vector<128x32xf32> to vector<1x128x32xf32>
    %42 = vector.broadcast %41 : vector<1x128x32xf32> to vector<4x128x32xf32>
    %43 = vector.broadcast %40 : vector<4x1x32xf32> to vector<4x128x32xf32>
    %44 = arith.mulf %42, %43 : vector<4x128x32xf32>
    %45 = vector.shape_cast %44 : vector<4x128x32xf32> to vector<512x32xf32>
    "tpu.trace_start"() <{level = 10 : i32, message = "nc,mc->nm"}> : () -> ()
    %cst_27 = arith.constant dense<0.000000e+00> : vector<512x128xf32>
    %46 = tpu.matmul %45, %34, %cst_27 {dimension_numbers = #tpu.dot_dimension_numbers<[1], [1], [0], [0], [0, 0, 1, 0], [], []>} : vector<512x32xf32>, vector<128x32xf32>, vector<512x128xf32> -> vector<512x128xf32>
    "tpu.trace_stop"() : () -> ()
    %47 = vector.shape_cast %46 : vector<512x128xf32> to vector<4x128x128xf32>
    %c0_28 = arith.constant 0 : index
    %c0_29 = arith.constant 0 : index
    %c0_30 = arith.constant 0 : index
    %48 = vector.load %arg11[%c0_28, %c0_29, %c0_30] : memref<4x128x128xf32, #tpu.memory_space<vmem>>, vector<4x128x128xf32>
    %49 = arith.addf %47, %48 : vector<4x128x128xf32>
    %cst_31 = arith.constant dense<0xFF800000> : vector<4x128xf32>
    %50 = vector.multi_reduction <maximumf>, %49, %cst_31 [2] : vector<4x128x128xf32> to vector<4x128xf32>
    %51 = vector.shape_cast %50 : vector<4x128xf32> to vector<4x128x1xf32>
    %52 = vector.broadcast %51 : vector<4x128x1xf32> to vector<4x128x128xf32>
    %53 = arith.subf %49, %52 : vector<4x128x128xf32>
    %54 = math.exp %53 : vector<4x128x128xf32>
    %cst_32 = arith.constant dense<0.000000e+00> : vector<4x128xf32>
    %55 = vector.multi_reduction <add>, %54, %cst_32 [2] : vector<4x128x128xf32> to vector<4x128xf32>
    %56 = vector.shape_cast %55 : vector<4x128xf32> to vector<4x128x1xf32>
    %57 = tpu.reciprocal %56 {approx = true} : vector<4x128x1xf32> -> vector<4x128x1xf32>
    %58 = vector.broadcast %57 : vector<4x128x1xf32> to vector<4x128x128xf32>
    %59 = arith.mulf %54, %58 : vector<4x128x128xf32>
    %60 = vector.shape_cast %39 : vector<128x32xf32> to vector<1x128x32xf32>
    %61 = vector.broadcast %60 : vector<1x128x32xf32> to vector<4x128x32xf32>
    %62 = vector.broadcast %40 : vector<4x1x32xf32> to vector<4x128x32xf32>
    %63 = arith.mulf %61, %62 : vector<4x128x32xf32>
    "tpu.trace_start"() <{level = 10 : i32, message = "hnm,hmc->hnc"}> : () -> ()
    %cst_33 = arith.constant dense<0.000000e+00> : vector<4x128x32xf32>
    %64 = tpu.matmul %59, %63, %cst_33 {dimension_numbers = #tpu.dot_dimension_numbers<[2], [1], [1], [2], [0, 0, 0, 1, 1, 2], [0], [0]>} : vector<4x128x128xf32>, vector<4x128x32xf32>, vector<4x128x32xf32> -> vector<4x128x32xf32>
    "tpu.trace_stop"() : () -> ()
    %65 = vector.extract_strided_slice %64 {offsets = [0, 0, 0], sizes = [1, 128, 32], strides = [1, 1, 1]} : vector<4x128x32xf32> to vector<1x128x32xf32>
    %66 = vector.shape_cast %65 : vector<1x128x32xf32> to vector<128x32xf32>
    %67 = vector.extract_strided_slice %64 {offsets = [1, 0, 0], sizes = [1, 128, 32], strides = [1, 1, 1]} : vector<4x128x32xf32> to vector<1x128x32xf32>
    %68 = vector.shape_cast %67 : vector<1x128x32xf32> to vector<128x32xf32>
    %69 = arith.addf %66, %68 : vector<128x32xf32>
    %70 = vector.extract_strided_slice %64 {offsets = [2, 0, 0], sizes = [1, 128, 32], strides = [1, 1, 1]} : vector<4x128x32xf32> to vector<1x128x32xf32>
    %71 = vector.shape_cast %70 : vector<1x128x32xf32> to vector<128x32xf32>
    %72 = arith.addf %69, %71 : vector<128x32xf32>
    %73 = vector.extract_strided_slice %64 {offsets = [3, 0, 0], sizes = [1, 128, 32], strides = [1, 1, 1]} : vector<4x128x32xf32> to vector<1x128x32xf32>
    %74 = vector.shape_cast %73 : vector<1x128x32xf32> to vector<128x32xf32>
    %75 = arith.addf %72, %74 : vector<128x32xf32>
    %c0_34 = arith.constant 0 : index
    %c0_35 = arith.constant 0 : index
    %76 = vector.load %arg12[%c0_34, %c0_35] : memref<32x32xf32, #tpu.memory_space<vmem>>, vector<32x32xf32>
    %cst_36 = arith.constant dense<0.000000e+00> : vector<128x32xf32>
    %77 = tpu.matmul %75, %76, %cst_36 {dimension_numbers = #tpu.dot_dimension_numbers<[1], [0], [0], [1], [0, 0, 1, 1], [], []>} : vector<128x32xf32>, vector<32x32xf32>, vector<128x32xf32> -> vector<128x32xf32>
    %c0_37 = arith.constant 0 : index
    %c0_38 = arith.constant 0 : index
    %78 = vector.load %arg13[%c0_37, %c0_38] : memref<1x32xf32, #tpu.memory_space<vmem>>, vector<1x32xf32>
    %79 = vector.broadcast %78 : vector<1x32xf32> to vector<128x32xf32>
    %80 = arith.addf %77, %79 : vector<128x32xf32>
    %81 = arith.addf %0, %80 : vector<128x32xf32>
    %cst_39 = arith.constant dense<0.000000e+00> : vector<128xf32>
    %82 = vector.multi_reduction <add>, %81, %cst_39 [1] : vector<128x32xf32> to vector<128xf32>
    %83 = vector.shape_cast %82 : vector<128xf32> to vector<128x1xf32>
    %cst_40 = arith.constant 3.200000e+01 : f32
    %84 = vector.broadcast %cst_40 : f32 to vector<128x1xf32>
    %85 = arith.divf %83, %84 : vector<128x1xf32>
    %86 = vector.broadcast %85 : vector<128x1xf32> to vector<128x32xf32>
    %87 = arith.subf %81, %86 : vector<128x32xf32>
    %88 = arith.mulf %87, %87 : vector<128x32xf32>
    %cst_41 = arith.constant dense<0.000000e+00> : vector<128xf32>
    %89 = vector.multi_reduction <add>, %88, %cst_41 [1] : vector<128x32xf32> to vector<128xf32>
    %90 = vector.shape_cast %89 : vector<128xf32> to vector<128x1xf32>
    %cst_42 = arith.constant 3.200000e+01 : f32
    %91 = vector.broadcast %cst_42 : f32 to vector<128x1xf32>
    %92 = arith.divf %90, %91 : vector<128x1xf32>
    %93 = vector.broadcast %85 : vector<128x1xf32> to vector<128x32xf32>
    %94 = arith.subf %81, %93 : vector<128x32xf32>
    %cst_43 = arith.constant 9.99999974E-6 : f32
    %95 = vector.broadcast %cst_43 : f32 to vector<128x1xf32>
    %96 = arith.addf %92, %95 : vector<128x1xf32>
    %97 = math.rsqrt %96 : vector<128x1xf32>
    %98 = vector.broadcast %97 : vector<128x1xf32> to vector<128x32xf32>
    %99 = arith.mulf %94, %98 : vector<128x32xf32>
    %c0_44 = arith.constant 0 : index
    %c0_45 = arith.constant 0 : index
    %100 = vector.load %arg14[%c0_44, %c0_45] : memref<1x32xf32, #tpu.memory_space<vmem>>, vector<1x32xf32>
    %101 = vector.broadcast %100 : vector<1x32xf32> to vector<128x32xf32>
    %102 = arith.mulf %99, %101 : vector<128x32xf32>
    %c0_46 = arith.constant 0 : index
    %c0_47 = arith.constant 0 : index
    %103 = vector.load %arg15[%c0_46, %c0_47] : memref<1x32xf32, #tpu.memory_space<vmem>>, vector<1x32xf32>
    %104 = vector.broadcast %103 : vector<1x32xf32> to vector<128x32xf32>
    %105 = arith.addf %102, %104 : vector<128x32xf32>
    %c0_48 = arith.constant 0 : index
    %c0_49 = arith.constant 0 : index
    %106 = vector.load %arg16[%c0_48, %c0_49] : memref<32x64xf32, #tpu.memory_space<vmem>>, vector<32x64xf32>
    %cst_50 = arith.constant dense<0.000000e+00> : vector<128x64xf32>
    %107 = tpu.matmul %105, %106, %cst_50 {dimension_numbers = #tpu.dot_dimension_numbers<[1], [0], [0], [1], [0, 0, 1, 1], [], []>} : vector<128x32xf32>, vector<32x64xf32>, vector<128x64xf32> -> vector<128x64xf32>
    %c0_51 = arith.constant 0 : index
    %c0_52 = arith.constant 0 : index
    %108 = vector.load %arg17[%c0_51, %c0_52] : memref<1x64xf32, #tpu.memory_space<vmem>>, vector<1x64xf32>
    %109 = vector.broadcast %108 : vector<1x64xf32> to vector<128x64xf32>
    %110 = arith.addf %107, %109 : vector<128x64xf32>
    %cst_53 = arith.constant 5.000000e-01 : f32
    %111 = vector.broadcast %cst_53 : f32 to vector<128x64xf32>
    %112 = arith.mulf %111, %110 : vector<128x64xf32>
    %cst_54 = arith.constant 0.707106769 : f32
    %113 = vector.broadcast %cst_54 : f32 to vector<128x64xf32>
    %114 = arith.mulf %110, %113 : vector<128x64xf32>
    %115 = math.erf %114 : vector<128x64xf32>
    %cst_55 = arith.constant 1.000000e+00 : f32
    %116 = vector.broadcast %cst_55 : f32 to vector<128x64xf32>
    %117 = arith.addf %116, %115 : vector<128x64xf32>
    %118 = arith.mulf %112, %117 : vector<128x64xf32>
    %c0_56 = arith.constant 0 : index
    %c0_57 = arith.constant 0 : index
    %119 = vector.load %arg18[%c0_56, %c0_57] : memref<64x32xf32, #tpu.memory_space<vmem>>, vector<64x32xf32>
    %cst_58 = arith.constant dense<0.000000e+00> : vector<128x32xf32>
    %120 = tpu.matmul %118, %119, %cst_58 {dimension_numbers = #tpu.dot_dimension_numbers<[1], [0], [0], [1], [0, 0, 1, 1], [], []>} : vector<128x64xf32>, vector<64x32xf32>, vector<128x32xf32> -> vector<128x32xf32>
    %c0_59 = arith.constant 0 : index
    %c0_60 = arith.constant 0 : index
    %121 = vector.load %arg19[%c0_59, %c0_60] : memref<1x32xf32, #tpu.memory_space<vmem>>, vector<1x32xf32>
    %122 = vector.broadcast %121 : vector<1x32xf32> to vector<128x32xf32>
    %123 = arith.addf %120, %122 : vector<128x32xf32>
    %124 = arith.addf %81, %123 : vector<128x32xf32>
    %c0_61 = arith.constant 0 : index
    %c0_62 = arith.constant 0 : index
    %125 = vector.load %arg20[%c0_61, %c0_62] : memref<128x32xf32, #tpu.memory_space<vmem>>, vector<128x32xf32>
    tpu.vector_store %arg20[%c0_61, %c0_62], %124 {strides = array<i32>} : memref<128x32xf32, #tpu.memory_space<vmem>>, vector<128x32xf32>,
    return
  }
  func.func @transform_0(%arg0: i32) -> (i32, i32) {
    %c0_i32 = arith.constant 0 : i32
    %c0_i32_0 = arith.constant 0 : i32
    %c0_i32_1 = arith.constant 0 : i32
    return %c0_i32, %c0_i32_0 : i32, i32
  }
  func.func @transform_1(%arg0: i32) -> (i32, i32) {
    %c0_i32 = arith.constant 0 : i32
    %c0_i32_0 = arith.constant 0 : i32
    %c0_i32_1 = arith.constant 0 : i32
    return %c0_i32, %c0_i32_0 : i32, i32
  }
  func.func @transform_2(%arg0: i32) -> (i32, i32) {
    %c0_i32 = arith.constant 0 : i32
    %c0_i32_0 = arith.constant 0 : i32
    %c0_i32_1 = arith.constant 0 : i32
    return %c0_i32, %c0_i32_0 : i32, i32
  }
  func.func @transform_3(%arg0: i32) -> (i32, i32) {
    %c0_i32 = arith.constant 0 : i32
    %c0_i32_0 = arith.constant 0 : i32
    %c0_i32_1 = arith.constant 0 : i32
    return %c0_i32, %c0_i32_0 : i32, i32
  }
  func.func @transform_4(%arg0: i32) -> (i32, i32) {
    %c0_i32 = arith.constant 0 : i32
    %c0_i32_0 = arith.constant 0 : i32
    %c0_i32_1 = arith.constant 0 : i32
    return %c0_i32, %c0_i32_0 : i32, i32
  }
  func.func @transform_5(%arg0: i32) -> (i32, i32) {
    %c0_i32 = arith.constant 0 : i32
    %c0_i32_0 = arith.constant 0 : i32
    %c0_i32_1 = arith.constant 0 : i32
    return %c0_i32, %c0_i32_0 : i32, i32
  }
  func.func @transform_6(%arg0: i32) -> (i32, i32) {
    %c0_i32 = arith.constant 0 : i32
    %c0_i32_0 = arith.constant 0 : i32
    %c0_i32_1 = arith.constant 0 : i32
    return %c0_i32, %c0_i32_0 : i32, i32
  }
  func.func @transform_7(%arg0: i32) -> (i32, i32) {
    %c0_i32 = arith.constant 0 : i32
    %c0_i32_0 = arith.constant 0 : i32
    %c0_i32_1 = arith.constant 0 : i32
    return %c0_i32, %c0_i32_0 : i32, i32
  }
  func.func @transform_8(%arg0: i32) -> (i32, i32) {
    %c0_i32 = arith.constant 0 : i32
    %c0_i32_0 = arith.constant 0 : i32
    %c0_i32_1 = arith.constant 0 : i32
    return %c0_i32, %c0_i32_0 : i32, i32
  }
  func.func @transform_9(%arg0: i32) -> (i32, i32, i32) {
    %c0_i32 = arith.constant 0 : i32
    %c0_i32_0 = arith.constant 0 : i32
    %c0_i32_1 = arith.constant 0 : i32
    %c0_i32_2 = arith.constant 0 : i32
    return %c0_i32, %c0_i32_0, %c0_i32_1 : i32, i32, i32
  }
  func.func @transform_10(%arg0: i32) -> (i32, i32, i32) {
    %c0_i32 = arith.constant 0 : i32
    %c0_i32_0 = arith.constant 0 : i32
    %c0_i32_1 = arith.constant 0 : i32
    %c0_i32_2 = arith.constant 0 : i32
    return %c0_i32, %c0_i32_0, %c0_i32_1 : i32, i32, i32
  }
  func.func @transform_11(%arg0: i32) -> (i32, i32) {
    %c0_i32 = arith.constant 0 : i32
    %c0_i32_0 = arith.constant 0 : i32
    %c0_i32_1 = arith.constant 0 : i32
    return %c0_i32, %c0_i32_0 : i32, i32
  }
  func.func @transform_12(%arg0: i32) -> (i32, i32) {
    %c0_i32 = arith.constant 0 : i32
    %c0_i32_0 = arith.constant 0 : i32
    %c0_i32_1 = arith.constant 0 : i32
    return %c0_i32, %c0_i32_0 : i32, i32
  }
  func.func @transform_13(%arg0: i32) -> (i32, i32) {
    %c0_i32 = arith.constant 0 : i32
    %c0_i32_0 = arith.constant 0 : i32
    %c0_i32_1 = arith.constant 0 : i32
    return %c0_i32, %c0_i32_0 : i32, i32
  }
  func.func @transform_14(%arg0: i32) -> (i32, i32) {
    %c0_i32 = arith.constant 0 : i32
    %c0_i32_0 = arith.constant 0 : i32
    %c0_i32_1 = arith.constant 0 : i32
    return %c0_i32, %c0_i32_0 : i32, i32
  }
  func.func @transform_15(%arg0: i32) -> (i32, i32) {
    %c0_i32 = arith.constant 0 : i32
    %c0_i32_0 = arith.constant 0 : i32
    %c0_i32_1 = arith.constant 0 : i32
    return %c0_i32, %c0_i32_0 : i32, i32
  }
  func.func @transform_16(%arg0: i32) -> (i32, i32) {
    %c0_i32 = arith.constant 0 : i32
    %c0_i32_0 = arith.constant 0 : i32
    %c0_i32_1 = arith.constant 0 : i32
    return %c0_i32, %c0_i32_0 : i32, i32
  }
  func.func @transform_17(%arg0: i32) -> (i32, i32) {
    %c0_i32 = arith.constant 0 : i32
    %c0_i32_0 = arith.constant 0 : i32
    %c0_i32_1 = arith.constant 0 : i32
    return %c0_i32, %c0_i32_0 : i32, i32
  }
  func.func @transform_18(%arg0: i32) -> (i32, i32) {
    %c0_i32 = arith.constant 0 : i32
    %c0_i32_0 = arith.constant 0 : i32
    %c0_i32_1 = arith.constant 0 : i32
    return %c0_i32, %c0_i32_0 : i32, i32
  }
  func.func @transform_19(%arg0: i32) -> (i32, i32) {
    %c0_i32 = arith.constant 0 : i32
    %c0_i32_0 = arith.constant 0 : i32
    %c0_i32_1 = arith.constant 0 : i32
    return %c0_i32, %c0_i32_0 : i32, i32
  }
}

</mosaic_0001>

<bundles_post_ra>
// kernel: swin_block_forward.1
= control target key start
LH: loop header
LB: loop body
LE: loop exit
PB: predicated region body
PF: predicated region fallthrough
CT: control target
= control target key end

     0   :  { %s8369_s0 = inlined_call_operand.hbm [shape: f32[128,32], index: 0, kind: input, shape index: {}]   ;;  %s8370_s1 = inlined_call_operand.hbm [shape: f32[1,32], index: 1, kind: input, shape index: {}]   ;;  %s8371_s2 = inlined_call_operand.hbm [shape: f32[1,32], index: 2, kind: input, shape index: {}]   ;;  %s8372_s3 = inlined_call_operand.vmem [shape: f32[32,32], index: 3, kind: input, shape index: {}]   ;;  %s8373_s4 = inlined_call_operand.hbm [shape: f32[1,32], index: 4, kind: input, shape index: {}]   ;;  %s8374_s5 = inlined_call_operand.vmem [shape: f32[32,32], index: 5, kind: input, shape index: {}]   ;;  %s8375_s6 = inlined_call_operand.hbm [shape: f32[1,32], index: 6, kind: input, shape index: {}]   ;;  %s8376_s7 = inlined_call_operand.vmem [shape: f32[32,32], index: 7, kind: input, shape index: {}]   ;;  %s8377_s8 = inlined_call_operand.hbm [shape: f32[1,32], index: 8, kind: input, shape index: {}]   ;;  %s8378_s9 = inlined_call_operand.hbm [shape: f32[4,1,32], index: 9, kind: input, shape index: {}]   ;;  %s8379_s10 = inlined_call_operand.hbm [shape: f32[4,128,128], index: 10, kind: input, shape index: {}]   ;;  %s8380_s11 = inlined_call_operand.vmem [shape: f32[32,32], index: 11, kind: input, shape index: {}]   ;;  %s8381_s12 = inlined_call_operand.hbm [shape: f32[1,32], index: 12, kind: input, shape index: {}]   ;;  %s8382_s13 = inlined_call_operand.hbm [shape: f32[1,32], index: 13, kind: input, shape index: {}]   ;;  %s8383_s14 = inlined_call_operand.hbm [shape: f32[1,32], index: 14, kind: input, shape index: {}]   ;;  %s8384_s15 = inlined_call_operand.hbm [shape: f32[32,64], index: 15, kind: input, shape index: {}]   ;;  %s8385_s16 = inlined_call_operand.hbm [shape: f32[1,64], index: 16, kind: input, shape index: {}]   ;;  %s8386_s17 = inlined_call_operand.vmem [shape: f32[64,32], index: 17, kind: input, shape index: {}]   ;;  %s8387_s18 = inlined_call_operand.hbm [shape: f32[1,32], index: 18, kind: input, shape index: {}]   ;;  %s8388_s19 = inlined_call_operand.hbm [shape: f32[128,32], index: 19, kind: output, shape index: {}]  }
   0x1   :  { %8455 = sst [smem:[#allocation77_spill]] %s8369_s0 }
   0x2   :  { %8456 = sst [smem:[#allocation78_spill]] %s8370_s1 }
   0x3   :  { %8457 = sst [smem:[#allocation79_spill]] %s8371_s2 }
   0x4   :  { %8458 = sst [smem:[#allocation80_spill]] %s8372_s3 }
   0x5   :  { %24 = vsyncpa [#allocation3], 0 }
   0x6   :  { %25 = vsyncpa [#allocation6], 0 }
   0x7   :  { %26 = vsyncpa [#allocation9], 0 }
   0x8   :  { %27 = vsyncpa [#allocation12], 0 }
   0x9   :  { %28 = vsyncpa [#allocation15], 0 }
   0xa   :  { %29 = vsyncpa [#allocation18], 0 }
   0xb   :  { %30 = vsyncpa [#allocation21], 0 }
   0xc   :  { %31 = vsyncpa [#allocation24], 0 }
   0xd   :  { %32 = vsyncpa [#allocation4], 0  ;;  %s6250_s0 = smov [#allocation5]   ;;  %s6251_s20 = smov [#allocation8]  }
   0xe   :  { %s51_s30 = sshll.u32 %s6250_s0, 4  ;;  %s73_s21 = sshll.u32 %s6251_s20, 4  ;;  %s52_s30 = int_to_ptr.vmem [resolvable:$true] %s51_s30  ;;  %s74_s21 = int_to_ptr.vmem [resolvable:$true] %s73_s21 }
   0xf   :  { %s8459_s2 = sld [smem:[#allocation78_spill]] }
  0x15   :  { %s5902_s23 = scalar_lea.hbm %s8459_s2, 16 }
  0x16   :  { %p5903_p0 = scmp.ne.s32.totalorder %s8459_s2, %s5902_s23  ;;  %p5906_p1 = scmp.lt.u32.totalorder %s5902_s23, %s8459_s2 }
  0x18   :  { %p5908_p2 = pnand %p5906_p1, %p5903_p0 }
  0x1a   :  { %5911 = shalt.err (!%p5908_p2)
}
  0x1b   :  { %s5912_s27 = scalar_lea.vmem %s52_s30, 16  ;;  %s5916_s28 = scalar_lea.vmem %s52_s30, 32 }
  0x1c   :  { %p5913_p3 = scmp.ne.s32.totalorder %s52_s30, %s5912_s27  ;;  %p5917_p4 = scmp.lt.s32.totalorder %s52_s30, %s52_s30 }
  0x1d   :  { %p5918_p5 = scmp.lt.s32.totalorder %s5916_s28, %s5912_s27 }
  0x1f   :  { %p5919_p6 = por %p5918_p5, %p5917_p4 }
  0x21   :  { %p5920_p7 = pnand %p5919_p6, %p5913_p3 }
  0x23   :  { %5923 = shalt.err (!%p5920_p7)
}
  0x24   :  { %54 = dma.hbm_to_vmem [thread:$0]  %s8459_s2, 16, %s52_s30, [#allocation6]  }
  0x25   :  { %s5924_s22 = scalar_lea.hbm %s8373_s4, 16 }
  0x26   :  { %p5925_p8 = scmp.ne.s32.totalorder %s8373_s4, %s5924_s22  ;;  %p5928_p9 = scmp.lt.u32.totalorder %s5924_s22, %s8373_s4 }
  0x28   :  { %p5930_p10 = pnand %p5928_p9, %p5925_p8 }
  0x2a   :  { %5933 = shalt.err (!%p5930_p10)
}
  0x2b   :  { %s5934_s26 = scalar_lea.vmem %s74_s21, 16  ;;  %s5938_s27 = scalar_lea.vmem %s74_s21, 32 }
  0x2c   :  { %p5935_p11 = scmp.ne.s32.totalorder %s74_s21, %s5934_s26  ;;  %p5939_p12 = scmp.lt.s32.totalorder %s74_s21, %s74_s21 }
  0x2d   :  { %p5940_p13 = scmp.lt.s32.totalorder %s5938_s27, %s5934_s26 }
  0x2f   :  { %p5941_p0 = por %p5940_p13, %p5939_p12 }
  0x31   :  { %p5942_p1 = pnand %p5941_p0, %p5935_p11 }
  0x33   :  { %5945 = shalt.err (!%p5942_p1)
}
  0x34   :  { %76 = dma.hbm_to_vmem [thread:$0]  %s8373_s4, 16, %s74_s21, [#allocation9]  }
  0x35   :  { %s6252_s28 = smov [#allocation11]   ;;  %s5946_s1 = scalar_lea.hbm %s8377_s8, 16 }
  0x36   :  { %s97_s29 = sshll.u32 %s6252_s28, 4  ;;  %p5947_p2 = scmp.ne.s32.totalorder %s8377_s8, %s5946_s1  ;;  %s98_s29 = int_to_ptr.vmem [resolvable:$true] %s97_s29 }
  0x37   :  { %p5950_p3 = scmp.lt.u32.totalorder %s5946_s1, %s8377_s8 }
  0x39   :  { %p5952_p4 = pnand %p5950_p3, %p5947_p2 }
  0x3b   :  { %5955 = shalt.err (!%p5952_p4)
}
  0x3c   :  { %s5956_s3 = scalar_lea.vmem %s98_s29, 16  ;;  %s5960_s4 = scalar_lea.vmem %s98_s29, 32 }
  0x3d   :  { %p5957_p5 = scmp.ne.s32.totalorder %s98_s29, %s5956_s3  ;;  %p5961_p6 = scmp.lt.s32.totalorder %s98_s29, %s98_s29 }
  0x3e   :  { %p5962_p7 = scmp.lt.s32.totalorder %s5960_s4, %s5956_s3 }
  0x40   :  { %p5963_p8 = por %p5962_p7, %p5961_p6 }
  0x42   :  { %p5964_p9 = pnand %p5963_p8, %p5957_p5 }
  0x44   :  { %5967 = shalt.err (!%p5964_p9)
}
  0x45   :  { %100 = dma.hbm_to_vmem [thread:$0]  %s8377_s8, 16, %s98_s29, [#allocation12]  }
  0x46   :  { %s6253_s27 = smov [#allocation14]   ;;  %s6254_s2 = smov [#allocation17]  }
  0x47   :  { %s118_s30 = sshll.u32 %s6253_s27, 4  ;;  %s143_s28 = sshll.u32 %s6254_s2, 4  ;;  %s119_s30 = int_to_ptr.vmem [resolvable:$true] %s118_s30  ;;  %s144_s28 = int_to_ptr.vmem [resolvable:$true] %s143_s28 }
  0x48   :  { %s5968_s1 = scalar_lea.hbm %s8379_s10, 8192 }
  0x49   :  { %p5969_p10 = scmp.ne.s32.totalorder %s8379_s10, %s5968_s1  ;;  %p5972_p11 = scmp.lt.u32.totalorder %s5968_s1, %s8379_s10 }
  0x4b   :  { %p5974_p12 = pnand %p5972_p11, %p5969_p10 }
  0x4d   :  { %5977 = shalt.err (!%p5974_p12)
}
  0x4e   :  { %s5978_s8 = scalar_lea.vmem %s119_s30, 8192  ;;  %p5983_p0 = scmp.lt.s32.totalorder %s119_s30, %s119_s30 }
  0x4f   :  { %p5979_p13 = scmp.ne.s32.totalorder %s119_s30, %s5978_s8  ;;  %p5984_p1 = scmp.lt.s32.totalorder %s5978_s8, %s5978_s8 }
  0x51   :  { %p5985_p2 = por %p5984_p1, %p5983_p0 }
  0x53   :  { %p5986_p3 = pnand %p5985_p2, %p5979_p13 }
  0x55   :  { %5989 = shalt.err (!%p5986_p3)
}
  0x56   :  { %s6255_s29 = smov 128   ;;  %s6256_s3 = smov 8  }
  0x57   :  { %124 = dma.hbm_to_vmem [thread:$0]  %s8379_s10, 8192, %s119_s30, [#allocation15], %s6255_s29, %s6255_s29, %s6256_s3  }
  0x58   :  { %s5990_s2 = scalar_lea.hbm %s8382_s13, 16 }
  0x59   :  { %p5991_p4 = scmp.ne.s32.totalorder %s8382_s13, %s5990_s2  ;;  %p5994_p5 = scmp.lt.u32.totalorder %s5990_s2, %s8382_s13 }
  0x5b   :  { %p5996_p6 = pnand %p5994_p5, %p5991_p4 }
  0x5d   :  { %5999 = shalt.err (!%p5996_p6)
}
  0x5e   :  { %s6000_s24 = scalar_lea.vmem %s144_s28, 16  ;;  %s6004_s23 = scalar_lea.vmem %s144_s28, 32 }
  0x5f   :  { %p6001_p7 = scmp.ne.s32.totalorder %s144_s28, %s6000_s24  ;;  %p6005_p8 = scmp.lt.s32.totalorder %s144_s28, %s144_s28 }
  0x60   :  { %p6006_p9 = scmp.lt.s32.totalorder %s6004_s23, %s6000_s24 }
  0x62   :  { %p6007_p10 = por %p6006_p9, %p6005_p8 }
  0x64   :  { %p6008_p11 = pnand %p6007_p10, %p6001_p7 }
  0x66   :  { %6011 = shalt.err (!%p6008_p11)
}
  0x67   :  { %146 = dma.hbm_to_vmem [thread:$0]  %s8382_s13, 16, %s144_s28, [#allocation18]  }
  0x68   :  { %s6257_s25 = smov [#allocation20]   ;;  %s6258_s4 = smov [#allocation2]  }
  0x69   :  { %s162_s8 = sshll.u32 %s6257_s25, 4  ;;  %s38_s21 = sshll.u32 %s6258_s4, 4  ;;  %s163_s8 = int_to_ptr.vmem [resolvable:$true] %s162_s8  ;;  %s39_s21 = int_to_ptr.vmem [resolvable:$true] %s38_s21 }
  0x6a   :  { %s6012_s2 = scalar_lea.hbm %s8384_s15, 512 }
  0x6b   :  { %p6013_p12 = scmp.ne.s32.totalorder %s8384_s15, %s6012_s2  ;;  %p6016_p13 = scmp.lt.u32.totalorder %s6012_s2, %s8384_s15 }
  0x6d   :  { %p6018_p0 = pnand %p6016_p13, %p6013_p12 }
  0x6f   :  { %6021 = shalt.err (!%p6018_p0)
}
  0x70   :  { %s6022_s13 = scalar_lea.vmem %s163_s8, 512  ;;  %p6027_p2 = scmp.lt.s32.totalorder %s163_s8, %s163_s8 }
  0x71   :  { %p6023_p1 = scmp.ne.s32.totalorder %s163_s8, %s6022_s13  ;;  %p6028_p3 = scmp.lt.s32.totalorder %s6022_s13, %s6022_s13 }
  0x73   :  { %p6029_p4 = por %p6028_p3, %p6027_p2 }
  0x75   :  { %p6030_p5 = pnand %p6029_p4, %p6023_p1 }
  0x77   :  { %6033 = shalt.err (!%p6030_p5)
}
  0x78   :  { %168 = dma.hbm_to_vmem [thread:$0]  %s8384_s15, 512, %s163_s8, [#allocation21], %s6255_s29, %s6255_s29, %s6256_s3  }
  0x79   :  { %s8460_s30 = sld [smem:[#allocation77_spill]] }
  0x7f   :  { %s6034_s25 = scalar_lea.hbm %s8460_s30, 2048 }
  0x80   :  { %p6035_p6 = scmp.ne.s32.totalorder %s8460_s30, %s6034_s25  ;;  %p6038_p7 = scmp.lt.u32.totalorder %s6034_s25, %s8460_s30 }
  0x82   :  { %p6040_p8 = pnand %p6038_p7, %p6035_p6 }
  0x84   :  { %6043 = shalt.err (!%p6040_p8)
}
  0x85   :  { %s6044_s0 = scalar_lea.vmem %s39_s21, 2048  ;;  %p6049_p10 = scmp.lt.s32.totalorder %s39_s21, %s39_s21 }
  0x86   :  { %p6045_p9 = scmp.ne.s32.totalorder %s39_s21, %s6044_s0  ;;  %p6050_p11 = scmp.lt.s32.totalorder %s6044_s0, %s6044_s0 }
  0x88   :  { %p6051_p12 = por %p6050_p11, %p6049_p10 }
  0x8a   :  { %p6052_p13 = pnand %p6051_p12, %p6045_p9 }
  0x8c   :  { %6055 = shalt.err (!%p6052_p13)
}
  0x8d   :  { %44 = dma.hbm_to_vmem [thread:$0]  %s8460_s30, 2048, %s39_s21, [#allocation3], %s6255_s29, %s6255_s29, %s6256_s3  }
  0x8e   :  { %s6259_s20 = smov [#allocation7]   ;;  %s6260_s22 = smov [#allocation10]  }
  0x8f   :  { %s61_s1 = sshll.u32 %s6259_s20, 4  ;;  %s85_s13 = sshll.u32 %s6260_s22, 4  ;;  %s62_s1 = int_to_ptr.vmem [resolvable:$true] %s61_s1  ;;  %s86_s13 = int_to_ptr.vmem [resolvable:$true] %s85_s13 }
  0x90   :  { %s8461_s23 = sld [smem:[#allocation79_spill]] }
  0x96   :  { %s6056_s10 = scalar_lea.hbm %s8461_s23, 16 }
  0x97   :  { %p6057_p0 = scmp.ne.s32.totalorder %s8461_s23, %s6056_s10  ;;  %p6060_p1 = scmp.lt.u32.totalorder %s6056_s10, %s8461_s23 }
  0x99   :  { %p6062_p2 = pnand %p6060_p1, %p6057_p0 }
  0x9b   :  { %6065 = shalt.err (!%p6062_p2)
}
  0x9c   :  { %s6066_s21 = scalar_lea.vmem %s62_s1, 16  ;;  %s6070_s30 = scalar_lea.vmem %s62_s1, 32 }
  0x9d   :  { %p6067_p3 = scmp.ne.s32.totalorder %s62_s1, %s6066_s21  ;;  %p6071_p4 = scmp.lt.s32.totalorder %s62_s1, %s62_s1 }
  0x9e   :  { %p6072_p5 = scmp.lt.s32.totalorder %s6070_s30, %s6066_s21 }
  0xa0   :  { %p6073_p6 = por %p6072_p5, %p6071_p4 }
  0xa2   :  { %p6074_p7 = pnand %p6073_p6, %p6067_p3 }
  0xa4   :  { %6077 = shalt.err (!%p6074_p7)
}
  0xa5   :  { %64 = dma.hbm_to_vmem [thread:$0]  %s8461_s23, 16, %s62_s1, [#allocation6]  }
  0xa6   :  { %s6078_s20 = scalar_lea.hbm %s8375_s6, 16 }
  0xa7   :  { %p6079_p8 = scmp.ne.s32.totalorder %s8375_s6, %s6078_s20  ;;  %p6082_p9 = scmp.lt.u32.totalorder %s6078_s20, %s8375_s6 }
  0xa9   :  { %p6084_p10 = pnand %p6082_p9, %p6079_p8 }
  0xab   :  { %6087 = shalt.err (!%p6084_p10)
}
  0xac   :  { %s6088_s25 = scalar_lea.vmem %s86_s13, 16  ;;  %s6092_s4 = scalar_lea.vmem %s86_s13, 32 }
  0xad   :  { %p6089_p11 = scmp.ne.s32.totalorder %s86_s13, %s6088_s25  ;;  %p6093_p12 = scmp.lt.s32.totalorder %s86_s13, %s86_s13 }
  0xae   :  { %p6094_p13 = scmp.lt.s32.totalorder %s6092_s4, %s6088_s25 }
  0xb0   :  { %p6095_p0 = por %p6094_p13, %p6093_p12 }
  0xb2   :  { %p6096_p1 = pnand %p6095_p0, %p6089_p11 }
  0xb4   :  { %6099 = shalt.err (!%p6096_p1)
}
  0xb5   :  { %88 = dma.hbm_to_vmem [thread:$0]  %s8375_s6, 16, %s86_s13, [#allocation9]  }
  0xb6   :  { %s6261_s26 = smov [#allocation13]   ;;  %s6100_s2 = scalar_lea.hbm %s8378_s9, 64 }
  0xb7   :  { %s106_s27 = sshll.u32 %s6261_s26, 4  ;;  %p6101_p2 = scmp.ne.s32.totalorder %s8378_s9, %s6100_s2  ;;  %s107_s27 = int_to_ptr.vmem [resolvable:$true] %s106_s27 }
  0xb8   :  { %p6104_p3 = scmp.lt.u32.totalorder %s6100_s2, %s8378_s9 }
  0xba   :  { %p6106_p4 = pnand %p6104_p3, %p6101_p2 }
  0xbc   :  { %6109 = shalt.err (!%p6106_p4)
}
  0xbd   :  { %s6110_s22 = scalar_lea.vmem %s107_s27, 64  ;;  %p6115_p6 = scmp.lt.s32.totalorder %s107_s27, %s107_s27 }
  0xbe   :  { %p6111_p5 = scmp.ne.s32.totalorder %s107_s27, %s6110_s22  ;;  %p6116_p7 = scmp.lt.s32.totalorder %s6110_s22, %s6110_s22 }
  0xc0   :  { %p6117_p8 = por %p6116_p7, %p6115_p6 }
  0xc2   :  { %p6118_p9 = pnand %p6117_p8, %p6111_p5 }
  0xc4   :  { %6121 = shalt.err (!%p6118_p9)
}
  0xc5   :  { %s6262_s6 = smov 16   ;;  %s6263_s13 = smov 1  }
  0xc6   :  { %112 = dma.hbm_to_vmem [thread:$0]  %s8378_s9, 64, %s107_s27, [#allocation12], %s6262_s6, %s6262_s6, %s6263_s13  }
  0xc7   :  { %s6264_s10 = smov [#allocation16]   ;;  %s6265_s4 = smov [#allocation19]  }
  0xc8   :  { %s133_s25 = sshll.u32 %s6264_s10, 4  ;;  %s153_s1 = sshll.u32 %s6265_s4, 4  ;;  %s134_s25 = int_to_ptr.vmem [resolvable:$true] %s133_s25  ;;  %s154_s1 = int_to_ptr.vmem [resolvable:$true] %s153_s1 }
  0xc9   :  { %s6122_s21 = scalar_lea.hbm %s8381_s12, 16 }
  0xca   :  { %p6123_p10 = scmp.ne.s32.totalorder %s8381_s12, %s6122_s21  ;;  %p6126_p11 = scmp.lt.u32.totalorder %s6122_s21, %s8381_s12 }
  0xcc   :  { %p6128_p12 = pnand %p6126_p11, %p6123_p10 }
  0xce   :  { %6131 = shalt.err (!%p6128_p12)
}
  0xcf   :  { %s6132_s9 = scalar_lea.vmem %s134_s25, 16  ;;  %s6136_s27 = scalar_lea.vmem %s134_s25, 32 }
  0xd0   :  { %p6133_p13 = scmp.ne.s32.totalorder %s134_s25, %s6132_s9  ;;  %p6137_p0 = scmp.lt.s32.totalorder %s134_s25, %s134_s25 }
  0xd1   :  { %p6138_p1 = scmp.lt.s32.totalorder %s6136_s27, %s6132_s9 }
  0xd3   :  { %p6139_p2 = por %p6138_p1, %p6137_p0 }
  0xd5   :  { %p6140_p3 = pnand %p6139_p2, %p6133_p13 }
  0xd7   :  { %6143 = shalt.err (!%p6140_p3)
}
  0xd8   :  { %136 = dma.hbm_to_vmem [thread:$0]  %s8381_s12, 16, %s134_s25, [#allocation15]  }
  0xd9   :  { %s6144_s13 = scalar_lea.hbm %s8383_s14, 16 }
  0xda   :  { %p6145_p4 = scmp.ne.s32.totalorder %s8383_s14, %s6144_s13  ;;  %p6148_p5 = scmp.lt.u32.totalorder %s6144_s13, %s8383_s14 }
  0xdc   :  { %p6150_p6 = pnand %p6148_p5, %p6145_p4 }
  0xde   :  { %6153 = shalt.err (!%p6150_p6)
}
  0xdf   :  { %s6154_s23 = scalar_lea.vmem %s154_s1, 16  ;;  %s6158_s26 = scalar_lea.vmem %s154_s1, 32 }
  0xe0   :  { %p6155_p7 = scmp.ne.s32.totalorder %s154_s1, %s6154_s23  ;;  %p6159_p8 = scmp.lt.s32.totalorder %s154_s1, %s154_s1 }
  0xe1   :  { %p6160_p9 = scmp.lt.s32.totalorder %s6158_s26, %s6154_s23 }
  0xe3   :  { %p6161_p10 = por %p6160_p9, %p6159_p8 }
  0xe5   :  { %p6162_p11 = pnand %p6161_p10, %p6155_p7 }
  0xe7   :  { %6165 = shalt.err (!%p6162_p11)
}
  0xe8   :  { %156 = dma.hbm_to_vmem [thread:$0]  %s8383_s14, 16, %s154_s1, [#allocation18]  }
  0xe9   :  { %s6266_s21 = smov [#allocation22]   ;;  %s6267_s2 = smov [#allocation23]  }
  0xea   :  { %s175_s30 = sshll.u32 %s6266_s21, 4  ;;  %s187_s0 = sshll.u32 %s6267_s2, 4  ;;  %s176_s30 = int_to_ptr.vmem [resolvable:$true] %s175_s30  ;;  %s188_s0 = int_to_ptr.vmem [resolvable:$true] %s187_s0 }
  0xeb   :  { %s6166_s27 = scalar_lea.hbm %s8385_s16, 16 }
  0xec   :  { %p6167_p12 = scmp.ne.s32.totalorder %s8385_s16, %s6166_s27  ;;  %p6170_p13 = scmp.lt.u32.totalorder %s6166_s27, %s8385_s16 }
  0xee   :  { %p6172_p0 = pnand %p6170_p13, %p6167_p12 }
  0xf0   :  { %6175 = shalt.err (!%p6172_p0)
}
  0xf1   :  { %s6176_s14 = scalar_lea.vmem %s176_s30, 16  ;;  %s6180_s1 = scalar_lea.vmem %s176_s30, 32 }
  0xf2   :  { %p6177_p1 = scmp.ne.s32.totalorder %s176_s30, %s6176_s14  ;;  %p6181_p2 = scmp.lt.s32.totalorder %s176_s30, %s176_s30 }
  0xf3   :  { %p6182_p3 = scmp.lt.s32.totalorder %s6180_s1, %s6176_s14 }
  0xf5   :  { %p6183_p4 = por %p6182_p3, %p6181_p2 }
  0xf7   :  { %p6184_p5 = pnand %p6183_p4, %p6177_p1 }
  0xf9   :  { %6187 = shalt.err (!%p6184_p5)
}
  0xfa   :  { %178 = dma.hbm_to_vmem [thread:$0]  %s8385_s16, 16, %s176_s30, [#allocation21]  }
  0xfb   :  { %s6188_s4 = scalar_lea.hbm %s8387_s18, 16 }
  0xfc   :  { %p6189_p6 = scmp.ne.s32.totalorder %s8387_s18, %s6188_s4  ;;  %p6192_p7 = scmp.lt.u32.totalorder %s6188_s4, %s8387_s18 }
  0xfe   :  { %p6194_p8 = pnand %p6192_p7, %p6189_p6 }
 0x100   :  { %6197 = shalt.err (!%p6194_p8)
}
 0x101   :  { %s6198_s21 = scalar_lea.vmem %s188_s0, 16  ;;  %s6202_s2 = scalar_lea.vmem %s188_s0, 32 }
 0x102   :  { %p6199_p9 = scmp.ne.s32.totalorder %s188_s0, %s6198_s21  ;;  %p6203_p10 = scmp.lt.s32.totalorder %s188_s0, %s188_s0 }
 0x103   :  { %p6204_p11 = scmp.lt.s32.totalorder %s6202_s2, %s6198_s21 }
 0x105   :  { %p6205_p12 = por %p6204_p11, %p6203_p10 }
 0x107   :  { %p6206_p13 = pnand %p6205_p12, %p6199_p9 }
 0x109   :  { %6209 = shalt.err (!%p6206_p13)
}
 0x10a   :  { %190 = dma.hbm_to_vmem [thread:$0]  %s8387_s18, 16, %s188_s0, [#allocation24]  }
 0x10b   :  { %6232 = dma.done.wait [#allocation3], 2048  }
 0x10c   :  { %6233 = vsyncadd [#allocation3], 4294965248 }
 0x10d   :  { %6234 = dma.done.wait [#allocation6], 32  }
 0x10e   :  { %6235 = vsyncadd [#allocation6], 4294967264 }
 0x10f   :  { %6236 = dma.done.wait [#allocation9], 32  }
 0x110   :  { %6237 = vsyncadd [#allocation9], 4294967264 }
 0x111   :  { %6238 = dma.done.wait [#allocation12], 80  }
 0x112   :  { %6239 = vsyncadd [#allocation12], 4294967216 }
 0x113   :  { %6240 = dma.done.wait [#allocation15], 8208  }
 0x114   :  { %6241 = vsyncadd [#allocation15], 4294959088 }
 0x115   :  { %6242 = dma.done.wait [#allocation18], 32  }
 0x116   :  { %6243 = vsyncadd [#allocation18], 4294967264 }
 0x117   :  { %6244 = dma.done.wait [#allocation21], 528  }
 0x118   :  { %6245 = vsyncadd [#allocation21], 4294966768 }
 0x119   :  { %6246 = dma.done.wait [#allocation24], 16  }
 0x11a   :  { %6247 = vsyncadd [#allocation24], 4294967280  ;;  %vm249_vm0 = vcmask 261120   ;;  %v241_v0 = vld [vmem:[#allocation2 + $0x40] sm:$0xff]  ;;  %v243_v1 = vld [vmem:[#allocation2 + $0x50] sm:$0xff]  ;;  %s8462_s15 = sld [smem:[#allocation80_spill]] }
 0x11b   :  { %v242_v2 = vld [vmem:[#allocation2 + $0x48] sm:$0xff]  ;;  %v274_v3 = vsel %vm249_vm0, %v241_v0, 0.0  ;;  %v280_v4 = vsel %vm249_vm0, %v243_v1, 0.0  ;;  %v244_v5 = vld [vmem:[#allocation2 + $0x58] sm:$0xff]  ;;  %v245_v8 = vld [vmem:[#allocation2 + $0x60] sm:$0xff]  ;;  %vm3907_vm2 = vcmask 523264  }
 0x11c   :  { %275 = vadd.xlane.f32.xlu0 %v274_v3  ;;  %281 = vadd.xlane.f32.xlu1 %v280_v4  ;;  %v277_v6 = vsel %vm249_vm0, %v242_v2, 0.0  ;;  %v283_v7 = vsel %vm249_vm0, %v244_v5, 0.0  ;;  %v246_v9 = vld [vmem:[#allocation2 + $0x68] sm:$0xff]  ;;  %v286_v10 = vsel %vm249_vm0, %v245_v8, 0.0  ;;  %v6552_v12 = vld [vmem:[#allocation2 + $0x70] sm:$0xff]  ;;  %v6554_v13 = vld [vmem:[#allocation2 + $0x78] sm:$0xff] }
 0x11d   :  { %v289_v11 = vsel %vm249_vm0, %v246_v9, 0.0  ;;  %v292_v14 = vsel %vm249_vm0, %v6552_v12, 0.0  ;;  %v295_v15 = vsel %vm249_vm0, %v6554_v13, 0.0  ;;  %v6560_v16 = vld [vmem:[#allocation2] sm:$0xff]  ;;  %v6562_v17 = vld [vmem:[#allocation2 + $0x8] sm:$0xff]  ;;  %v6568_v20 = vld [vmem:[#allocation2 + $0x10] sm:$0xff] }
 0x11e   :  { %v250_v18 = vsel %vm249_vm0, %v6560_v16, 0.0  ;;  %v253_v19 = vsel %vm249_vm0, %v6562_v17, 0.0  ;;  %v6570_v21 = vld [vmem:[#allocation2 + $0x18] sm:$0xff]  ;;  %v256_v22 = vsel %vm249_vm0, %v6568_v20, 0.0  ;;  %v6576_v24 = vld [vmem:[#allocation2 + $0x20] sm:$0xff]  ;;  %v6578_v25 = vld [vmem:[#allocation2 + $0x28] sm:$0xff] }
 0x11f   :  { %v259_v23 = vsel %vm249_vm0, %v6570_v21, 0.0  ;;  %v262_v26 = vsel %vm249_vm0, %v6576_v24, 0.0  ;;  %v265_v27 = vsel %vm249_vm0, %v6578_v25, 0.0  ;;  %v6584_v28 = vld [vmem:[#allocation2 + $0x30] sm:$0xff]  ;;  %v6586_v29 = vld [vmem:[#allocation2 + $0x38] sm:$0xff]  ;;  %vm6972_vm1 = vmpackc.low %vm249_vm0, %vm249_vm0 }
 0x120   :  { %278 = vadd.xlane.f32.xlu0 %v277_v6  ;;  %284 = vadd.xlane.f32.xlu1 %v283_v7  ;;  %v268_v30 = vsel %vm249_vm0, %v6584_v28, 0.0  ;;  %v271_v31 = vsel %vm249_vm0, %v6586_v29, 0.0 }
 0x124   :  { %287 = vadd.xlane.f32.xlu0 %v286_v10  ;;  %290 = vadd.xlane.f32.xlu1 %v289_v11 }
 0x128   :  { %293 = vadd.xlane.f32.xlu0 %v292_v14  ;;  %296 = vadd.xlane.f32.xlu1 %v295_v15 }
 0x12c   :  { %251 = vadd.xlane.f32.xlu0 %v250_v18  ;;  %254 = vadd.xlane.f32.xlu1 %v253_v19 }
 0x130   :  { %257 = vadd.xlane.f32.xlu0 %v256_v22  ;;  %260 = vadd.xlane.f32.xlu1 %v259_v23 }
 0x134   :  { %263 = vadd.xlane.f32.xlu0 %v262_v26  ;;  %266 = vadd.xlane.f32.xlu1 %v265_v27 }
 0x138   :  { %269 = vadd.xlane.f32.xlu0 %v268_v30  ;;  %272 = vadd.xlane.f32.xlu1 %v271_v31 }
 0x1a9   :  { %v276_v32 = vpop.xlane.xlu0 %275  ;;  %v282_v33 = vpop.xlane.xlu1 %281 }
 0x1aa   :  { %v307_v34 = vmul.f32 0.03125, %v276_v32  ;;  %v309_v35 = vmul.f32 0.03125, %v282_v33 }
 0x1ac   :  { %v6592_v36 = vsub.f32 %v241_v0, %v307_v34  ;;  %v6594_v37 = vsub.f32 %v243_v1, %v309_v35 }
 0x1ad   :  { %v279_v38 = vpop.xlane.xlu0 %278  ;;  %v285_v39 = vpop.xlane.xlu1 %284 }
 0x1ae   :  { %v308_v40 = vmul.f32 0.03125, %v279_v38  ;;  %v310_v41 = vmul.f32 0.03125, %v285_v39  ;;  %v339_v42 = vmul.f32 %v6592_v36, %v6592_v36  ;;  %v341_v43 = vmul.f32 %v6594_v37, %v6594_v37 }
 0x1b0   :  { %v6600_v44 = vsub.f32 %v242_v2, %v308_v40  ;;  %v6602_v45 = vsub.f32 %v244_v5, %v310_v41  ;;  %v371_v46 = vsel %vm249_vm0, %v339_v42, 0.0  ;;  %v377_v49 = vsel %vm249_vm0, %v341_v43, 0.0 }
 0x1b1   :  { %v288_v47 = vpop.xlane.xlu0 %287  ;;  %372 = vadd.xlane.f32.xlu0 %v371_v46  ;;  %v291_v48 = vpop.xlane.xlu1 %290 }
 0x1b2   :  { %v311_v50 = vmul.f32 0.03125, %v288_v47  ;;  %v312_v51 = vmul.f32 0.03125, %v291_v48  ;;  %v340_v52 = vmul.f32 %v6600_v44, %v6600_v44  ;;  %v342_v53 = vmul.f32 %v6602_v45, %v6602_v45 }
 0x1b4   :  { %v6610_v54 = vsub.f32 %v245_v8, %v311_v50  ;;  %v6612_v55 = vsub.f32 %v246_v9, %v312_v51  ;;  %v374_v56 = vsel %vm249_vm0, %v340_v52, 0.0  ;;  %v380_v59 = vsel %vm249_vm0, %v342_v53, 0.0  ;;  %v506_v53 = vld [vmem:[%s8462_s15 + $0x8] sm:$0xff] }
 0x1b5   :  { %v294_v57 = vpop.xlane.xlu0 %293  ;;  %375 = vadd.xlane.f32.xlu1 %v374_v56  ;;  %378 = vadd.xlane.f32.xlu0 %v377_v49  ;;  %v297_v58 = vpop.xlane.xlu1 %296 }
 0x1b6   :  { %v313_v60 = vmul.f32 0.03125, %v294_v57  ;;  %v314_v61 = vmul.f32 0.03125, %v297_v58  ;;  %v343_v62 = vmul.f32 %v6610_v54, %v6610_v54  ;;  %v344_v63 = vmul.f32 %v6612_v55, %v6612_v55  ;;  %v507_v57 = vld [vmem:[%s8462_s15 + $0x10] sm:$0xff]  ;;  %v508_v58 = vld [vmem:[%s8462_s15 + $0x18] sm:$0xff] }
 0x1b8   :  { %v6621_v0 = vsub.f32 %v6552_v12, %v313_v60  ;;  %v6624_v1 = vsub.f32 %v6554_v13, %v314_v61  ;;  %v383_v2 = vsel %vm249_vm0, %v343_v62, 0.0  ;;  %v386_v4 = vsel %vm249_vm0, %v344_v63, 0.0  ;;  %v709_v60 = vld [vmem:[%s8374_s5] sm:$0xff]  ;;  %v710_v61 = vld [vmem:[%s8374_s5 + $0x8] sm:$0xff] }
 0x1b9   :  { %381 = vadd.xlane.f32.xlu1 %v380_v59  ;;  %384 = vadd.xlane.f32.xlu0 %v383_v2  ;;  %v252_v3 = vpop.xlane.xlu0 %251  ;;  %v255_v5 = vpop.xlane.xlu1 %254  ;;  %v5235_v59 = vpack.c.bf16 %v508_v58, %v507_v57  ;;  %v6700_v62 = vpack.c.bf16 %v710_v61, %v709_v60  ;;  %v865_v63 = vld [vmem:[%s8376_s7] sm:$0xff]  ;;  %v866_v2 = vld [vmem:[%s8376_s7 + $0x8] sm:$0xff]  ;;  %v711_v58 = vld [vmem:[%s8374_s5 + $0x10] sm:$0xff] }
 0x1ba   :  { %v299_v6 = vmul.f32 0.03125, %v252_v3  ;;  %v300_v7 = vmul.f32 0.03125, %v255_v5  ;;  %v345_v8 = vmul.f32 %v6621_v0, %v6621_v0  ;;  %v346_v9 = vmul.f32 %v6624_v1, %v6624_v1 }
 0x1bb   :  { %v6709_v3 = vpack.c.bf16 %v866_v2, %v865_v63 }
 0x1bc   :  { %v6633_v10 = vsub.f32 %v6560_v16, %v299_v6  ;;  %v6636_v11 = vsub.f32 %v6562_v17, %v300_v7  ;;  %v389_v12 = vsel %vm249_vm0, %v345_v8, 0.0  ;;  %v392_v14 = vsel %vm249_vm0, %v346_v9, 0.0 }
 0x1bd   :  { %387 = vadd.xlane.f32.xlu1 %v386_v4  ;;  %390 = vadd.xlane.f32.xlu0 %v389_v12  ;;  %v258_v13 = vpop.xlane.xlu0 %257  ;;  %v261_v15 = vpop.xlane.xlu1 %260 }
 0x1be   :  { %v301_v18 = vmul.f32 0.03125, %v258_v13  ;;  %v302_v19 = vmul.f32 0.03125, %v261_v15  ;;  %v331_v22 = vmul.f32 %v6633_v10, %v6633_v10  ;;  %v332_v16 = vmul.f32 %v6636_v11, %v6636_v11 }
 0x1c0   :  { %v6645_v23 = vsub.f32 %v6568_v20, %v301_v18  ;;  %v6648_v17 = vsub.f32 %v6570_v21, %v302_v19  ;;  %v347_v26 = vsel %vm249_vm0, %v331_v22, 0.0  ;;  %v350_v30 = vsel %vm249_vm0, %v332_v16, 0.0 }
 0x1c1   :  { %393 = vadd.xlane.f32.xlu1 %v392_v14  ;;  %348 = vadd.xlane.f32.xlu0 %v347_v26  ;;  %v264_v27 = vpop.xlane.xlu0 %263  ;;  %v267_v31 = vpop.xlane.xlu1 %266 }
 0x1c2   :  { %v303_v32 = vmul.f32 0.03125, %v264_v27  ;;  %v304_v33 = vmul.f32 0.03125, %v267_v31  ;;  %v333_v34 = vmul.f32 %v6645_v23, %v6645_v23  ;;  %v334_v20 = vmul.f32 %v6648_v17, %v6648_v17 }
 0x1c4   :  { %v6657_v35 = vsub.f32 %v6576_v24, %v303_v32  ;;  %v6660_v21 = vsub.f32 %v6578_v25, %v304_v33  ;;  %v353_v38 = vsel %vm249_vm0, %v333_v34, 0.0  ;;  %v356_v40 = vsel %vm249_vm0, %v334_v20, 0.0 }
 0x1c5   :  { %351 = vadd.xlane.f32.xlu1 %v350_v30  ;;  %354 = vadd.xlane.f32.xlu0 %v353_v38  ;;  %v270_v39 = vpop.xlane.xlu0 %269  ;;  %v273_v41 = vpop.xlane.xlu1 %272  ;;  %v6712_v38 = vld [vmem:[#allocation5] ss:$0 sm:$0xff] }
 0x1c6   :  { %v305_v42 = vmul.f32 0.03125, %v270_v39  ;;  %v306_v43 = vmul.f32 0.03125, %v273_v41  ;;  %v335_v46 = vmul.f32 %v6657_v35, %v6657_v35  ;;  %v336_v24 = vmul.f32 %v6660_v21, %v6660_v21 }
 0x1c8   :  { %v6669_v47 = vsub.f32 %v6584_v28, %v305_v42  ;;  %v6672_v25 = vsub.f32 %v6586_v29, %v306_v43  ;;  %v359_v48 = vsel %vm249_vm0, %v335_v46, 0.0  ;;  %v362_v49 = vsel %vm249_vm0, %v336_v24, 0.0  ;;  %v505_v29 = vld [vmem:[%s8462_s15] sm:$0xff] }
 0x1c9   :  { %357 = vadd.xlane.f32.xlu1 %v356_v40  ;;  %360 = vadd.xlane.f32.xlu0 %v359_v48  ;;  %v5231_v56 = vpack.c.bf16 %v506_v53, %v505_v29  ;;  %v6715_v46 = vld [vmem:[#allocation7] ss:$0 sm:$0xff] }
 0x1ca   :  { %v337_v50 = vmul.f32 %v6669_v47, %v6669_v47  ;;  %v338_v51 = vmul.f32 %v6672_v25, %v6672_v25 }
 0x1cb   :  { %5463 = vmatprep.subr.bf16.mxu1 %v5231_v56  ;;  %5232 = vmatprep.subr.bf16.mxu0 %v5231_v56 }
 0x1cc   :  { %v365_v52 = vsel %vm249_vm0, %v337_v50, 0.0  ;;  %v368_v28 = vsel %vm249_vm0, %v338_v51, 0.0  ;;  %5465 = vmatpush3.bf16.msra.mxu1 %v5231_v56  ;;  %5234 = vmatpush3.bf16.msra.mxu0 %v5231_v56 }
 0x1cd   :  { %363 = vadd.xlane.f32.xlu1 %v362_v49  ;;  %366 = vadd.xlane.f32.xlu0 %v365_v52 }
 0x1ce   :  { %5464 = vmatprep.subr.bf16.mxu1 %v5235_v59  ;;  %5236 = vmatprep.subr.bf16.mxu0 %v5235_v59 }
 0x1d0   :  { %5466 = vmatpush3.bf16.msra.mxu1 %v5235_v59  ;;  %5238 = vmatpush3.bf16.msra.mxu0 %v5235_v59  ;;  %v712_v59 = vld [vmem:[%s8374_s5 + $0x18] sm:$0xff] }
 0x1d1   :  { %369 = vadd.xlane.f32.xlu1 %v368_v28  ;;  %5240 = vmatprep.subr.bf16.mxu1 %v6700_v62 }
 0x1d2   :  { %5248 = vmatprep.subr.bf16.mxu0 %v6709_v3 }
 0x23e   :  { %v373_v4 = vpop.xlane.xlu0 %372 }
 0x23f   :  { %v403_v5 = vmul.f32 0.03125, %v373_v4 }
 0x241   :  { %v419_v6 = vadd.f32 1e-05, %v403_v5 }
 0x242   :  { %v376_v7 = vpop.xlane.xlu1 %375  ;;  %v379_v8 = vpop.xlane.xlu0 %378 }
 0x243   :  { %5534 = vrsqrt.f32 %v419_v6  ;;  %v404_v9 = vmul.f32 0.03125, %v376_v7  ;;  %v405_v12 = vmul.f32 0.03125, %v379_v8  ;;  %v5243_v8 = vpack.c.bf16 %v712_v59, %v711_v58  ;;  %v867_v58 = vld [vmem:[%s8376_s7 + $0x10] sm:$0xff]  ;;  %v868_v59 = vld [vmem:[%s8376_s7 + $0x18] sm:$0xff] }
 0x245   :  { %v420_v13 = vadd.f32 1e-05, %v404_v9  ;;  %v421_v14 = vadd.f32 1e-05, %v405_v12 }
 0x246   :  { %v382_v15 = vpop.xlane.xlu1 %381  ;;  %v385_v18 = vpop.xlane.xlu0 %384 }
 0x247   :  { %5536 = vrsqrt.f32 %v420_v13  ;;  %v406_v19 = vmul.f32 0.03125, %v382_v15  ;;  %v407_v22 = vmul.f32 0.03125, %v385_v18 }
 0x248   :  { %5538 = vrsqrt.f32 %v421_v14 }
 0x249   :  { %v422_v16 = vadd.f32 1e-05, %v406_v19  ;;  %v423_v26 = vadd.f32 1e-05, %v407_v22 }
 0x24a   :  { %v388_v27 = vpop.xlane.xlu1 %387  ;;  %v391_v30 = vpop.xlane.xlu0 %390 }
 0x24b   :  { %5540 = vrsqrt.f32 %v422_v16  ;;  %v408_v31 = vmul.f32 0.03125, %v388_v27  ;;  %v409_v32 = vmul.f32 0.03125, %v391_v30 }
 0x24c   :  { %5542 = vrsqrt.f32 %v423_v26 }
 0x24d   :  { %v5535_v33 = vpop.eup %5534  ;;  %v424_v34 = vadd.f32 1e-05, %v408_v31  ;;  %v425_v20 = vadd.f32 1e-05, %v409_v32 }
 0x24e   :  { %v394_v39 = vpop.xlane.xlu1 %393  ;;  %v349_v40 = vpop.xlane.xlu0 %348  ;;  %v451_v41 = vmul.f32 %v5535_v33, %v6592_v36 }
 0x24f   :  { %5544 = vrsqrt.f32 %v424_v34  ;;  %v410_v42 = vmul.f32 0.03125, %v394_v39  ;;  %v395_v43 = vmul.f32 0.03125, %v349_v40 }
 0x250   :  { %5546 = vrsqrt.f32 %v425_v20  ;;  %v474_v24 = vmul.f32 %v6712_v38, %v451_v41 }
 0x251   :  { %v5537_v48 = vpop.eup %5536  ;;  %v426_v49 = vadd.f32 1e-05, %v410_v42  ;;  %v411_v50 = vadd.f32 1e-05, %v395_v43 }
 0x252   :  { %v5539_v51 = vpop.eup %5538  ;;  %v352_v52 = vpop.xlane.xlu1 %351  ;;  %v6719_v29 = vadd.f32 %v6715_v46, %v474_v24  ;;  %v452_v53 = vmul.f32 %v5537_v48, %v6600_v44 }
 0x253   :  { %v355_v28 = vpop.xlane.xlu0 %354  ;;  %5548 = vrsqrt.f32 %v426_v49  ;;  %v396_v36 = vmul.f32 0.03125, %v352_v52  ;;  %v453_v57 = vmul.f32 %v5539_v51, %v6594_v37 }
 0x254   :  { %v397_v56 = vmul.f32 0.03125, %v355_v28  ;;  %5550 = vrsqrt.f32 %v411_v50  ;;  %4699 = vmatprep.mubr.msk.f32.mxu1 %vm249_vm0, %v6719_v29  ;;  %v475_v60 = vmul.f32 %v6712_v38, %v452_v53 }
 0x255   :  { %v5541_v44 = vpop.eup %5540  ;;  %v412_v61 = vadd.f32 1e-05, %v396_v36  ;;  %v476_v2 = vmul.f32 %v6712_v38, %v453_v57 }
 0x256   :  { %v413_v63 = vadd.f32 1e-05, %v397_v56  ;;  %v5543_v37 = vpop.eup %5542  ;;  %v358_v4 = vpop.xlane.xlu1 %357  ;;  %v6734_v6 = vadd.f32 %v6715_v46, %v475_v60  ;;  %v454_v7 = vmul.f32 %v5541_v44, %v6602_v45 }
 0x257   :  { %v361_v5 = vpop.xlane.xlu0 %360  ;;  %5552 = vrsqrt.f32 %v412_v61  ;;  %v398_v9 = vmul.f32 0.03125, %v358_v4  ;;  %v6738_v13 = vadd.f32 %v6715_v46, %v476_v2  ;;  %v455_v15 = vmul.f32 %v5543_v37, %v6610_v54 }
 0x258   :  { %v399_v12 = vmul.f32 0.03125, %v361_v5  ;;  %5554 = vrsqrt.f32 %v413_v63  ;;  %4700 = vmatmul.mubr.msk.f32.vlgmr.msra.gmra.mrb[0].mxu1 %vm249_vm0, %v6734_v6  ;;  %v477_v14 = vmul.f32 %v6712_v38, %v454_v7  ;;  %v5251_v37 = vpack.c.bf16 %v868_v59, %v867_v58 }
 0x259   :  { %v5545_v18 = vpop.eup %5544  ;;  %v414_v19 = vadd.f32 1e-05, %v398_v9  ;;  %5242 = vmatpush3.bf16.msra.mxu1 %v6700_v62  ;;  %4702 = vmatprep.mubr.msk.f32.mxu1 %vm249_vm0, %v6738_v13  ;;  %v478_v30 = vmul.f32 %v6712_v38, %v455_v15 }
 0x25a   :  { %v415_v22 = vadd.f32 1e-05, %v399_v12  ;;  %v5547_v45 = vpop.eup %5546  ;;  %v364_v16 = vpop.xlane.xlu1 %363  ;;  %v6748_v27 = vadd.f32 %v6715_v46, %v477_v14  ;;  %5244 = vmatprep.subr.bf16.mxu1 %v5243_v8  ;;  %v456_v31 = vmul.f32 %v5545_v18, %v6612_v55 }
 0x25b   :  { %v367_v26 = vpop.xlane.xlu0 %366  ;;  %5556 = vrsqrt.f32 %v414_v19  ;;  %v400_v54 = vmul.f32 0.03125, %v364_v16  ;;  %v457_v33 = vmul.f32 %v5547_v45, %v6621_v0  ;;  %v6756_v62 = vadd.f32 %v6715_v46, %v478_v30 }
 0x25c   :  { %v401_v32 = vmul.f32 0.03125, %v367_v26  ;;  %5558 = vrsqrt.f32 %v415_v22  ;;  %4703 = vmatmul.mubr.msk.f32.gmra.mrb[2].mxu1 %vm249_vm0, %v6748_v27  ;;  %v479_v34 = vmul.f32 %v6712_v38, %v456_v31 }
 0x25d   :  { %v5549_v20 = vpop.eup %5548  ;;  %v416_v39 = vadd.f32 1e-05, %v400_v54  ;;  %5246 = vmatpush3.bf16.msra.mxu1 %v5243_v8  ;;  %v480_v55 = vmul.f32 %v6712_v38, %v457_v33  ;;  %4705 = vmatprep.mubr.msk.f32.mxu1 %vm249_vm0, %v6756_v62 }
 0x25e   :  { %v417_v40 = vadd.f32 1e-05, %v401_v32  ;;  %v5551_v41 = vpop.eup %5550  ;;  %v370_v0 = vpop.xlane.xlu1 %369  ;;  %v6763_v42 = vadd.f32 %v6715_v46, %v479_v34  ;;  %v458_v43 = vmul.f32 %v5549_v20, %v6624_v1 }
 0x25f   :  { %5560 = vrsqrt.f32 %v416_v39  ;;  %v402_v24 = vmul.f32 0.03125, %v370_v0  ;;  %v6767_v48 = vadd.f32 %v6715_v46, %v480_v55  ;;  %v443_v49 = vmul.f32 %v5551_v41, %v6633_v10 }
 0x260   :  { %5562 = vrsqrt.f32 %v417_v40  ;;  %4706 = vmatmul.mubr.msk.f32.gmra.mrb[4].mxu1 %vm249_vm0, %v6763_v42  ;;  %v481_v50 = vmul.f32 %v6712_v38, %v458_v43 }
 0x261   :  { %v5553_v51 = vpop.eup %5552  ;;  %v418_v52 = vadd.f32 1e-05, %v402_v24  ;;  %4708 = vmatprep.mubr.msk.f32.mxu1 %vm249_vm0, %v6767_v48  ;;  %v466_v1 = vmul.f32 %v6712_v38, %v443_v49 }
 0x262   :  { %v5555_v28 = vpop.eup %5554  ;;  %v6777_v53 = vadd.f32 %v6715_v46, %v481_v50  ;;  %v444_v36 = vmul.f32 %v5553_v51, %v6636_v11 }
 0x263   :  { %5564 = vrsqrt.f32 %v418_v52  ;;  %v489_v10 = vadd.f32 %v6715_v46, %v466_v1  ;;  %v445_v56 = vmul.f32 %v5555_v28, %v6645_v23  ;;  %v6940_v52 = vld [vmem:[#allocation10] ss:$0 sm:$0xff] }
 0x264   :  { %4709 = vmatmul.mubr.msk.f32.gmra.mrb[6].mxu1 %vm249_vm0, %v6777_v53  ;;  %v467_v57 = vmul.f32 %v6712_v38, %v444_v36 }
 0x265   :  { %v5557_v60 = vpop.eup %5556  ;;  %4687 = vmatprep.mubr.msk.f32.mxu0 %vm249_vm0, %v489_v10  ;;  %4719 = vmatprep.mubr.msk.f32.mxu1 %vm249_vm0, %v489_v10  ;;  %v468_v11 = vmul.f32 %v6712_v38, %v445_v56 }
 0x266   :  { %v5559_v23 = vpop.eup %5558  ;;  %v490_v44 = vadd.f32 %v6715_v46, %v467_v57  ;;  %v446_v61 = vmul.f32 %v5557_v60, %v6648_v17 }
 0x267   :  { %v491_v63 = vadd.f32 %v6715_v46, %v468_v11  ;;  %v447_v2 = vmul.f32 %v5559_v23, %v6657_v35 }
 0x268   :  { %4688 = vmatmul.mubr.msk.f32.vlgmr.msra.gmra.mrb[0].mxu0 %vm249_vm0, %v490_v44  ;;  %4720 = vmatmul.mubr.msk.f32.vlgmr.msra.gmra.mrb[8].mxu1 %vm249_vm0, %v490_v44  ;;  %v469_v4 = vmul.f32 %v6712_v38, %v446_v61 }
 0x269   :  { %v5561_v5 = vpop.eup %5560  ;;  %4690 = vmatprep.mubr.msk.f32.mxu0 %vm249_vm0, %v491_v63  ;;  %4722 = vmatprep.mubr.msk.f32.mxu1 %vm249_vm0, %v491_v63  ;;  %v470_v7 = vmul.f32 %v6712_v38, %v447_v2 }
 0x26a   :  { %v5563_v8 = vpop.eup %5562  ;;  %v492_v17 = vadd.f32 %v6715_v46, %v469_v4  ;;  %v448_v9 = vmul.f32 %v5561_v5, %v6660_v21  ;;  %5250 = vmatpush3.bf16.msra.mxu0 %v6709_v3 }
 0x26b   :  { %v493_v35 = vadd.f32 %v6715_v46, %v470_v7  ;;  %v449_v12 = vmul.f32 %v5563_v8, %v6669_v47  ;;  %5252 = vmatprep.subr.bf16.mxu0 %v5251_v37 }
 0x26c   :  { %4691 = vmatmul.mubr.msk.f32.gmra.mrb[2].mxu0 %vm249_vm0, %v492_v17  ;;  %4723 = vmatmul.mubr.msk.f32.gmra.mrb[10].mxu1 %vm249_vm0, %v492_v17  ;;  %v471_v14 = vmul.f32 %v6712_v38, %v448_v9 }
 0x26d   :  { %v5565_v15 = vpop.eup %5564  ;;  %4693 = vmatprep.mubr.msk.f32.mxu0 %vm249_vm0, %v493_v35  ;;  %4725 = vmatprep.mubr.msk.f32.mxu1 %vm249_vm0, %v493_v35  ;;  %v472_v21 = vmul.f32 %v6712_v38, %v449_v12 }
 0x26e   :  { %v494_v3 = vadd.f32 %v6715_v46, %v471_v14  ;;  %v450_v18 = vmul.f32 %v5565_v15, %v6672_v25  ;;  %5254 = vmatpush3.bf16.msra.mxu0 %v5251_v37  ;;  %v6866_v25 = vld [vmem:[#allocation8] ss:$0 sm:$0xff] }
 0x26f   :  { %v495_v47 = vadd.f32 %v6715_v46, %v472_v21 }
 0x270   :  { %4694 = vmatmul.mubr.msk.f32.gmra.mrb[4].mxu0 %vm249_vm0, %v494_v3  ;;  %4726 = vmatmul.mubr.msk.f32.gmra.mrb[12].mxu1 %vm249_vm0, %v494_v3  ;;  %v473_v19 = vmul.f32 %v6712_v38, %v450_v18 }
 0x271   :  { %4696 = vmatprep.mubr.msk.f32.mxu0 %vm249_vm0, %v495_v47  ;;  %4728 = vmatprep.mubr.msk.f32.mxu1 %vm249_vm0, %v495_v47 }
 0x272   :  { %v496_v22 = vadd.f32 %v6715_v46, %v473_v19  ;;  %v6868_v46 = vld [vmem:[#allocation13] ss:$0 sm:$0xff] }
 0x274   :  { %4697 = vmatmul.mubr.msk.f32.gmra.mrb[6].mxu0 %vm249_vm0, %v496_v22  ;;  %4729 = vmatmul.mubr.msk.f32.gmra.mrb[14].mxu1 %vm249_vm0, %v496_v22 }
 0x275   :  { %4731 = vmatprep.mubr.msk.f32.mxu1 %vm249_vm0, %v6719_v29  ;;  %4751 = vmatprep.mubr.msk.f32.mxu0 %vm249_vm0, %v489_v10 }
 0x278   :  { %4732 = vmatmul.mubr.msk.f32.gmra.mrb[16].mxu1 %vm249_vm0, %v6734_v6  ;;  %4752 = vmatmul.mubr.msk.f32.vlgmr.msra.gmra.mrb[8].mxu0 %vm249_vm0, %v490_v44 }
 0x279   :  { %4734 = vmatprep.mubr.msk.f32.mxu1 %vm249_vm0, %v6738_v13  ;;  %4754 = vmatprep.mubr.msk.f32.mxu0 %vm249_vm0, %v491_v63 }
 0x27c   :  { %4735 = vmatmul.mubr.msk.f32.gmra.mrb[18].mxu1 %vm249_vm0, %v6748_v27  ;;  %4755 = vmatmul.mubr.msk.f32.gmra.mrb[10].mxu0 %vm249_vm0, %v492_v17 }
 0x27d   :  { %4737 = vmatprep.mubr.msk.f32.mxu1 %vm249_vm0, %v6756_v62  ;;  %4757 = vmatprep.mubr.msk.f32.mxu0 %vm249_vm0, %v493_v35 }
 0x280   :  { %4738 = vmatmul.mubr.msk.f32.gmra.mrb[20].mxu1 %vm249_vm0, %v6763_v42  ;;  %4758 = vmatmul.mubr.msk.f32.gmra.mrb[12].mxu0 %vm249_vm0, %v494_v3 }
 0x281   :  { %4740 = vmatprep.mubr.msk.f32.mxu1 %vm249_vm0, %v6767_v48  ;;  %4760 = vmatprep.mubr.msk.f32.mxu0 %vm249_vm0, %v495_v47 }
 0x284   :  { %4741 = vmatmul.mubr.msk.f32.gmra.mrb[22].mxu1 %vm249_vm0, %v6777_v53  ;;  %4761 = vmatmul.mubr.msk.f32.gmra.mrb[14].mxu0 %vm249_vm0, %v496_v22 }
 0x285   :  { %4763 = vmatprep.mubr.msk.f32.mxu0 %vm249_vm0, %v6719_v29  ;;  %v6870_v29 = vld [vmem:[#allocation13 + $0x1] ss:$0 sm:$0xff] }
 0x288   :  { %4764 = vmatmul.mubr.msk.f32.gmra.mrb[16].mxu0 %vm249_vm0, %v6734_v6 }
 0x289   :  { %4766 = vmatprep.mubr.msk.f32.mxu0 %vm249_vm0, %v6738_v13 }
 0x28c   :  { %4767 = vmatmul.mubr.msk.f32.gmra.mrb[18].mxu0 %vm249_vm0, %v6748_v27 }
 0x28d   :  { %4769 = vmatprep.mubr.msk.f32.mxu0 %vm249_vm0, %v6756_v62 }
 0x290   :  { %4770 = vmatmul.mubr.msk.f32.gmra.mrb[20].mxu0 %vm249_vm0, %v6763_v42 }
 0x291   :  { %4772 = vmatprep.mubr.msk.f32.mxu0 %vm249_vm0, %v6767_v48 }
 0x294   :  { %4773 = vmatmul.mubr.msk.f32.gmra.mrb[22].mxu0 %vm249_vm0, %v6777_v53 }
 0x32b   :  { %v4701_v38 = vpop.f32.mrb[0].mxu1 }
 0x32c   :  { %v6873_v6 = vadd.f32 %v4701_v38, %v6866_v25  ;;  %v670_v13 = vpop.f32.mrb[1].mxu1 }
 0x32d   :  { %v6876_v45 = vadd.f32 %v6866_v25, %v670_v13 }
 0x32e   :  { %8463 = vst [vmem:[#allocation35_spill] sm:$0xff] %v6873_v6  ;;  %v6880_v16 = vmul.f32 %v6868_v46, %v6873_v6  ;;  %v6884_v26 = vmul.f32 %v6870_v29, %v6873_v6 }
 0x32f   :  { %v4704_v27 = vpop.f32.mrb[2].mxu1  ;;  %v6888_v30 = vmul.f32 %v6868_v46, %v6876_v45 }
 0x330   :  { %v6891_v31 = vadd.f32 %v4704_v27, %v6866_v25  ;;  %v680_v54 = vpop.f32.mrb[3].mxu1 }
 0x331   :  { %v6894_v32 = vadd.f32 %v6866_v25, %v680_v54 }
 0x332   :  { %8464 = vst [vmem:[#allocation36_spill] sm:$0xff] %v6891_v31  ;;  %v6898_v33 = vmul.f32 %v6868_v46, %v6891_v31  ;;  %v6902_v62 = vmul.f32 %v6870_v29, %v6891_v31 }
 0x333   :  { %8465 = vst [vmem:[#allocation37_spill] sm:$0xff] %v6894_v32  ;;  %v4707_v34 = vpop.f32.mrb[4].mxu1  ;;  %v6906_v20 = vmul.f32 %v6868_v46, %v6894_v32  ;;  %v6910_v39 = vmul.f32 %v6870_v29, %v6894_v32 }
 0x334   :  { %v6913_v40 = vadd.f32 %v4707_v34, %v6866_v25  ;;  %v690_v55 = vpop.f32.mrb[5].mxu1 }
 0x335   :  { %v6916_v41 = vadd.f32 %v6866_v25, %v690_v55 }
 0x336   :  { %8466 = vst [vmem:[#allocation38_spill] sm:$0xff] %v6913_v40  ;;  %v6920_v0 = vmul.f32 %v6868_v46, %v6913_v40  ;;  %v6924_v42 = vmul.f32 %v6870_v29, %v6913_v40 }
 0x337   :  { %8467 = vst [vmem:[#allocation39_spill] sm:$0xff] %v6916_v41  ;;  %v4710_v43 = vpop.f32.mrb[6].mxu1  ;;  %v6928_v24 = vmul.f32 %v6868_v46, %v6916_v41  ;;  %v6932_v48 = vmul.f32 %v6870_v29, %v6916_v41 }
 0x338   :  { %8468 = vst [vmem:[#allocation40_spill] sm:$0xff] %v6924_v42  ;;  %v6935_v49 = vadd.f32 %v4710_v43, %v6866_v25  ;;  %v700_v50 = vpop.f32.mrb[7].mxu1 }
 0x339   :  { %v6938_v51 = vadd.f32 %v6866_v25, %v700_v50 }
 0x33a   :  { %8469 = vst [vmem:[#allocation41_spill] sm:$0xff] %v6935_v49  ;;  %v6944_v1 = vmul.f32 %v6868_v46, %v6935_v49  ;;  %v6948_v28 = vmul.f32 %v6870_v29, %v6935_v49 }
 0x33b   :  { %8470 = vst [vmem:[#allocation42_spill] sm:$0xff] %v6938_v51  ;;  %v4689_v53 = vpop.f32.mrb[0].mxu0  ;;  %v4721_v36 = vpop.f32.mrb[8].mxu1  ;;  %v6952_v10 = vmul.f32 %v6868_v46, %v6938_v51  ;;  %v6956_v56 = vmul.f32 %v6870_v29, %v6938_v51 }
 0x33c   :  { %8471 = vst [vmem:[#allocation43_spill] sm:$0xff] %v6948_v28  ;;  %v6959_v57 = vadd.f32 %v4689_v53, %v6866_v25  ;;  %v792_v58 = vadd.f32 %v4721_v36, %v6940_v52  ;;  %v630_v59 = vpop.f32.mrb[1].mxu0  ;;  %v786_v60 = vpop.f32.mrb[9].mxu1 }
 0x33d   :  { %8472 = vst [vmem:[#allocation44_spill] sm:$0xff] %v6956_v56  ;;  %v6963_v11 = vadd.f32 %v6866_v25, %v630_v59  ;;  %v787_v23 = vadd.f32 %v6940_v52, %v786_v60 }
 0x33e   :  { %v6968_v44 = vmul.f32 %v6868_v46, %v6959_v57 }
 0x33f   :  { %v5255_v63 = vpack.c.bf16 %v792_v58, %v787_v23  ;;  %v4692_v2 = vpop.f32.mrb[2].mxu0  ;;  %v4724_v37 = vpop.f32.mrb[10].mxu1  ;;  %v1049_v4 = vmul.f32 %v6868_v46, %v6963_v11  ;;  %v7025_v23 = vld [vmem:[#allocation11] ss:$0 sm:$0xff] }
 0x340   :  { %v6979_v5 = vadd.f32 %v4692_v2, %v6866_v25  ;;  %v802_v7 = vadd.f32 %v4724_v37, %v6940_v52  ;;  %v640_v8 = vpop.f32.mrb[3].mxu0  ;;  %v796_v17 = vpop.f32.mrb[11].mxu1 }
 0x341   :  { %v6983_v9 = vadd.f32 %v6866_v25, %v640_v8  ;;  %v797_v35 = vadd.f32 %v6940_v52, %v796_v17  ;;  %5257 = vmatprep.subr.msk.bf16.mxu1 %vm6972_vm1, %v5255_v63  ;;  %4807 = vmatprep.mubr.msk.f32.mxu1 %vm249_vm0, %v1049_v4 }
 0x342   :  { %5260 = vmatpush3.bf16.xpose.msk.msra.mxu1 %vm6972_vm1, %v5255_v63  ;;  %v6993_v12 = vmul.f32 %v6868_v46, %v6979_v5 }
 0x343   :  { %v5261_v14 = vpack.c.bf16 %v802_v7, %v797_v35  ;;  %v4695_v15 = vpop.f32.mrb[4].mxu0  ;;  %v4727_v21 = vpop.f32.mrb[12].mxu1  ;;  %v6997_v3 = vmul.f32 %v6868_v46, %v6983_v9 }
 0x344   :  { %v7000_v18 = vadd.f32 %v4695_v15, %v6866_v25  ;;  %v812_v47 = vadd.f32 %v4727_v21, %v6940_v52  ;;  %v650_v19 = vpop.f32.mrb[5].mxu0  ;;  %v806_v22 = vpop.f32.mrb[13].mxu1  ;;  %v7045_v21 = vld [vmem:[#allocation13 + $0x2] ss:$0 sm:$0xff] }
 0x345   :  { %v7004_v38 = vadd.f32 %v6866_v25, %v650_v19  ;;  %v807_v13 = vadd.f32 %v6940_v52, %v806_v22  ;;  %5263 = vmatprep.subr.msk.bf16.mxu1 %vm6972_vm1, %v5261_v14  ;;  %v1081_v61 = vmul.f32 %v7045_v21, %v6963_v11 }
 0x346   :  { %v7011_v27 = vmul.f32 %v6868_v46, %v7000_v18 }
 0x347   :  { %v5267_v54 = vpack.c.bf16 %v812_v47, %v807_v13  ;;  %v4698_v34 = vpop.f32.mrb[6].mxu0  ;;  %v4730_v55 = vpop.f32.mrb[14].mxu1  ;;  %v7015_v43 = vmul.f32 %v6868_v46, %v7004_v38  ;;  %v7047_v47 = vld [vmem:[#allocation13 + $0x3] ss:$0 sm:$0xff] }
 0x348   :  { %v7018_v50 = vadd.f32 %v4698_v34, %v6866_v25  ;;  %v822_v53 = vadd.f32 %v4730_v55, %v6940_v52  ;;  %v660_v36 = vpop.f32.mrb[7].mxu0  ;;  %v816_v58 = vpop.f32.mrb[15].mxu1 }
 0x349   :  { %v7022_v59 = vadd.f32 %v6866_v25, %v660_v36  ;;  %v817_v60 = vadd.f32 %v6940_v52, %v816_v58 }
 0x34a   :  { %5266 = vmatpush3.bf16.xpose.msk.msra.mxu1 %vm6972_vm1, %v5261_v14  ;;  %v7031_v63 = vmul.f32 %v6868_v46, %v7018_v50 }
 0x34b   :  { %v7033_v2 = vpack.c.bf16 %v822_v53, %v817_v60  ;;  %v4733_v37 = vpop.f32.mrb[16].mxu1  ;;  %v4753_v4 = vpop.f32.mrb[8].mxu0  ;;  %5269 = vmatprep.subr.msk.bf16.mxu1 %vm6972_vm1, %v5267_v54  ;;  %v7039_v25 = vmul.f32 %v6868_v46, %v7022_v59 }
 0x34c   :  { %v832_v7 = vadd.f32 %v4733_v37, %v6940_v52  ;;  %v948_v8 = vadd.f32 %v4753_v4, %v7025_v23  ;;  %v826_v17 = vpop.f32.mrb[17].mxu1  ;;  %v942_v35 = vpop.f32.mrb[9].mxu0 }
 0x34d   :  { %v827_v14 = vadd.f32 %v6940_v52, %v826_v17  ;;  %v943_v15 = vadd.f32 %v7025_v23, %v942_v35 }
 0x34e   :  { %v2443_v19 = vmul.f32 %v6868_v46, %v948_v8  ;;  %v2459_v22 = vmul.f32 %v6870_v29, %v948_v8  ;;  %v2475_v13 = vmul.f32 %v7045_v21, %v948_v8  ;;  %v2491_v34 = vmul.f32 %v7047_v47, %v948_v8 }
 0x34f   :  { %v7053_v55 = vpack.c.bf16 %v832_v7, %v827_v14  ;;  %v4736_v53 = vpop.f32.mrb[18].mxu1  ;;  %v4756_v36 = vpop.f32.mrb[10].mxu0  ;;  %v2442_v58 = vmul.f32 %v6868_v46, %v943_v15  ;;  %v2458_v60 = vmul.f32 %v6870_v29, %v943_v15  ;;  %v2474_v37 = vmul.f32 %v7045_v21, %v943_v15 }
 0x350   :  { %v842_v4 = vadd.f32 %v4736_v53, %v6940_v52  ;;  %v958_v17 = vadd.f32 %v4756_v36, %v7025_v23  ;;  %v836_v35 = vpop.f32.mrb[19].mxu1  ;;  %v952_v49 = vpop.f32.mrb[11].mxu0  ;;  %v2490_v51 = vmul.f32 %v7047_v47, %v943_v15 }
 0x351   :  { %v837_v8 = vadd.f32 %v6940_v52, %v836_v35  ;;  %v953_v7 = vadd.f32 %v7025_v23, %v952_v49  ;;  %v5303_v14 = vpack.c.bf16 %v2443_v19, %v2442_v58  ;;  %v7063_v40 = vpack.c.bf16 %v2459_v22, %v2458_v60 }
 0x352   :  { %5272 = vmatpush3.bf16.xpose.msk.msra.mxu1 %vm6972_vm1, %v5267_v54  ;;  %v2445_v41 = vmul.f32 %v6868_v46, %v958_v17  ;;  %v2461_v53 = vmul.f32 %v6870_v29, %v958_v17  ;;  %v7069_v31 = vpack.c.bf16 %v2475_v13, %v2474_v37  ;;  %v2477_v36 = vmul.f32 %v7045_v21, %v958_v17 }
 0x353   :  { %8475 = vst [vmem:[#allocation45_spill] sm:$0xff] %v7063_v40  ;;  %v7072_v32 = vpack.c.bf16 %v842_v4, %v837_v8  ;;  %v4739_v15 = vpop.f32.mrb[20].mxu1  ;;  %v4759_v35 = vpop.f32.mrb[12].mxu0  ;;  %5275 = vmatprep.subr.msk.bf16.mxu1 %vm6972_vm1, %v7033_v2  ;;  %5304 = vmatprep.subr.bf16.mxu0 %v5303_v14  ;;  %v2444_v49 = vmul.f32 %v6868_v46, %v953_v7 }
 0x354   :  { %8476 = vst [vmem:[#allocation46_spill] sm:$0xff] %v7069_v31  ;;  %v2460_v54 = vmul.f32 %v6870_v29, %v953_v7  ;;  %v852_v19 = vadd.f32 %v4739_v15, %v6940_v52  ;;  %v968_v22 = vadd.f32 %v4759_v35, %v7025_v23  ;;  %v846_v13 = vpop.f32.mrb[21].mxu1  ;;  %v962_v58 = vpop.f32.mrb[13].mxu0  ;;  %5306 = vmatpush3.bf16.msra.mxu0 %v5303_v14 }
 0x355   :  { %v2476_v60 = vmul.f32 %v7045_v21, %v953_v7  ;;  %v7082_v37 = vpack.c.bf16 %v2491_v34, %v2490_v51  ;;  %v847_v4 = vadd.f32 %v6940_v52, %v846_v13  ;;  %v963_v8 = vadd.f32 %v7025_v23, %v962_v58 }
 0x356   :  { %v5307_v31 = vpack.c.bf16 %v2445_v41, %v2444_v49  ;;  %v7086_v6 = vpack.c.bf16 %v2461_v53, %v2460_v54  ;;  %v2447_v28 = vmul.f32 %v6868_v46, %v968_v22  ;;  %v2463_v15 = vmul.f32 %v6870_v29, %v968_v22 }
 0x357   :  { %8477 = vst [vmem:[#allocation47_spill] sm:$0xff] %v7082_v37  ;;  %v7090_v56 = vpack.c.bf16 %v2477_v36, %v2476_v60  ;;  %v2479_v35 = vmul.f32 %v7045_v21, %v968_v22  ;;  %v7093_v14 = vpack.c.bf16 %v852_v19, %v847_v4  ;;  %v4742_v42 = vpop.f32.mrb[22].mxu1  ;;  %v4762_v51 = vpop.f32.mrb[14].mxu0  ;;  %v2446_v34 = vmul.f32 %v6868_v46, %v963_v8 }
 0x358   :  { %8478 = vst [vmem:[#allocation48_spill] sm:$0xff] %v7086_v6  ;;  %5308 = vmatprep.subr.bf16.mxu0 %v5307_v31  ;;  %v2462_v13 = vmul.f32 %v6870_v29, %v963_v8  ;;  %v2478_v41 = vmul.f32 %v7045_v21, %v963_v8  ;;  %v862_v53 = vadd.f32 %v4742_v42, %v6940_v52  ;;  %v856_v54 = vpop.f32.mrb[23].mxu1  ;;  %v972_v36 = vpop.f32.mrb[15].mxu0 }
 0x359   :  { %8479 = vst [vmem:[#allocation49_spill] sm:$0xff] %v7090_v56  ;;  %v978_v49 = vadd.f32 %v4762_v51, %v7025_v23  ;;  %5310 = vmatpush3.bf16.msra.mxu0 %v5307_v31  ;;  %v2492_v58 = vmul.f32 %v7047_v47, %v953_v7  ;;  %v2493_v19 = vmul.f32 %v7047_v47, %v958_v17 }
 0x35a   :  { %v857_v60 = vadd.f32 %v6940_v52, %v856_v54  ;;  %v973_v4 = vadd.f32 %v7025_v23, %v972_v36  ;;  %v5311_v37 = vpack.c.bf16 %v2447_v28, %v2446_v34  ;;  %v7104_v56 = vpack.c.bf16 %v2463_v15, %v2462_v13  ;;  %5278 = vmatpush3.bf16.xpose.msk.msra.mxu1 %vm6972_vm1, %v7033_v2 }
 0x35b   :  { %v2449_v42 = vmul.f32 %v6868_v46, %v978_v49  ;;  %v2465_v51 = vmul.f32 %v6870_v29, %v978_v49  ;;  %v7111_v31 = vpack.c.bf16 %v2479_v35, %v2478_v41  ;;  %v2481_v7 = vmul.f32 %v7045_v21, %v978_v49  ;;  %v4765_v52 = vpop.f32.mrb[16].mxu0  ;;  %5281 = vmatprep.subr.msk.bf16.mxu1 %vm6972_vm1, %v7053_v55 }
 0x35c   :  { %8480 = vst [vmem:[#allocation50_spill] sm:$0xff] %v7104_v56  ;;  %v7114_v17 = vpack.c.bf16 %v862_v53, %v857_v60  ;;  %5312 = vmatprep.subr.bf16.mxu0 %v5311_v37  ;;  %v2448_v28 = vmul.f32 %v6868_v46, %v973_v4  ;;  %v2464_v2 = vmul.f32 %v6870_v29, %v973_v4  ;;  %v982_v34 = vpop.f32.mrb[17].mxu0 }
 0x35d   :  { %8481 = vst [vmem:[#allocation51_spill] sm:$0xff] %v7111_v31  ;;  %v988_v15 = vadd.f32 %v4765_v52, %v7025_v23  ;;  %5314 = vmatpush3.bf16.msra.mxu0 %v5311_v37  ;;  %v2480_v35 = vmul.f32 %v7045_v21, %v973_v4  ;;  %v7123_v13 = vpack.c.bf16 %v2493_v19, %v2492_v58 }
 0x35e   :  { %v2494_v41 = vmul.f32 %v7047_v47, %v963_v8  ;;  %v983_v53 = vadd.f32 %v7025_v23, %v982_v34  ;;  %v5315_v54 = vpack.c.bf16 %v2449_v42, %v2448_v28  ;;  %v7127_v36 = vpack.c.bf16 %v2465_v51, %v2464_v2 }
 0x35f   :  { %8482 = vst [vmem:[#allocation52_spill] sm:$0xff] %v7123_v13  ;;  %v2495_v60 = vmul.f32 %v7047_v47, %v968_v22  ;;  %v2451_v31 = vmul.f32 %v6868_v46, %v988_v15  ;;  %v2467_v56 = vmul.f32 %v6870_v29, %v988_v15  ;;  %v7132_v52 = vpack.c.bf16 %v2481_v7, %v2480_v35  ;;  %v4768_v6 = vpop.f32.mrb[18].mxu0 }
 0x360   :  { %8483 = vst [vmem:[#allocation53_spill] sm:$0xff] %v7127_v36  ;;  %v2483_v37 = vmul.f32 %v7045_v21, %v988_v15  ;;  %5316 = vmatprep.subr.bf16.mxu0 %v5315_v54  ;;  %v2450_v58 = vmul.f32 %v6868_v46, %v983_v53  ;;  %v2466_v8 = vmul.f32 %v6870_v29, %v983_v53  ;;  %v992_v51 = vpop.f32.mrb[19].mxu0  ;;  %v1789_v36 = vld [vmem:[#allocation14 + $0x198] sm:$0xff] }
 0x361   :  { %8484 = vst [vmem:[#allocation54_spill] sm:$0xff] %v7132_v52  ;;  %v2482_v19 = vmul.f32 %v7045_v21, %v983_v53  ;;  %v7138_v42 = vpack.c.bf16 %v2495_v60, %v2494_v41  ;;  %v998_v22 = vadd.f32 %v4768_v6, %v7025_v23  ;;  %5318 = vmatpush3.bf16.msra.mxu0 %v5315_v54 }
 0x362   :  { %v2496_v28 = vmul.f32 %v7047_v47, %v973_v4  ;;  %v2497_v7 = vmul.f32 %v7047_v47, %v978_v49  ;;  %v2498_v2 = vmul.f32 %v7047_v47, %v983_v53  ;;  %v993_v34 = vadd.f32 %v7025_v23, %v992_v51  ;;  %5284 = vmatpush3.bf16.xpose.msk.msra.mxu1 %vm6972_vm1, %v7053_v55 }
 0x363   :  { %8485 = vst [vmem:[#allocation55_spill] sm:$0xff] %v7138_v42  ;;  %v5319_v35 = vpack.c.bf16 %v2451_v31, %v2450_v58  ;;  %v7145_v13 = vpack.c.bf16 %v2467_v56, %v2466_v8  ;;  %v7147_v52 = vpack.c.bf16 %v2483_v37, %v2482_v19  ;;  %v2453_v6 = vmul.f32 %v6868_v46, %v998_v22  ;;  %v4771_v53 = vpop.f32.mrb[20].mxu0 }
 0x364   :  { %v2469_v41 = vmul.f32 %v6870_v29, %v998_v22  ;;  %v2485_v4 = vmul.f32 %v7045_v21, %v998_v22  ;;  %v7155_v49 = vpack.c.bf16 %v2497_v7, %v2496_v28  ;;  %5287 = vmatprep.subr.msk.bf16.mxu1 %vm6972_vm1, %v7072_v32  ;;  %v2452_v56 = vmul.f32 %v6868_v46, %v993_v34  ;;  %v1002_v60 = vpop.f32.mrb[21].mxu0 }
 0x365   :  { %8486 = vst [vmem:[#allocation56_spill] sm:$0xff] %v7145_v13  ;;  %8487 = vst [vmem:[#allocation57_spill] sm:$0xff] %v7147_v52  ;;  %5320 = vmatprep.subr.bf16.mxu0 %v5319_v35  ;;  %v2468_v31 = vmul.f32 %v6870_v29, %v993_v34  ;;  %v2484_v55 = vmul.f32 %v7045_v21, %v993_v34  ;;  %v1008_v54 = vadd.f32 %v4771_v53, %v7025_v23 }
 0x366   :  { %8488 = vst [vmem:[#allocation58_spill] sm:$0xff] %v7155_v49  ;;  %5322 = vmatpush3.bf16.msra.mxu0 %v5319_v35  ;;  %v2499_v37 = vmul.f32 %v7047_v47, %v988_v15  ;;  %v2500_v58 = vmul.f32 %v7047_v47, %v993_v34  ;;  %v2501_v8 = vmul.f32 %v7047_v47, %v998_v22 }
 0x367   :  { %v1003_v19 = vadd.f32 %v7025_v23, %v1002_v60  ;;  %v5323_v51 = vpack.c.bf16 %v2453_v6, %v2452_v56  ;;  %v7168_v28 = vpack.c.bf16 %v2469_v41, %v2468_v31  ;;  %v7170_v7 = vpack.c.bf16 %v2485_v4, %v2484_v55  ;;  %v4774_v15 = vpop.f32.mrb[22].mxu0 }
 0x368   :  { %v2455_v49 = vmul.f32 %v6868_v46, %v1008_v54  ;;  %v2471_v42 = vmul.f32 %v6870_v29, %v1008_v54  ;;  %v2487_v53 = vmul.f32 %v7045_v21, %v1008_v54  ;;  %v7175_v35 = vpack.c.bf16 %v2499_v37, %v2498_v2  ;;  %v1012_v56 = vpop.f32.mrb[23].mxu0 }
 0x369   :  { %8489 = vst [vmem:[#allocation59_spill] sm:$0xff] %v7168_v28  ;;  %8490 = vst [vmem:[#allocation60_spill] sm:$0xff] %v7170_v7  ;;  %5324 = vmatprep.subr.bf16.mxu0 %v5323_v51  ;;  %v2454_v34 = vmul.f32 %v6868_v46, %v1003_v19  ;;  %v2470_v22 = vmul.f32 %v6870_v29, %v1003_v19  ;;  %v2486_v6 = vmul.f32 %v7045_v21, %v1003_v19  ;;  %v1784_v7 = vld [vmem:[#allocation14 + $0x170] sm:$0xff]  ;;  %v1786_v28 = vld [vmem:[#allocation14 + $0x180] sm:$0xff] }
 0x36a   :  { %8491 = vst [vmem:[#allocation61_spill] sm:$0xff] %v7175_v35  ;;  %v7180_v41 = vpack.c.bf16 %v2501_v8, %v2500_v58  ;;  %v1018_v4 = vadd.f32 %v4774_v15, %v7025_v23  ;;  %5326 = vmatpush3.bf16.msra.mxu0 %v5323_v51  ;;  %v2502_v31 = vmul.f32 %v7047_v47, %v1003_v19 }
 0x36b   :  { %v2503_v55 = vmul.f32 %v7047_v47, %v1008_v54  ;;  %v1013_v2 = vadd.f32 %v7025_v23, %v1012_v56  ;;  %v5327_v60 = vpack.c.bf16 %v2455_v49, %v2454_v34  ;;  %v7186_v37 = vpack.c.bf16 %v2471_v42, %v2470_v22  ;;  %5290 = vmatpush3.bf16.xpose.msk.msra.mxu1 %vm6972_vm1, %v7072_v32 }
 0x36c   :  { %8492 = vst [vmem:[#allocation62_spill] sm:$0xff] %v7180_v41  ;;  %v7188_v35 = vpack.c.bf16 %v2487_v53, %v2486_v6  ;;  %v2457_v58 = vmul.f32 %v6868_v46, %v1018_v4  ;;  %v2473_v8 = vmul.f32 %v6870_v29, %v1018_v4  ;;  %v2489_v51 = vmul.f32 %v7045_v21, %v1018_v4 }
 0x36d   :  { %8493 = vst [vmem:[#allocation63_spill] sm:$0xff] %v7186_v37  ;;  %v7196_v19 = vpack.c.bf16 %v2503_v55, %v2502_v31  ;;  %5293 = vmatprep.subr.msk.bf16.mxu1 %vm6972_vm1, %v7093_v14  ;;  %5328 = vmatprep.subr.bf16.mxu0 %v5327_v60  ;;  %v2456_v23 = vmul.f32 %v6868_v46, %v1013_v2  ;;  %v8505_v31 = vld [vmem:[#allocation39_spill] sm:$0xff] }
 0x36e   :  { %8494 = vst [vmem:[#allocation64_spill] sm:$0xff] %v7188_v35  ;;  %v2472_v42 = vmul.f32 %v6870_v29, %v1013_v2  ;;  %v2488_v49 = vmul.f32 %v7045_v21, %v1013_v2  ;;  %5330 = vmatpush3.bf16.msra.mxu0 %v5327_v60  ;;  %v2504_v32 = vmul.f32 %v7047_v47, %v1013_v2  ;;  %v8506_v2 = vld [vmem:[#allocation38_spill] sm:$0xff] }
 0x36f   :  { %8495 = vst [vmem:[#allocation65_spill] sm:$0xff] %v7196_v19  ;;  %v2505_v54 = vmul.f32 %v7047_v47, %v1018_v4  ;;  %v5331_v53 = vpack.c.bf16 %v2457_v58, %v2456_v23  ;;  %v1065_v46 = vmul.f32 %v6870_v29, %v6963_v11  ;;  %v8504_v4 = vld [vmem:[#allocation36_spill] sm:$0xff]  ;;  %v1093_v55 = vmul.f32 %v7045_v21, %v8505_v31  ;;  %v8507_v58 = vld [vmem:[#allocation42_spill] sm:$0xff] }
 0x370   :  { %v7206_v15 = vpack.c.bf16 %v2473_v8, %v2472_v42  ;;  %v7208_v34 = vpack.c.bf16 %v2489_v51, %v2488_v49  ;;  %v1092_v56 = vmul.f32 %v7045_v21, %v8504_v4  ;;  %v1094_v60 = vmul.f32 %v7045_v21, %v8506_v2  ;;  %v8508_v51 = vld [vmem:[#allocation41_spill] sm:$0xff]  ;;  %v1783_v19 = vld [vmem:[#allocation14 + $0x168] sm:$0xff] }
 0x371   :  { %v7210_v22 = vpack.c.bf16 %v2505_v54, %v2504_v32  ;;  %5332 = vmatprep.subr.bf16.mxu0 %v5331_v53  ;;  %v1095_v8 = vmul.f32 %v7045_v21, %v8507_v58  ;;  %v1096_v23 = vmul.f32 %v7045_v21, %v8508_v51  ;;  %v1097_v42 = vmul.f32 %v7047_v47, %v6963_v11 }
 0x372   :  { %8496 = vst [vmem:[#allocation66_spill] sm:$0xff] %v7206_v15  ;;  %8497 = vst [vmem:[#allocation67_spill] sm:$0xff] %v7208_v34  ;;  %5334 = vmatpush3.bf16.msra.mxu0 %v5331_v53  ;;  %v1098_v49 = vmul.f32 %v7047_v47, %v6959_v57  ;;  %v1099_v32 = vmul.f32 %v7047_v47, %v6983_v9  ;;  %v1101_v11 = vmul.f32 %v7047_v47, %v7004_v38  ;;  %v1787_v15 = vld [vmem:[#allocation14 + $0x188] sm:$0xff] }
 0x373   :  { %8498 = vst [vmem:[#allocation68_spill] sm:$0xff] %v7210_v22  ;;  %5336 = vmatprep.subr.bf16.mxu0 %v7063_v40  ;;  %5296 = vmatpush3.bf16.xpose.msk.msra.mxu1 %vm6972_vm1, %v7093_v14  ;;  %v1110_v54 = vmul.f32 %v7047_v47, %v8506_v2  ;;  %v1111_v53 = vmul.f32 %v7047_v47, %v8507_v58  ;;  %v1748_v58 = vld [vmem:[#allocation14 + $0x50] sm:$0xff] }
 0x374   :  { %5299 = vmatprep.subr.msk.bf16.mxu1 %vm6972_vm1, %v7114_v17 }
 0x37b   :  { %5302 = vmatpush3.bf16.xpose.msk.msra.mxu1 %vm6972_vm1, %v7114_v17  ;;  %v8503_v17 = vld [vmem:[#allocation37_spill] sm:$0xff] }
 0x37c   :  { %v1091_v6 = vmul.f32 %v7045_v21, %v8503_v17 }
 0x382   :  { %4808 = vmatmul.mubr.msk.f32.vlgmr.msra.gmra.mrb[24].mxu1 %vm249_vm0, %v6968_v44  ;;  %v8499_v44 = vld [vmem:[#allocation40_spill] sm:$0xff] }
 0x383   :  { %4810 = vmatprep.mubr.msk.f32.mxu1 %vm249_vm0, %v6997_v3  ;;  %v1086_v3 = vmul.f32 %v7045_v21, %v7000_v18 }
 0x386   :  { %4811 = vmatmul.mubr.msk.f32.gmra.mrb[26].mxu1 %vm249_vm0, %v6993_v12  ;;  %v8501_v12 = vld [vmem:[#allocation43_spill] sm:$0xff] }
 0x387   :  { %4813 = vmatprep.mubr.msk.f32.mxu1 %vm249_vm0, %v7015_v43  ;;  %v1088_v43 = vmul.f32 %v7045_v21, %v7018_v50 }
 0x38a   :  { %4814 = vmatmul.mubr.msk.f32.gmra.mrb[28].mxu1 %vm249_vm0, %v7011_v27  ;;  %v1087_v27 = vmul.f32 %v7045_v21, %v7022_v59 }
 0x38b   :  { %4816 = vmatprep.mubr.msk.f32.mxu1 %vm249_vm0, %v7039_v25  ;;  %v8502_v25 = vld [vmem:[#allocation35_spill] sm:$0xff] }
 0x38c   :  { %v1090_v14 = vmul.f32 %v7045_v21, %v8502_v25 }
 0x38e   :  { %4817 = vmatmul.mubr.msk.f32.gmra.mrb[30].mxu1 %vm249_vm0, %v7031_v63  ;;  %v1089_v63 = vmul.f32 %v7045_v21, %v6876_v45 }
 0x38f   :  { %4819 = vmatprep.mubr.msk.f32.mxu1 %vm249_vm0, %v6888_v30  ;;  %v1067_v30 = vmul.f32 %v6870_v29, %v6983_v9 }
 0x392   :  { %4820 = vmatmul.mubr.msk.f32.gmra.mrb[32].mxu1 %vm249_vm0, %v6880_v16  ;;  %v1066_v16 = vmul.f32 %v6870_v29, %v6959_v57 }
 0x393   :  { %4822 = vmatprep.mubr.msk.f32.mxu1 %vm249_vm0, %v6906_v20  ;;  %v1069_v20 = vmul.f32 %v6870_v29, %v7004_v38 }
 0x396   :  { %4823 = vmatmul.mubr.msk.f32.gmra.mrb[34].mxu1 %vm249_vm0, %v6898_v33  ;;  %v1068_v33 = vmul.f32 %v6870_v29, %v6979_v5 }
 0x397   :  { %4825 = vmatprep.mubr.msk.f32.mxu1 %vm249_vm0, %v6928_v24  ;;  %v1071_v24 = vmul.f32 %v6870_v29, %v7022_v59 }
 0x39a   :  { %4826 = vmatmul.mubr.msk.f32.gmra.mrb[36].mxu1 %vm249_vm0, %v6920_v0  ;;  %v1070_v0 = vmul.f32 %v6870_v29, %v7000_v18 }
 0x39b   :  { %4828 = vmatprep.mubr.msk.f32.mxu1 %vm249_vm0, %v6952_v10  ;;  %v1073_v10 = vmul.f32 %v6870_v29, %v6876_v45 }
 0x39e   :  { %4829 = vmatmul.mubr.msk.f32.gmra.mrb[38].mxu1 %vm249_vm0, %v6944_v1  ;;  %v1072_v1 = vmul.f32 %v6870_v29, %v7018_v50  ;;  %v8500_v29 = vld [vmem:[#allocation44_spill] sm:$0xff] }
 0x39f   :  { %4831 = vmatprep.mubr.msk.f32.mxu1 %vm249_vm0, %v1065_v46  ;;  %v1112_v46 = vmul.f32 %v7047_v47, %v8508_v51 }
 0x3a2   :  { %4832 = vmatmul.mubr.msk.f32.gmra.mrb[40].mxu1 %vm249_vm0, %v1066_v16  ;;  %v1739_v16 = vld [vmem:[#allocation14 + $0x8] sm:$0xff] }
 0x3a3   :  { %4834 = vmatprep.mubr.msk.f32.mxu1 %vm249_vm0, %v1067_v30  ;;  %v1738_v30 = vld [vmem:[#allocation14] sm:$0xff] }
 0x3a6   :  { %4835 = vmatmul.mubr.msk.f32.gmra.mrb[42].mxu1 %vm249_vm0, %v1068_v33 }
 0x3a7   :  { %4837 = vmatprep.mubr.msk.f32.mxu1 %vm249_vm0, %v1069_v20 }
 0x3aa   :  { %4838 = vmatmul.mubr.msk.f32.gmra.mrb[44].mxu1 %vm249_vm0, %v1070_v0 }
 0x3ab   :  { %4840 = vmatprep.mubr.msk.f32.mxu1 %vm249_vm0, %v1071_v24 }
 0x3ae   :  { %4841 = vmatmul.mubr.msk.f32.gmra.mrb[46].mxu1 %vm249_vm0, %v1072_v1  ;;  %v1741_v1 = vld [vmem:[#allocation14 + $0x18] sm:$0xff] }
 0x3af   :  { %4843 = vmatprep.mubr.msk.f32.mxu1 %vm249_vm0, %v1073_v10  ;;  %v1740_v10 = vld [vmem:[#allocation14 + $0x10] sm:$0xff] }
 0x3b2   :  { %4844 = vmatmul.mubr.msk.f32.gmra.mrb[48].mxu1 %vm249_vm0, %v6884_v26  ;;  %v1082_v26 = vmul.f32 %v7045_v21, %v6959_v57  ;;  %v1102_v57 = vmul.f32 %v7047_v47, %v7000_v18  ;;  %v1106_v18 = vmul.f32 %v7047_v47, %v8502_v25 }
 0x3b3   :  { %4846 = vmatprep.mubr.msk.f32.mxu1 %vm249_vm0, %v6910_v39  ;;  %v1084_v39 = vmul.f32 %v7045_v21, %v6979_v5 }
 0x3b6   :  { %4847 = vmatmul.mubr.msk.f32.gmra.mrb[50].mxu1 %vm249_vm0, %v6902_v62  ;;  %v1083_v62 = vmul.f32 %v7045_v21, %v6983_v9  ;;  %v1103_v9 = vmul.f32 %v7047_v47, %v7022_v59  ;;  %v1107_v59 = vmul.f32 %v7047_v47, %v8503_v17 }
 0x3b7   :  { %4849 = vmatprep.mubr.msk.f32.mxu1 %vm249_vm0, %v6932_v48  ;;  %v1085_v48 = vmul.f32 %v7045_v21, %v7004_v38  ;;  %v1100_v21 = vmul.f32 %v7047_v47, %v6979_v5  ;;  %v1104_v5 = vmul.f32 %v7047_v47, %v7018_v50  ;;  %v1105_v38 = vmul.f32 %v7047_v47, %v6876_v45 }
 0x3b8   :  { %v1108_v50 = vmul.f32 %v7047_v47, %v8504_v4  ;;  %v1109_v45 = vmul.f32 %v7047_v47, %v8505_v31  ;;  %v1746_v4 = vld [vmem:[#allocation14 + $0x40] sm:$0xff] }
 0x3ba   :  { %4850 = vmatmul.mubr.msk.f32.gmra.mrb[52].mxu1 %vm249_vm0, %v8499_v44 }
 0x3bb   :  { %4852 = vmatprep.mubr.msk.f32.mxu1 %vm249_vm0, %v8500_v29 }
 0x3be   :  { %4853 = vmatmul.mubr.msk.f32.gmra.mrb[54].mxu1 %vm249_vm0, %v8501_v12  ;;  %v1743_v12 = vld [vmem:[#allocation14 + $0x28] sm:$0xff] }
 0x3bf   :  { %4855 = vmatprep.mubr.msk.f32.mxu1 %vm249_vm0, %v1081_v61 }
 0x3c2   :  { %4856 = vmatmul.mubr.msk.f32.gmra.mrb[56].mxu1 %vm249_vm0, %v1082_v26  ;;  %v1742_v26 = vld [vmem:[#allocation14 + $0x20] sm:$0xff] }
 0x3c3   :  { %4858 = vmatprep.mubr.msk.f32.mxu1 %vm249_vm0, %v1083_v62 }
 0x3c6   :  { %4859 = vmatmul.mubr.msk.f32.gmra.mrb[58].mxu1 %vm249_vm0, %v1084_v39 }
 0x3c7   :  { %4861 = vmatprep.mubr.msk.f32.mxu1 %vm249_vm0, %v1085_v48 }
 0x3ca   :  { %4862 = vmatmul.mubr.msk.f32.gmra.mrb[60].mxu1 %vm249_vm0, %v1086_v3 }
 0x3cb   :  { %4864 = vmatprep.mubr.msk.f32.mxu1 %vm249_vm0, %v1087_v27  ;;  %v1745_v27 = vld [vmem:[#allocation14 + $0x38] sm:$0xff] }
 0x3ce   :  { %4865 = vmatmul.mubr.msk.f32.gmra.mrb[62].mxu1 %vm249_vm0, %v1088_v43  ;;  %v1744_v43 = vld [vmem:[#allocation14 + $0x30] sm:$0xff] }
 0x3cf   :  { %4867 = vmatprep.mubr.msk.f32.mxu1 %vm249_vm0, %v1089_v63 }
 0x3d2   :  { %4868 = vmatmul.mubr.msk.f32.gmra.mrb[64].mxu1 %vm249_vm0, %v1090_v14 }
 0x3d3   :  { %4870 = vmatprep.mubr.msk.f32.mxu1 %vm249_vm0, %v1091_v6  ;;  %v1747_v6 = vld [vmem:[#allocation14 + $0x48] sm:$0xff] }
 0x3d6   :  { %4871 = vmatmul.mubr.msk.f32.gmra.mrb[66].mxu1 %vm249_vm0, %v1092_v56 }
 0x3d7   :  { %4873 = vmatprep.mubr.msk.f32.mxu1 %vm249_vm0, %v1093_v55 }
 0x3da   :  { %4874 = vmatmul.mubr.msk.f32.gmra.mrb[68].mxu1 %vm249_vm0, %v1094_v60  ;;  %v1749_v60 = vld [vmem:[#allocation14 + $0x58] sm:$0xff] }
 0x3db   :  { %4876 = vmatprep.mubr.msk.f32.mxu1 %vm249_vm0, %v1095_v8 }
 0x3de   :  { %4877 = vmatmul.mubr.msk.f32.gmra.mrb[70].mxu1 %vm249_vm0, %v1096_v23 }
 0x3df   :  { %4879 = vmatprep.mubr.msk.f32.mxu1 %vm249_vm0, %v1097_v42 }
 0x3e2   :  { %4880 = vmatmul.mubr.msk.f32.gmra.mrb[72].mxu1 %vm249_vm0, %v1098_v49  ;;  %v1751_v49 = vld [vmem:[#allocation14 + $0x68] sm:$0xff] }
 0x3e3   :  { %4882 = vmatprep.mubr.msk.f32.mxu1 %vm249_vm0, %v1099_v32  ;;  %v1750_v32 = vld [vmem:[#allocation14 + $0x60] sm:$0xff] }
 0x3e6   :  { %4883 = vmatmul.mubr.msk.f32.gmra.mrb[74].mxu1 %vm249_vm0, %v1100_v21 }
 0x3e7   :  { %4885 = vmatprep.mubr.msk.f32.mxu1 %vm249_vm0, %v1101_v11 }
 0x3ea   :  { %4886 = vmatmul.mubr.msk.f32.gmra.mrb[76].mxu1 %vm249_vm0, %v1102_v57 }
 0x3eb   :  { %4888 = vmatprep.mubr.msk.f32.mxu1 %vm249_vm0, %v1103_v9 }
 0x3ee   :  { %4889 = vmatmul.mubr.msk.f32.gmra.mrb[78].mxu1 %vm249_vm0, %v1104_v5  ;;  %v1753_v5 = vld [vmem:[#allocation14 + $0x78] sm:$0xff] }
 0x3ef   :  { %4891 = vmatprep.mubr.msk.f32.mxu1 %vm249_vm0, %v1105_v38  ;;  %v1752_v38 = vld [vmem:[#allocation14 + $0x70] sm:$0xff] }
 0x3f2   :  { %4892 = vmatmul.mubr.msk.f32.gmra.mrb[80].mxu1 %vm249_vm0, %v1106_v18 }
 0x3f3   :  { %4894 = vmatprep.mubr.msk.f32.mxu1 %vm249_vm0, %v1107_v59 }
 0x3f6   :  { %4895 = vmatmul.mubr.msk.f32.gmra.mrb[82].mxu1 %vm249_vm0, %v1108_v50 }
 0x3f7   :  { %4897 = vmatprep.mubr.msk.f32.mxu1 %vm249_vm0, %v1109_v45 }
 0x3fa   :  { %4898 = vmatmul.mubr.msk.f32.gmra.mrb[84].mxu1 %vm249_vm0, %v1110_v54  ;;  %v1755_v54 = vld [vmem:[#allocation14 + $0x88] sm:$0xff] }
 0x3fb   :  { %4900 = vmatprep.mubr.msk.f32.mxu1 %vm249_vm0, %v1111_v53  ;;  %v1754_v53 = vld [vmem:[#allocation14 + $0x80] sm:$0xff] }
 0x3fe   :  { %4901 = vmatmul.mubr.msk.f32.gmra.mrb[86].mxu1 %vm249_vm0, %v1112_v46 }
 0x455   :  { %v4809_v33 = vpop.f32.mrb[24].mxu1 }
 0x456   :  { %v7389_v20 = vadd.f32 %v4809_v33, %v1739_v16  ;;  %v1419_v0 = vpop.f32.mrb[25].mxu1 }
 0x457   :  { %v7391_v24 = vadd.f32 %v1738_v30, %v1419_v0  ;;  %v1757_v0 = vld [vmem:[#allocation14 + $0x98] sm:$0xff] }
 0x458   :  { %1868 = vmax.xlane.f32.xlu1 %v7389_v20 }
 0x459   :  { %1866 = vmax.xlane.f32.xlu0 %v7391_v24  ;;  %v4812_v44 = vpop.f32.mrb[26].mxu1 }
 0x45a   :  { %v7395_v29 = vadd.f32 %v4812_v44, %v1741_v1  ;;  %v1429_v47 = vpop.f32.mrb[27].mxu1  ;;  %v1756_v1 = vld [vmem:[#allocation14 + $0x90] sm:$0xff] }
 0x45b   :  { %v7397_v61 = vadd.f32 %v1740_v10, %v1429_v47 }
 0x45c   :  { %1872 = vmax.xlane.f32.xlu1 %v7395_v29 }
 0x45d   :  { %1870 = vmax.xlane.f32.xlu0 %v7397_v61  ;;  %v4815_v62 = vpop.f32.mrb[28].mxu1 }
 0x45e   :  { %v7401_v39 = vadd.f32 %v4815_v62, %v1743_v12  ;;  %v1439_v48 = vpop.f32.mrb[29].mxu1  ;;  %v1758_v62 = vld [vmem:[#allocation14 + $0xa0] sm:$0xff] }
 0x45f   :  { %v7403_v3 = vadd.f32 %v1742_v26, %v1439_v48  ;;  %v1759_v26 = vld [vmem:[#allocation14 + $0xa8] sm:$0xff] }
 0x460   :  { %1876 = vmax.xlane.f32.xlu1 %v7401_v39 }
 0x461   :  { %1874 = vmax.xlane.f32.xlu0 %v7403_v3  ;;  %v4818_v63 = vpop.f32.mrb[30].mxu1 }
 0x462   :  { %v7407_v25 = vadd.f32 %v4818_v63, %v1745_v27  ;;  %v1449_v14 = vpop.f32.mrb[31].mxu1 }
 0x463   :  { %v7409_v17 = vadd.f32 %v1744_v43, %v1449_v14  ;;  %v1761_v14 = vld [vmem:[#allocation14 + $0xb8] sm:$0xff] }
 0x464   :  { %1880 = vmax.xlane.f32.xlu1 %v7407_v25 }
 0x465   :  { %1878 = vmax.xlane.f32.xlu0 %v7409_v17  ;;  %v4821_v56 = vpop.f32.mrb[32].mxu1 }
 0x466   :  { %v7413_v31 = vadd.f32 %v4821_v56, %v1747_v6  ;;  %v1459_v55 = vpop.f32.mrb[33].mxu1  ;;  %v1760_v6 = vld [vmem:[#allocation14 + $0xb0] sm:$0xff] }
 0x467   :  { %v7415_v2 = vadd.f32 %v1746_v4, %v1459_v55 }
 0x468   :  { %1884 = vmax.xlane.f32.xlu1 %v7413_v31 }
 0x469   :  { %1882 = vmax.xlane.f32.xlu0 %v7415_v2  ;;  %v4824_v8 = vpop.f32.mrb[34].mxu1 }
 0x46a   :  { %v7419_v51 = vadd.f32 %v4824_v8, %v1749_v60  ;;  %v1469_v23 = vpop.f32.mrb[35].mxu1  ;;  %v1762_v8 = vld [vmem:[#allocation14 + $0xc0] sm:$0xff] }
 0x46b   :  { %v7421_v42 = vadd.f32 %v1748_v58, %v1469_v23  ;;  %v1763_v58 = vld [vmem:[#allocation14 + $0xc8] sm:$0xff] }
 0x46c   :  { %1888 = vmax.xlane.f32.xlu1 %v7419_v51 }
 0x46d   :  { %1886 = vmax.xlane.f32.xlu0 %v7421_v42  ;;  %v4827_v21 = vpop.f32.mrb[36].mxu1 }
 0x46e   :  { %v7425_v11 = vadd.f32 %v4827_v21, %v1751_v49  ;;  %v1479_v57 = vpop.f32.mrb[37].mxu1 }
 0x46f   :  { %v7427_v9 = vadd.f32 %v1750_v32, %v1479_v57  ;;  %v1765_v57 = vld [vmem:[#allocation14 + $0xd8] sm:$0xff] }
 0x470   :  { %1892 = vmax.xlane.f32.xlu1 %v7425_v11 }
 0x471   :  { %1890 = vmax.xlane.f32.xlu0 %v7427_v9  ;;  %v4830_v18 = vpop.f32.mrb[38].mxu1 }
 0x472   :  { %v7431_v59 = vadd.f32 %v4830_v18, %v1753_v5  ;;  %v1489_v50 = vpop.f32.mrb[39].mxu1  ;;  %v1764_v5 = vld [vmem:[#allocation14 + $0xd0] sm:$0xff] }
 0x473   :  { %v7433_v45 = vadd.f32 %v1752_v38, %v1489_v50 }
 0x474   :  { %1896 = vmax.xlane.f32.xlu1 %v7431_v59 }
 0x475   :  { %1894 = vmax.xlane.f32.xlu0 %v7433_v45  ;;  %v4833_v46 = vpop.f32.mrb[40].mxu1 }
 0x476   :  { %v7437_v16 = vadd.f32 %v4833_v46, %v1755_v54  ;;  %v1499_v30 = vpop.f32.mrb[41].mxu1  ;;  %v1766_v46 = vld [vmem:[#allocation14 + $0xe0] sm:$0xff] }
 0x477   :  { %v7439_v33 = vadd.f32 %v1754_v53, %v1499_v30  ;;  %v1767_v53 = vld [vmem:[#allocation14 + $0xe8] sm:$0xff] }
 0x478   :  { %1900 = vmax.xlane.f32.xlu1 %v7437_v16 }
 0x479   :  { %1898 = vmax.xlane.f32.xlu0 %v7439_v33  ;;  %v4836_v10 = vpop.f32.mrb[42].mxu1 }
 0x47a   :  { %v7443_v44 = vadd.f32 %v4836_v10, %v1757_v0  ;;  %v1509_v47 = vpop.f32.mrb[43].mxu1 }
 0x47b   :  { %v7445_v12 = vadd.f32 %v1756_v1, %v1509_v47  ;;  %v1769_v47 = vld [vmem:[#allocation14 + $0xf8] sm:$0xff] }
 0x47c   :  { %1904 = vmax.xlane.f32.xlu1 %v7443_v44 }
 0x47d   :  { %1902 = vmax.xlane.f32.xlu0 %v7445_v12  ;;  %v4839_v48 = vpop.f32.mrb[44].mxu1 }
 0x47e   :  { %v7449_v27 = vadd.f32 %v4839_v48, %v1759_v26  ;;  %v1519_v43 = vpop.f32.mrb[45].mxu1  ;;  %v1768_v26 = vld [vmem:[#allocation14 + $0xf0] sm:$0xff] }
 0x47f   :  { %v7451_v63 = vadd.f32 %v1758_v62, %v1519_v43 }
 0x480   :  { %1908 = vmax.xlane.f32.xlu1 %v7449_v27 }
 0x481   :  { %1906 = vmax.xlane.f32.xlu0 %v7451_v63  ;;  %v4842_v4 = vpop.f32.mrb[46].mxu1 }
 0x482   :  { %v7455_v56 = vadd.f32 %v4842_v4, %v1761_v14  ;;  %v1529_v55 = vpop.f32.mrb[47].mxu1  ;;  %v1770_v4 = vld [vmem:[#allocation14 + $0x100] sm:$0xff] }
 0x483   :  { %v7457_v60 = vadd.f32 %v1760_v6, %v1529_v55  ;;  %v1771_v6 = vld [vmem:[#allocation14 + $0x108] sm:$0xff] }
 0x484   :  { %1912 = vmax.xlane.f32.xlu1 %v7455_v56 }
 0x485   :  { %1910 = vmax.xlane.f32.xlu0 %v7457_v60  ;;  %v4845_v23 = vpop.f32.mrb[48].mxu1 }
 0x486   :  { %v7461_v49 = vadd.f32 %v4845_v23, %v1763_v58  ;;  %v1539_v32 = vpop.f32.mrb[49].mxu1 }
 0x487   :  { %v7463_v21 = vadd.f32 %v1762_v8, %v1539_v32  ;;  %v1773_v32 = vld [vmem:[#allocation14 + $0x118] sm:$0xff] }
 0x488   :  { %1916 = vmax.xlane.f32.xlu1 %v7461_v49 }
 0x489   :  { %1914 = vmax.xlane.f32.xlu0 %v7463_v21  ;;  %v4848_v38 = vpop.f32.mrb[50].mxu1 }
 0x48a   :  { %v7467_v18 = vadd.f32 %v4848_v38, %v1765_v57  ;;  %v1549_v50 = vpop.f32.mrb[51].mxu1  ;;  %v1772_v57 = vld [vmem:[#allocation14 + $0x110] sm:$0xff] }
 0x48b   :  { %v7469_v54 = vadd.f32 %v1764_v5, %v1549_v50 }
 0x48c   :  { %1920 = vmax.xlane.f32.xlu1 %v7467_v18 }
 0x48d   :  { %1918 = vmax.xlane.f32.xlu0 %v7469_v54  ;;  %v4851_v30 = vpop.f32.mrb[52].mxu1 }
 0x48e   :  { %v7473_v0 = vadd.f32 %v4851_v30, %v1767_v53  ;;  %v1559_v1 = vpop.f32.mrb[53].mxu1  ;;  %v1774_v30 = vld [vmem:[#allocation14 + $0x120] sm:$0xff] }
 0x48f   :  { %v7475_v10 = vadd.f32 %v1766_v46, %v1559_v1  ;;  %v1775_v46 = vld [vmem:[#allocation14 + $0x128] sm:$0xff] }
 0x490   :  { %1924 = vmax.xlane.f32.xlu1 %v7473_v0 }
 0x491   :  { %1922 = vmax.xlane.f32.xlu0 %v7475_v10  ;;  %v4854_v62 = vpop.f32.mrb[54].mxu1 }
 0x492   :  { %v7479_v48 = vadd.f32 %v4854_v62, %v1769_v47  ;;  %v1569_v43 = vpop.f32.mrb[55].mxu1 }
 0x493   :  { %v7481_v14 = vadd.f32 %v1768_v26, %v1569_v43  ;;  %v1777_v43 = vld [vmem:[#allocation14 + $0x138] sm:$0xff] }
 0x494   :  { %1928 = vmax.xlane.f32.xlu1 %v7479_v48 }
 0x495   :  { %1926 = vmax.xlane.f32.xlu0 %v7481_v14  ;;  %v4857_v55 = vpop.f32.mrb[56].mxu1 }
 0x496   :  { %v7485_v58 = vadd.f32 %v4857_v55, %v1771_v6  ;;  %v1579_v8 = vpop.f32.mrb[57].mxu1  ;;  %v1776_v6 = vld [vmem:[#allocation14 + $0x130] sm:$0xff] }
 0x497   :  { %v7487_v23 = vadd.f32 %v1770_v4, %v1579_v8 }
 0x498   :  { %1932 = vmax.xlane.f32.xlu1 %v7485_v58 }
 0x499   :  { %1930 = vmax.xlane.f32.xlu0 %v7487_v23  ;;  %v4860_v5 = vpop.f32.mrb[58].mxu1 }
 0x49a   :  { %v7491_v38 = vadd.f32 %v4860_v5, %v1773_v32  ;;  %v1589_v50 = vpop.f32.mrb[59].mxu1  ;;  %v1778_v5 = vld [vmem:[#allocation14 + $0x140] sm:$0xff] }
 0x49b   :  { %v7493_v53 = vadd.f32 %v1772_v57, %v1589_v50  ;;  %v1779_v57 = vld [vmem:[#allocation14 + $0x148] sm:$0xff] }
 0x49c   :  { %1936 = vmax.xlane.f32.xlu1 %v7491_v38 }
 0x49d   :  { %1934 = vmax.xlane.f32.xlu0 %v7493_v53  ;;  %v4863_v1 = vpop.f32.mrb[60].mxu1 }
 0x49e   :  { %v7497_v47 = vadd.f32 %v4863_v1, %v1775_v46  ;;  %v1599_v26 = vpop.f32.mrb[61].mxu1 }
 0x49f   :  { %v7499_v62 = vadd.f32 %v1774_v30, %v1599_v26  ;;  %v1781_v26 = vld [vmem:[#allocation14 + $0x158] sm:$0xff] }
 0x4a0   :  { %1940 = vmax.xlane.f32.xlu1 %v7497_v47 }
 0x4a1   :  { %8509 = vst [vmem:[#allocation40_spill] sm:$0xff] %v7499_v62  ;;  %1938 = vmax.xlane.f32.xlu0 %v7499_v62  ;;  %v4866_v4 = vpop.f32.mrb[62].mxu1  ;;  %v1793_v62 = vld [vmem:[#allocation14 + $0x1b8] sm:$0xff] }
 0x4a2   :  { %v7503_v55 = vadd.f32 %v4866_v4, %v1777_v43  ;;  %v1609_v8 = vpop.f32.mrb[63].mxu1  ;;  %v1780_v43 = vld [vmem:[#allocation14 + $0x150] sm:$0xff] }
 0x4a3   :  { %v7505_v32 = vadd.f32 %v1776_v6, %v1609_v8 }
 0x4a4   :  { %1944 = vmax.xlane.f32.xlu1 %v7503_v55 }
 0x4a5   :  { %8510 = vst [vmem:[#allocation44_spill] sm:$0xff] %v7505_v32  ;;  %1942 = vmax.xlane.f32.xlu0 %v7505_v32  ;;  %v4869_v50 = vpop.f32.mrb[64].mxu1  ;;  %v1790_v32 = vld [vmem:[#allocation14 + $0x1a0] sm:$0xff] }
 0x4a6   :  { %v7509_v46 = vadd.f32 %v4869_v50, %v1779_v57  ;;  %v1619_v30 = vpop.f32.mrb[65].mxu1 }
 0x4a7   :  { %v7511_v1 = vadd.f32 %v1778_v5, %v1619_v30  ;;  %v1782_v30 = vld [vmem:[#allocation14 + $0x160] sm:$0xff] }
 0x4a8   :  { %1948 = vmax.xlane.f32.xlu1 %v7509_v46 }
 0x4a9   :  { %8511 = vst [vmem:[#allocation43_spill] sm:$0xff] %v7511_v1  ;;  %1946 = vmax.xlane.f32.xlu0 %v7511_v1  ;;  %v4872_v6 = vpop.f32.mrb[66].mxu1 }
 0x4aa   :  { %v7515_v4 = vadd.f32 %v4872_v6, %v1781_v26  ;;  %v1629_v8 = vpop.f32.mrb[67].mxu1  ;;  %v1785_v6 = vld [vmem:[#allocation14 + $0x178] sm:$0xff] }
 0x4ab   :  { %v7517_v22 = vadd.f32 %v1780_v43, %v1629_v8 }
 0x4ac   :  { %1952 = vmax.xlane.f32.xlu1 %v7515_v4 }
 0x4ad   :  { %8512 = vst [vmem:[#allocation35_spill] sm:$0xff] %v7517_v22  ;;  %1950 = vmax.xlane.f32.xlu0 %v7517_v22  ;;  %v4875_v57 = vpop.f32.mrb[68].mxu1  ;;  %v1791_v22 = vld [vmem:[#allocation14 + $0x1a8] sm:$0xff] }
 0x4ae   :  { %v7521_v5 = vadd.f32 %v4875_v57, %v1783_v19  ;;  %v1639_v50 = vpop.f32.mrb[69].mxu1 }
 0x4af   :  { %v7524_v34 = vadd.f32 %v1782_v30, %v1639_v50 }
 0x4b0   :  { %1956 = vmax.xlane.f32.xlu1 %v7521_v5 }
 0x4b1   :  { %v4878_v41 = vpop.f32.mrb[70].mxu1  ;;  %8513 = vst [vmem:[#allocation37_spill] sm:$0xff] %v7524_v34 }
 0x4b2   :  { %v1649_v26 = vpop.f32.mrb[71].mxu1  ;;  %v7527_v8 = vadd.f32 %v4878_v41, %v1785_v6 }
 0x4b3   :  { %v7530_v57 = vadd.f32 %v1784_v7, %v1649_v26 }
 0x4b4   :  { %1954 = vmax.xlane.f32.xlu1 %v7524_v34  ;;  %v1788_v34 = vld [vmem:[#allocation14 + $0x190] sm:$0xff] }
 0x4b5   :  { %v4881_v43 = vpop.f32.mrb[72].mxu1  ;;  %8514 = vst [vmem:[#allocation36_spill] sm:$0xff] %v7530_v57 }
 0x4b6   :  { %v1659_v35 = vpop.f32.mrb[73].mxu1  ;;  %v7533_v30 = vadd.f32 %v4881_v43, %v1787_v15 }
 0x4b7   :  { %v7536_v6 = vadd.f32 %v1786_v28, %v1659_v35 }
 0x4b8   :  { %1960 = vmax.xlane.f32.xlu1 %v7527_v8 }
 0x4b9   :  { %v4884_v19 = vpop.f32.mrb[74].mxu1  ;;  %8515 = vst [vmem:[#allocation39_spill] sm:$0xff] %v7536_v6 }
 0x4ba   :  { %v1669_v52 = vpop.f32.mrb[75].mxu1  ;;  %v7539_v26 = vadd.f32 %v4884_v19, %v1789_v36 }
 0x4bb   :  { %v7542_v43 = vadd.f32 %v1788_v34, %v1669_v52  ;;  %v1792_v34 = vld [vmem:[#allocation14 + $0x1b0] sm:$0xff] }
 0x4bc   :  { %1958 = vmax.xlane.f32.xlu1 %v7530_v57 }
 0x4bd   :  { %v4887_v50 = vpop.f32.mrb[76].mxu1  ;;  %8516 = vst [vmem:[#allocation38_spill] sm:$0xff] %v7542_v43 }
 0x4be   :  { %v1679_v37 = vpop.f32.mrb[77].mxu1  ;;  %v7545_v35 = vadd.f32 %v4887_v50, %v1791_v22  ;;  %v1795_v22 = vld [vmem:[#allocation14 + $0x1c8] sm:$0xff] }
 0x4bf   :  { %v7548_v19 = vadd.f32 %v1790_v32, %v1679_v37  ;;  %v1797_v32 = vld [vmem:[#allocation14 + $0x1d8] sm:$0xff] }
 0x4c0   :  { %1964 = vmax.xlane.f32.xlu1 %v7533_v30  ;;  %8517 = vst [vmem:[#allocation42_spill] sm:$0xff] %v7545_v35 }
 0x4c1   :  { %v4890_v41 = vpop.f32.mrb[78].mxu1  ;;  %8518 = vst [vmem:[#allocation41_spill] sm:$0xff] %v7548_v19 }
 0x4c2   :  { %v1689_v13 = vpop.f32.mrb[79].mxu1  ;;  %v7551_v52 = vadd.f32 %v4890_v41, %v1793_v62 }
 0x4c4   :  { %1962 = vmax.xlane.f32.xlu1 %v7536_v6  ;;  %8519 = vst [vmem:[#allocation69_spill] sm:$0xff] %v7551_v52 }
 0x4c5   :  { %v4893_v7 = vpop.f32.mrb[80].mxu1 }
 0x4c6   :  { %v1699_v40 = vpop.f32.mrb[81].mxu1  ;;  %v7557_v50 = vadd.f32 %v4893_v7, %v1795_v22 }
 0x4c8   :  { %1968 = vmax.xlane.f32.xlu1 %v7539_v26  ;;  %8521 = vst [vmem:[#allocation71_spill] sm:$0xff] %v7557_v50 }
 0x4c9   :  { %v4896_v15 = vpop.f32.mrb[82].mxu1 }
 0x4ca   :  { %v1709_v57 = vpop.f32.mrb[83].mxu1  ;;  %v7563_v41 = vadd.f32 %v4896_v15, %v1797_v32 }
 0x4cc   :  { %1966 = vmax.xlane.f32.xlu1 %v7542_v43  ;;  %v7554_v43 = vadd.f32 %v1792_v34, %v1689_v13  ;;  %v1796_v34 = vld [vmem:[#allocation14 + $0x1d0] sm:$0xff] }
 0x4cd   :  { %v4899_v28 = vpop.f32.mrb[84].mxu1  ;;  %v7568_v22 = vadd.f32 %v1796_v34, %v1709_v57  ;;  %v1801_v34 = vld [vmem:[#allocation14 + $0x1f8] sm:$0xff] }
 0x4ce   :  { %v1719_v1 = vpop.f32.mrb[85].mxu1  ;;  %8520 = vst [vmem:[#allocation70_spill] sm:$0xff] %v7554_v43 }
 0x4d0   :  { %1972 = vmax.xlane.f32.xlu1 %v7545_v35  ;;  %v1794_v35 = vld [vmem:[#allocation14 + $0x1c0] sm:$0xff] }
 0x4d1   :  { %v4902_v36 = vpop.f32.mrb[86].mxu1  ;;  %v7560_v37 = vadd.f32 %v1794_v35, %v1699_v40 }
 0x4d2   :  { %v1729_v6 = vpop.f32.mrb[87].mxu1 }
 0x4d3   :  { %8522 = vst [vmem:[#allocation72_spill] sm:$0xff] %v7560_v37 }
 0x4d4   :  { %1970 = vmax.xlane.f32.xlu1 %v7548_v19 }
 0x4d8   :  { %1976 = vmax.xlane.f32.xlu1 %v7551_v52 }
 0x4dc   :  { %1974 = vmax.xlane.f32.xlu1 %v7554_v43 }
 0x4e0   :  { %1980 = vmax.xlane.f32.xlu1 %v7557_v50  ;;  %v1799_v50 = vld [vmem:[#allocation14 + $0x1e8] sm:$0xff] }
 0x4e4   :  { %1978 = vmax.xlane.f32.xlu1 %v7560_v37 }
 0x4e5   :  { %v1869_v62 = vpop.xlane.xlu1 %1868 }
 0x4e6   :  { %v1995_v19 = vsub.f32 %v7389_v20, %v1869_v62  ;;  %v1867_v13 = vpop.xlane.xlu0 %1866  ;;  %v7572_v20 = vadd.f32 %v4899_v28, %v1799_v50  ;;  %v1798_v62 = vld [vmem:[#allocation14 + $0x1e0] sm:$0xff] }
 0x4e7   :  { %v1994_v52 = vsub.f32 %v7391_v24, %v1867_v13 }
 0x4e8   :  { %v2060_v43 = vmul.f32 1.442695, %v1995_v19  ;;  %1984 = vmax.xlane.f32.xlu1 %v7563_v41 }
 0x4e9   :  { %v1873_v7 = vpop.xlane.xlu1 %1872  ;;  %v2058_v40 = vmul.f32 1.442695, %v1994_v52 }
 0x4ea   :  { %5566 = vpow2.f32 %v2060_v43  ;;  %v1997_v35 = vsub.f32 %v7395_v29, %v1873_v7  ;;  %v1871_v37 = vpop.xlane.xlu0 %1870  ;;  %v7576_v43 = vadd.f32 %v1798_v62, %v1719_v1 }
 0x4eb   :  { %5568 = vpow2.f32 %v2058_v40  ;;  %v1996_v24 = vsub.f32 %v7397_v61, %v1871_v37  ;;  %v7583_v61 = vadd.f32 %v4902_v36, %v1801_v34  ;;  %v1800_v40 = vld [vmem:[#allocation14 + $0x1f0] sm:$0xff] }
 0x4ec   :  { %1982 = vmax.xlane.f32.xlu1 %v7568_v22  ;;  %v2064_v32 = vmul.f32 1.442695, %v1997_v35 }
 0x4ed   :  { %v1877_v15 = vpop.xlane.xlu1 %1876  ;;  %v2062_v29 = vmul.f32 1.442695, %v1996_v24 }
 0x4ee   :  { %v1875_v19 = vpop.xlane.xlu0 %1874  ;;  %5570 = vpow2.f32 %v2064_v32  ;;  %v1999_v52 = vsub.f32 %v7401_v39, %v1877_v15  ;;  %v7590_v15 = vadd.f32 %v1800_v40, %v1729_v6 }
 0x4ef   :  { %5572 = vpow2.f32 %v2062_v29  ;;  %v1998_v1 = vsub.f32 %v7403_v3, %v1875_v19 }
 0x4f0   :  { %1988 = vmax.xlane.f32.xlu1 %v7572_v20  ;;  %v2068_v50 = vmul.f32 1.442695, %v1999_v52 }
 0x4f1   :  { %v1881_v57 = vpop.xlane.xlu1 %1880  ;;  %v2066_v32 = vmul.f32 1.442695, %v1998_v1 }
 0x4f2   :  { %v1879_v13 = vpop.xlane.xlu0 %1878  ;;  %5574 = vpow2.f32 %v2068_v50  ;;  %v2001_v36 = vsub.f32 %v7407_v25, %v1881_v57 }
 0x4f3   :  { %5576 = vpow2.f32 %v2066_v32  ;;  %v2000_v29 = vsub.f32 %v7409_v17, %v1879_v13 }
 0x4f4   :  { %v7579_v7 = vpop.eup %5566  ;;  %1986 = vmax.xlane.f32.xlu1 %v7576_v43  ;;  %v2072_v19 = vmul.f32 1.442695, %v2001_v36 }
 0x4f5   :  { %v1885_v28 = vpop.xlane.xlu1 %1884  ;;  %2188 = vadd.xlane.f32.xlu0 %v7579_v7  ;;  %v7586_v35 = vpop.eup %5568  ;;  %v2070_v25 = vmul.f32 1.442695, %v2000_v29 }
 0x4f6   :  { %v1883_v37 = vpop.xlane.xlu0 %1882  ;;  %5578 = vpow2.f32 %v2072_v19  ;;  %v2003_v57 = vsub.f32 %v7413_v31, %v1885_v28 }
 0x4f7   :  { %5580 = vpow2.f32 %v2070_v25  ;;  %v2002_v17 = vsub.f32 %v7415_v2, %v1883_v37 }
 0x4f8   :  { %1992 = vmax.xlane.f32.xlu1 %v7583_v61  ;;  %v7593_v62 = vpop.eup %5570  ;;  %v2076_v40 = vmul.f32 1.442695, %v2003_v57 }
 0x4f9   :  { %v1889_v39 = vpop.xlane.xlu1 %1888  ;;  %2186 = vadd.xlane.f32.xlu0 %v7586_v35  ;;  %8523 = vst [vmem:[#allocation73_spill] sm:$0xff] %v7593_v62  ;;  %v7598_v52 = vpop.eup %5572  ;;  %v2074_v31 = vmul.f32 1.442695, %v2002_v17 }
 0x4fa   :  { %v1887_v24 = vpop.xlane.xlu0 %1886  ;;  %v2005_v36 = vsub.f32 %v7419_v51, %v1889_v39  ;;  %5582 = vpow2.f32 %v2076_v40 }
 0x4fb   :  { %v2004_v29 = vsub.f32 %v7421_v42, %v1887_v24  ;;  %5584 = vpow2.f32 %v2074_v31 }
 0x4fc   :  { %1990 = vmax.xlane.f32.xlu1 %v7590_v15  ;;  %v7602_v50 = vpop.eup %5574  ;;  %v2080_v19 = vmul.f32 1.442695, %v2005_v36 }
 0x4fd   :  { %v1893_v3 = vpop.xlane.xlu1 %1892  ;;  %2192 = vadd.xlane.f32.xlu0 %v7593_v62  ;;  %v7608_v32 = vpop.eup %5576  ;;  %v2078_v39 = vmul.f32 1.442695, %v2004_v29 }
 0x4fe   :  { %v1891_v6 = vpop.xlane.xlu0 %1890  ;;  %5586 = vpow2.f32 %v2080_v19  ;;  %v2007_v40 = vsub.f32 %v7425_v11, %v1893_v3 }
 0x500   :  { %v7614_v28 = vpop.eup %5578 }
 0x501   :  { %v1897_v34 = vpop.xlane.xlu1 %1896  ;;  %2190 = vadd.xlane.f32.xlu0 %v7598_v52  ;;  %v7621_v51 = vpop.eup %5580 }
 0x502   :  { %v1895_v13 = vpop.xlane.xlu0 %1894  ;;  %v2009_v29 = vsub.f32 %v7431_v59, %v1897_v34 }
 0x504   :  { %v7628_v36 = vpop.eup %5582 }
 0x505   :  { %v7604_v1 = vpop.xlane.xlu1 %1900  ;;  %2196 = vadd.xlane.f32.xlu0 %v7602_v50  ;;  %v7633_v3 = vpop.eup %5584 }
 0x506   :  { %v7617_v25 = vpop.xlane.xlu0 %1898 }
 0x509   :  { %v7611_v62 = vpop.xlane.xlu1 %1904  ;;  %2194 = vadd.xlane.f32.xlu0 %v7608_v32 }
 0x50a   :  { %v7626_v24 = vpop.xlane.xlu0 %1902 }
 0x50d   :  { %v1909_v57 = vpop.xlane.xlu1 %1908  ;;  %2200 = vadd.xlane.f32.xlu0 %v7614_v28 }
 0x50e   :  { %v2015_v2 = vsub.f32 %v7449_v27, %v1909_v57  ;;  %v2084_v27 = vmul.f32 1.442695, %v2007_v40  ;;  %v2006_v57 = vsub.f32 %v7427_v9, %v1891_v6  ;;  %v7640_v6 = vpop.eup %5586  ;;  %v2088_v40 = vmul.f32 1.442695, %v2009_v29 }
 0x510   :  { %v2100_v37 = vmul.f32 1.442695, %v2015_v2 }
 0x511   :  { %v1913_v17 = vpop.xlane.xlu1 %1912  ;;  %2198 = vadd.xlane.f32.xlu0 %v7621_v51 }
 0x512   :  { %5588 = vpow2.f32 %v2100_v37  ;;  %v2017_v42 = vsub.f32 %v7455_v56, %v1913_v17  ;;  %v2082_v56 = vmul.f32 1.442695, %v2006_v57  ;;  %v7636_v37 = vpop.xlane.xlu0 %1906 }
 0x513   :  { %5590 = vpow2.f32 %v2078_v39 }
 0x514   :  { %v2104_v31 = vmul.f32 1.442695, %v2017_v42  ;;  %v2008_v42 = vsub.f32 %v7433_v45, %v1895_v13  ;;  %v2011_v45 = vsub.f32 %v7437_v16, %v7604_v1 }
 0x515   :  { %v1917_v2 = vpop.xlane.xlu1 %1916  ;;  %2204 = vadd.xlane.f32.xlu0 %v7628_v36 }
 0x516   :  { %5592 = vpow2.f32 %v2104_v31  ;;  %v2019_v11 = vsub.f32 %v7461_v49, %v1917_v2  ;;  %v2086_v2 = vmul.f32 1.442695, %v2008_v42  ;;  %v2092_v29 = vmul.f32 1.442695, %v2011_v45 }
 0x517   :  { %5594 = vpow2.f32 %v2084_v27 }
 0x518   :  { %v2108_v19 = vmul.f32 1.442695, %v2019_v11 }
 0x519   :  { %v1921_v17 = vpop.xlane.xlu1 %1920  ;;  %2202 = vadd.xlane.f32.xlu0 %v7633_v3 }
 0x51a   :  { %5596 = vpow2.f32 %v2108_v19  ;;  %v2021_v9 = vsub.f32 %v7467_v18, %v1921_v17  ;;  %v7650_v18 = vpop.xlane.xlu0 %1910  ;;  %v2010_v17 = vsub.f32 %v7439_v33, %v7617_v25  ;;  %v2013_v33 = vsub.f32 %v7443_v44, %v7611_v62 }
 0x51b   :  { %5598 = vpow2.f32 %v2082_v56  ;;  %v2012_v44 = vsub.f32 %v7445_v12, %v7626_v24 }
 0x51c   :  { %v7642_v39 = vpop.eup %5588  ;;  %v2112_v49 = vmul.f32 1.442695, %v2021_v9  ;;  %v2090_v42 = vmul.f32 1.442695, %v2010_v17  ;;  %v2096_v45 = vmul.f32 1.442695, %v2013_v33  ;;  %v2014_v17 = vsub.f32 %v7451_v63, %v7636_v37 }
 0x51d   :  { %v1925_v31 = vpop.xlane.xlu1 %1924  ;;  %2208 = vadd.xlane.f32.xlu0 %v7640_v6  ;;  %2228 = vadd.xlane.f32.xlu1 %v7642_v39  ;;  %v7648_v34 = vpop.eup %5590  ;;  %v2016_v33 = vsub.f32 %v7457_v60, %v7650_v18 }
 0x51e   :  { %5600 = vpow2.f32 %v2112_v49  ;;  %v2023_v59 = vsub.f32 %v7473_v0, %v1925_v31  ;;  %v7665_v9 = vpop.xlane.xlu0 %1914 }
 0x51f   :  { %5602 = vpow2.f32 %v2088_v40 }
 0x520   :  { %v7652_v27 = vpop.eup %5592  ;;  %v2116_v57 = vmul.f32 1.442695, %v2023_v59 }
 0x521   :  { %v1929_v13 = vpop.xlane.xlu1 %1928  ;;  %2206 = vadd.xlane.f32.xlu0 %v7648_v34  ;;  %2232 = vadd.xlane.f32.xlu1 %v7652_v27  ;;  %v7659_v11 = vpop.eup %5594 }
 0x522   :  { %5604 = vpow2.f32 %v2116_v57  ;;  %v2025_v0 = vsub.f32 %v7479_v48, %v1929_v13 }
 0x523   :  { %5606 = vpow2.f32 %v2086_v2 }
 0x524   :  { %v7661_v19 = vpop.eup %5596  ;;  %v2120_v56 = vmul.f32 1.442695, %v2025_v0 }
 0x525   :  { %v1933_v16 = vpop.xlane.xlu1 %1932  ;;  %2212 = vadd.xlane.f32.xlu0 %v7659_v11  ;;  %2236 = vadd.xlane.f32.xlu1 %v7661_v19  ;;  %v7670_v1 = vpop.eup %5598 }
 0x526   :  { %5608 = vpow2.f32 %v2120_v56  ;;  %v2027_v48 = vsub.f32 %v7485_v58, %v1933_v16  ;;  %v7681_v58 = vpop.xlane.xlu0 %1918 }
 0x527   :  { %5610 = vpow2.f32 %v2092_v29  ;;  %v2094_v29 = vmul.f32 1.442695, %v2012_v44  ;;  %v2018_v44 = vsub.f32 %v7463_v21, %v7665_v9  ;;  %v2020_v21 = vsub.f32 %v7469_v54, %v7681_v58 }
 0x528   :  { %v7672_v49 = vpop.eup %5600  ;;  %v2124_v40 = vmul.f32 1.442695, %v2027_v48 }
 0x529   :  { %v1937_v25 = vpop.xlane.xlu1 %1936  ;;  %2210 = vadd.xlane.f32.xlu0 %v7670_v1  ;;  %2240 = vadd.xlane.f32.xlu1 %v7672_v49  ;;  %v7679_v59 = vpop.eup %5602 }
 0x52a   :  { %5612 = vpow2.f32 %v2124_v40  ;;  %v2029_v31 = vsub.f32 %v7491_v38, %v1937_v25  ;;  %v1923_v16 = vpop.xlane.xlu0 %1922 }
 0x52b   :  { %5614 = vpow2.f32 %v2090_v42  ;;  %v2098_v42 = vmul.f32 1.442695, %v2014_v17 }
 0x52c   :  { %v7683_v57 = vpop.eup %5604  ;;  %v2128_v2 = vmul.f32 1.442695, %v2029_v31 }
 0x52d   :  { %v1941_v62 = vpop.xlane.xlu1 %1940  ;;  %2216 = vadd.xlane.f32.xlu0 %v7679_v59  ;;  %2244 = vadd.xlane.f32.xlu1 %v7683_v57  ;;  %v7690_v13 = vpop.eup %5606 }
 0x52e   :  { %5616 = vpow2.f32 %v2128_v2  ;;  %v2031_v38 = vsub.f32 %v7497_v47, %v1941_v62 }
 0x52f   :  { %5618 = vpow2.f32 %v2096_v45  ;;  %v2102_v45 = vmul.f32 1.442695, %v2016_v33  ;;  %v2110_v33 = vmul.f32 1.442695, %v2020_v21 }
 0x530   :  { %v7692_v0 = vpop.eup %5608  ;;  %v2132_v56 = vmul.f32 1.442695, %v2031_v38 }
 0x531   :  { %v1945_v12 = vpop.xlane.xlu1 %1944  ;;  %2214 = vadd.xlane.f32.xlu0 %v7690_v13  ;;  %2248 = vadd.xlane.f32.xlu1 %v7692_v0  ;;  %v7699_v47 = vpop.eup %5610 }
 0x532   :  { %5620 = vpow2.f32 %v2132_v56  ;;  %v2033_v24 = vsub.f32 %v7503_v55, %v1945_v12  ;;  %v1927_v55 = vpop.xlane.xlu0 %1926  ;;  %v2106_v56 = vmul.f32 1.442695, %v2018_v44 }
 0x533   :  { %5622 = vpow2.f32 %v2094_v29 }
 0x534   :  { %v7701_v48 = vpop.eup %5612  ;;  %v2136_v40 = vmul.f32 1.442695, %v2033_v24 }
 0x535   :  { %v1949_v63 = vpop.xlane.xlu1 %1948  ;;  %2220 = vadd.xlane.f32.xlu0 %v7699_v47  ;;  %2252 = vadd.xlane.f32.xlu1 %v7701_v48  ;;  %v7708_v25 = vpop.eup %5614 }
 0x536   :  { %5624 = vpow2.f32 %v2136_v40  ;;  %v2035_v37 = vsub.f32 %v7509_v46, %v1949_v63  ;;  %v1931_v29 = vpop.xlane.xlu0 %1930  ;;  %v2022_v40 = vsub.f32 %v7475_v10, %v1923_v16  ;;  %v2024_v10 = vsub.f32 %v7481_v14, %v1927_v55 }
 0x537   :  { %5626 = vpow2.f32 %v2098_v42 }
 0x538   :  { %v7710_v31 = vpop.eup %5616  ;;  %v2140_v2 = vmul.f32 1.442695, %v2035_v37  ;;  %v2114_v63 = vmul.f32 1.442695, %v2022_v40  ;;  %v8527_v40 = vld [vmem:[#allocation40_spill] sm:$0xff] }
 0x539   :  { %v1953_v60 = vpop.xlane.xlu1 %1952  ;;  %2218 = vadd.xlane.f32.xlu0 %v7708_v25  ;;  %2256 = vadd.xlane.f32.xlu1 %v7710_v31  ;;  %v7717_v46 = vpop.eup %5618 }
 0x53a   :  { %5628 = vpow2.f32 %v2140_v2  ;;  %v2037_v18 = vsub.f32 %v7515_v4, %v1953_v60  ;;  %v1935_v58 = vpop.xlane.xlu0 %1934  ;;  %v2026_v60 = vsub.f32 %v7487_v23, %v1931_v29 }
 0x53b   :  { %5630 = vpow2.f32 %v2102_v45  ;;  %v2028_v23 = vsub.f32 %v7493_v53, %v1935_v58  ;;  %v8529_v58 = vld [vmem:[#allocation44_spill] sm:$0xff] }
 0x53c   :  { %v7719_v62 = vpop.eup %5620  ;;  %v2144_v38 = vmul.f32 1.442695, %v2037_v18  ;;  %v2122_v55 = vmul.f32 1.442695, %v2026_v60 }
 0x53d   :  { %2224 = vadd.xlane.f32.xlu0 %v7717_v46  ;;  %v1957_v17 = vpop.xlane.xlu1 %1956  ;;  %2260 = vadd.xlane.f32.xlu1 %v7719_v62  ;;  %v7726_v4 = vpop.eup %5622 }
 0x53e   :  { %5632 = vpow2.f32 %v2144_v38  ;;  %v2039_v9 = vsub.f32 %v7521_v5, %v1957_v17  ;;  %v1939_v18 = vpop.xlane.xlu0 %1938 }
 0x53f   :  { %5634 = vpow2.f32 %v2106_v56  ;;  %v2118_v56 = vmul.f32 1.442695, %v2024_v10 }
 0x540   :  { %v7728_v12 = vpop.eup %5624  ;;  %v2148_v24 = vmul.f32 1.442695, %v2039_v9 }
 0x541   :  { %2222 = vadd.xlane.f32.xlu0 %v7726_v4  ;;  %v7732_v42 = vpop.xlane.xlu1 %1954  ;;  %2264 = vadd.xlane.f32.xlu1 %v7728_v12  ;;  %v7735_v54 = vpop.eup %5626 }
 0x542   :  { %5636 = vpow2.f32 %v2148_v24  ;;  %v1943_v21 = vpop.xlane.xlu0 %1942 }
 0x543   :  { %5638 = vpow2.f32 %v2110_v33  ;;  %v2030_v33 = vsub.f32 %v8527_v40, %v1939_v18  ;;  %v2032_v60 = vsub.f32 %v8529_v58, %v1943_v21  ;;  %v8532_v21 = vld [vmem:[#allocation35_spill] sm:$0xff] }
 0x544   :  { %v7737_v5 = vpop.eup %5628  ;;  %5640 = vpow2.f32 %v2114_v63 }
 0x545   :  { %8524 = vst [vmem:[#allocation74_spill] sm:$0xff] %v7737_v5  ;;  %2226 = vadd.xlane.f32.xlu0 %v7735_v54  ;;  %v1961_v37 = vpop.xlane.xlu1 %1960  ;;  %2268 = vadd.xlane.f32.xlu1 %v7737_v5  ;;  %v7743_v2 = vpop.eup %5630 }
 0x546   :  { %v2041_v16 = vsub.f32 %v7527_v8, %v1961_v37  ;;  %v2126_v37 = vmul.f32 1.442695, %v2028_v23  ;;  %v1947_v53 = vpop.xlane.xlu0 %1946 }
 0x548   :  { %v7745_v45 = vpop.eup %5632  ;;  %v2152_v44 = vmul.f32 1.442695, %v2041_v16 }
 0x549   :  { %8525 = vst [vmem:[#allocation75_spill] sm:$0xff] %v7745_v45  ;;  %2230 = vadd.xlane.f32.xlu0 %v7743_v2  ;;  %v7749_v38 = vpop.xlane.xlu1 %1958  ;;  %2272 = vadd.xlane.f32.xlu1 %v7745_v45  ;;  %v7752_v14 = vpop.eup %5634 }
 0x54a   :  { %5642 = vpow2.f32 %v2152_v44  ;;  %v2130_v44 = vmul.f32 1.442695, %v2030_v33  ;;  %v1951_v33 = vpop.xlane.xlu0 %1950 }
 0x54b   :  { %5644 = vpow2.f32 %v2118_v56 }
 0x54c   :  { %v7754_v8 = vpop.eup %5636  ;;  %5646 = vpow2.f32 %v2122_v55 }
 0x54d   :  { %8526 = vst [vmem:[#allocation76_spill] sm:$0xff] %v7754_v8  ;;  %2234 = vadd.xlane.f32.xlu0 %v7752_v14  ;;  %v1965_v17 = vpop.xlane.xlu1 %1964  ;;  %2276 = vadd.xlane.f32.xlu1 %v7754_v8  ;;  %v7760_v9 = vpop.eup %5638 }
 0x54e   :  { %v2043_v29 = vsub.f32 %v7533_v30, %v1965_v17  ;;  %v7764_v10 = vpop.eup %5640  ;;  %v8530_v17 = vld [vmem:[#allocation43_spill] sm:$0xff] }
 0x54f   :  { %v2034_v23 = vsub.f32 %v8530_v17, %v1947_v53  ;;  %v8533_v53 = vld [vmem:[#allocation42_spill] sm:$0xff] }
 0x550   :  { %v2156_v24 = vmul.f32 1.442695, %v2043_v29 }
 0x551   :  { %2238 = vadd.xlane.f32.xlu0 %v7760_v9  ;;  %v1963_v63 = vpop.xlane.xlu1 %1962 }
 0x552   :  { %5648 = vpow2.f32 %v2156_v24  ;;  %v2134_v24 = vmul.f32 1.442695, %v2032_v60 }
 0x553   :  { %5650 = vpow2.f32 %v2126_v37  ;;  %v2138_v37 = vmul.f32 1.442695, %v2034_v23 }
 0x554   :  { %v7766_v16 = vpop.eup %5642  ;;  %5652 = vpow2.f32 %v2130_v44  ;;  %v2036_v44 = vsub.f32 %v8532_v21, %v1951_v33 }
 0x555   :  { %8528 = vst [vmem:[#allocation40_spill] sm:$0xff] %v7766_v16  ;;  %2242 = vadd.xlane.f32.xlu0 %v7764_v10  ;;  %v1969_v30 = vpop.xlane.xlu1 %1968  ;;  %2280 = vadd.xlane.f32.xlu1 %v7766_v16  ;;  %v7772_v56 = vpop.eup %5644 }
 0x556   :  { %v2045_v18 = vsub.f32 %v7539_v26, %v1969_v30  ;;  %v7776_v40 = vpop.eup %5646  ;;  %v2142_v23 = vmul.f32 1.442695, %v2036_v44 }
 0x558   :  { %v2160_v55 = vmul.f32 1.442695, %v2045_v18  ;;  %v8534_v18 = vld [vmem:[#allocation37_spill] sm:$0xff] }
 0x559   :  { %2246 = vadd.xlane.f32.xlu0 %v7772_v56  ;;  %v1967_v29 = vpop.xlane.xlu1 %1966 }
 0x55a   :  { %5654 = vpow2.f32 %v2160_v55  ;;  %v2038_v55 = vsub.f32 %v8534_v18, %v7732_v42  ;;  %v8537_v42 = vld [vmem:[#allocation69_spill] sm:$0xff] }
 0x55b   :  { %5656 = vpow2.f32 %v2134_v24 }
 0x55c   :  { %v7778_v16 = vpop.eup %5648  ;;  %5658 = vpow2.f32 %v2138_v37  ;;  %v2146_v24 = vmul.f32 1.442695, %v2038_v55  ;;  %v8536_v37 = vld [vmem:[#allocation36_spill] sm:$0xff] }
 0x55d   :  { %8531 = vst [vmem:[#allocation44_spill] sm:$0xff] %v7778_v16  ;;  %2250 = vadd.xlane.f32.xlu0 %v7776_v40  ;;  %v1973_v26 = vpop.xlane.xlu1 %1972  ;;  %2284 = vadd.xlane.f32.xlu1 %v7778_v16  ;;  %v7784_v58 = vpop.eup %5650 }
 0x55e   :  { %v2047_v30 = vsub.f32 %v8533_v53, %v1973_v26  ;;  %v7789_v8 = vpop.eup %5652  ;;  %v2040_v26 = vsub.f32 %v8536_v37, %v7749_v38  ;;  %v8542_v37 = vld [vmem:[#allocation71_spill] sm:$0xff] }
 0x560   :  { %v2164_v60 = vmul.f32 1.442695, %v2047_v30  ;;  %v8538_v30 = vld [vmem:[#allocation39_spill] sm:$0xff]  ;;  %v2150_v55 = vmul.f32 1.442695, %v2040_v26  ;;  %v8543_v26 = vld [vmem:[#allocation41_spill] sm:$0xff] }
 0x561   :  { %2254 = vadd.xlane.f32.xlu0 %v7784_v58  ;;  %v1971_v17 = vpop.xlane.xlu1 %1970 }
 0x562   :  { %5660 = vpow2.f32 %v2164_v60  ;;  %v2042_v60 = vsub.f32 %v8538_v30, %v1963_v63 }
 0x563   :  { %5662 = vpow2.f32 %v2142_v23 }
 0x564   :  { %v7791_v16 = vpop.eup %5654  ;;  %5664 = vpow2.f32 %v2146_v24  ;;  %v2154_v23 = vmul.f32 1.442695, %v2042_v60 }
 0x565   :  { %8535 = vst [vmem:[#allocation43_spill] sm:$0xff] %v7791_v16  ;;  %2258 = vadd.xlane.f32.xlu0 %v7789_v8  ;;  %v1977_v33 = vpop.xlane.xlu1 %1976  ;;  %2288 = vadd.xlane.f32.xlu1 %v7791_v16  ;;  %v7798_v53 = vpop.eup %5656 }
 0x566   :  { %v2049_v21 = vsub.f32 %v8537_v42, %v1977_v33  ;;  %v7802_v45 = vpop.eup %5658  ;;  %v8541_v33 = vld [vmem:[#allocation38_spill] sm:$0xff] }
 0x567   :  { %8539 = vst [vmem:[#allocation35_spill] sm:$0xff] %v7802_v45  ;;  %v2044_v24 = vsub.f32 %v8541_v33, %v1967_v29 }
 0x568   :  { %v2168_v44 = vmul.f32 1.442695, %v2049_v21 }
 0x569   :  { %2262 = vadd.xlane.f32.xlu0 %v7798_v53  ;;  %v1975_v18 = vpop.xlane.xlu1 %1974  ;;  %v2158_v60 = vmul.f32 1.442695, %v2044_v24  ;;  %v8545_v24 = vld [vmem:[#allocation72_spill] sm:$0xff] }
 0x56a   :  { %5666 = vpow2.f32 %v2168_v44  ;;  %v2046_v44 = vsub.f32 %v8543_v26, %v1971_v17 }
 0x56b   :  { %5668 = vpow2.f32 %v2150_v55 }
 0x56c   :  { %v7804_v16 = vpop.eup %5660  ;;  %5670 = vpow2.f32 %v2154_v23  ;;  %v2162_v55 = vmul.f32 1.442695, %v2046_v44 }
 0x56d   :  { %8540 = vst [vmem:[#allocation42_spill] sm:$0xff] %v7804_v16  ;;  %2266 = vadd.xlane.f32.xlu0 %v7802_v45  ;;  %v1981_v38 = vpop.xlane.xlu1 %1980  ;;  %2292 = vadd.xlane.f32.xlu1 %v7804_v16  ;;  %v7810_v42 = vpop.eup %5662 }
 0x56e   :  { %v2051_v63 = vsub.f32 %v8542_v37, %v1981_v38  ;;  %v7814_v5 = vpop.eup %5664  ;;  %v8544_v38 = vld [vmem:[#allocation70_spill] sm:$0xff] }
 0x56f   :  { %v2048_v23 = vsub.f32 %v8544_v38, %v1975_v18 }
 0x570   :  { %v2172_v21 = vmul.f32 1.442695, %v2051_v63 }
 0x571   :  { %2270 = vadd.xlane.f32.xlu0 %v7810_v42  ;;  %v1979_v30 = vpop.xlane.xlu1 %1978  ;;  %v2166_v26 = vmul.f32 1.442695, %v2048_v23 }
 0x572   :  { %5672 = vpow2.f32 %v2172_v21  ;;  %v2050_v63 = vsub.f32 %v8545_v24, %v1979_v30 }
 0x573   :  { %5674 = vpow2.f32 %v2158_v60 }
 0x574   :  { %v7816_v45 = vpop.eup %5666  ;;  %5676 = vpow2.f32 %v2162_v55  ;;  %v2170_v60 = vmul.f32 1.442695, %v2050_v63 }
 0x575   :  { %2274 = vadd.xlane.f32.xlu0 %v7814_v5  ;;  %v1985_v29 = vpop.xlane.xlu1 %1984  ;;  %2296 = vadd.xlane.f32.xlu1 %v7816_v45  ;;  %v7822_v33 = vpop.eup %5668 }
 0x576   :  { %v2053_v17 = vsub.f32 %v7563_v41, %v1985_v29  ;;  %v7826_v44 = vpop.eup %5670 }
 0x578   :  { %v2176_v37 = vmul.f32 1.442695, %v2053_v17 }
 0x579   :  { %2278 = vadd.xlane.f32.xlu0 %v7822_v33  ;;  %v1983_v21 = vpop.xlane.xlu1 %1982 }
 0x57a   :  { %5678 = vpow2.f32 %v2176_v37  ;;  %v2052_v18 = vsub.f32 %v7568_v22, %v1983_v21 }
 0x57b   :  { %5680 = vpow2.f32 %v2166_v26 }
 0x57c   :  { %v7828_v16 = vpop.eup %5672  ;;  %5682 = vpow2.f32 %v2170_v60  ;;  %v2174_v38 = vmul.f32 1.442695, %v2052_v18 }
 0x57d   :  { %2282 = vadd.xlane.f32.xlu0 %v7826_v44  ;;  %v1989_v41 = vpop.xlane.xlu1 %1988  ;;  %2300 = vadd.xlane.f32.xlu1 %v7828_v16  ;;  %v7834_v55 = vpop.eup %5674 }
 0x57e   :  { %v2055_v30 = vsub.f32 %v7572_v20, %v1989_v41  ;;  %v7838_v37 = vpop.eup %5676 }
 0x580   :  { %v2180_v29 = vmul.f32 1.442695, %v2055_v30 }
 0x581   :  { %2286 = vadd.xlane.f32.xlu0 %v7834_v55  ;;  %v1987_v23 = vpop.xlane.xlu1 %1986 }
 0x582   :  { %5684 = vpow2.f32 %v2180_v29  ;;  %v2054_v17 = vsub.f32 %v7576_v43, %v1987_v23  ;;  %v2189_v22 = vpop.xlane.xlu0 %2188 }
 0x583   :  { %5686 = vpow2.f32 %v2174_v38 }
 0x584   :  { %v7840_v24 = vpop.eup %5678  ;;  %v2178_v63 = vmul.f32 1.442695, %v2054_v17  ;;  %5688 = vrcp.f32 %v2189_v22 }
 0x585   :  { %2290 = vadd.xlane.f32.xlu0 %v7838_v37  ;;  %v1993_v20 = vpop.xlane.xlu1 %1992  ;;  %2304 = vadd.xlane.f32.xlu1 %v7840_v24  ;;  %v7845_v60 = vpop.eup %5680 }
 0x586   :  { %v2057_v21 = vsub.f32 %v7583_v61, %v1993_v20  ;;  %v2187_v26 = vpop.xlane.xlu0 %2186  ;;  %v7849_v29 = vpop.eup %5682 }
 0x587   :  { %5690 = vrcp.f32 %v2187_v26 }
 0x588   :  { %v2184_v43 = vmul.f32 1.442695, %v2057_v21  ;;  %5692 = vpow2.f32 %v2178_v63 }
 0x589   :  { %2294 = vadd.xlane.f32.xlu0 %v7845_v60  ;;  %v1991_v18 = vpop.xlane.xlu1 %1990 }
 0x58a   :  { %5694 = vpow2.f32 %v2184_v43  ;;  %v2056_v41 = vsub.f32 %v7590_v15, %v1991_v18  ;;  %v2193_v30 = vpop.xlane.xlu0 %2192  ;;  %v8547_v18 = vld [vmem:[#allocation45_spill] sm:$0xff] }
 0x58b   :  { %5696 = vrcp.f32 %v2193_v30 }
 0x58c   :  { %v7851_v38 = vpop.eup %5684  ;;  %v2182_v23 = vmul.f32 1.442695, %v2056_v41 }
 0x58d   :  { %2298 = vadd.xlane.f32.xlu0 %v7849_v29  ;;  %2308 = vadd.xlane.f32.xlu1 %v7851_v38  ;;  %v7855_v17 = vpop.eup %5686 }
 0x58e   :  { %5698 = vpow2.f32 %v2182_v23  ;;  %v2191_v61 = vpop.xlane.xlu0 %2190  ;;  %v5689_v22 = vpop.eup %5688  ;;  %v8548_v23 = vld [vmem:[#allocation48_spill] sm:$0xff] }
 0x58f   :  { %5700 = vrcp.f32 %v2191_v61  ;;  %v2379_v26 = vmul.f32 %v5689_v22, %v7579_v7 }
 0x591   :  { %v5691_v63 = vpop.eup %5690  ;;  %2302 = vadd.xlane.f32.xlu0 %v7855_v17 }
 0x592   :  { %v2197_v15 = vpop.xlane.xlu0 %2196  ;;  %v2378_v20 = vmul.f32 %v5691_v63, %v7586_v35  ;;  %v7859_v21 = vpop.eup %5692  ;;  %v8549_v63 = vld [vmem:[#allocation50_spill] sm:$0xff] }
 0x593   :  { %5702 = vrcp.f32 %v2197_v15  ;;  %v8550_v15 = vld [vmem:[#allocation73_spill] sm:$0xff] }
 0x594   :  { %v7862_v43 = vpop.eup %5694  ;;  %4935 = vmatprep.mubr.f32.mxu0 %v2378_v20 }
 0x595   :  { %8546 = vst [vmem:[#allocation37_spill] sm:$0xff] %v7862_v43  ;;  %4936 = vmatmul.mubr.f32.vlgmr.msra.gmra.mrb[24].mxu0 %v2379_v26  ;;  %2306 = vadd.xlane.f32.xlu0 %v7859_v21  ;;  %v5697_v30 = vpop.eup %5696 }
 0x596   :  { %5338 = vmatpush3.bf16.msra.mxu0 %v8547_v18  ;;  %2312 = vadd.xlane.f32.xlu1 %v7862_v43  ;;  %v2195_v41 = vpop.xlane.xlu0 %2194  ;;  %v2381_v20 = vmul.f32 %v5697_v30, %v8550_v15  ;;  %v8551_v18 = vld [vmem:[#allocation53_spill] sm:$0xff] }
 0x597   :  { %5340 = vmatprep.subr.bf16.mxu0 %v8548_v23  ;;  %5704 = vrcp.f32 %v2195_v41 }
 0x598   :  { %v7868_v35 = vpop.eup %5698 }
 0x599   :  { %v5701_v61 = vpop.eup %5700  ;;  %2310 = vadd.xlane.f32.xlu0 %v7868_v35 }
 0x59a   :  { %5342 = vmatpush3.bf16.msra.mxu0 %v8548_v23  ;;  %v2201_v7 = vpop.xlane.xlu0 %2200  ;;  %v2380_v22 = vmul.f32 %v5701_v61, %v7598_v52  ;;  %v8552_v61 = vld [vmem:[#allocation56_spill] sm:$0xff] }
 0x59b   :  { %5344 = vmatprep.subr.bf16.mxu0 %v8549_v63  ;;  %5706 = vrcp.f32 %v2201_v7 }
 0x59c   :  { %4938 = vmatprep.mubr.f32.mxu0 %v2380_v22  ;;  %v8553_v22 = vld [vmem:[#allocation59_spill] sm:$0xff] }
 0x59d   :  { %4939 = vmatmul.mubr.f32.gmra.mrb[26].mxu0 %v2381_v20  ;;  %v5703_v41 = vpop.eup %5702 }
 0x59e   :  { %5346 = vmatpush3.bf16.msra.mxu0 %v8549_v63  ;;  %v2199_v26 = vpop.xlane.xlu0 %2198  ;;  %v2383_v30 = vmul.f32 %v5703_v41, %v7602_v50 }
 0x59f   :  { %5348 = vmatprep.subr.bf16.mxu0 %v8551_v18  ;;  %5708 = vrcp.f32 %v2199_v26 }
 0x5a1   :  { %v5705_v43 = vpop.eup %5704 }
 0x5a2   :  { %5350 = vmatpush3.bf16.msra.mxu0 %v8551_v18  ;;  %v2205_v23 = vpop.xlane.xlu0 %2204  ;;  %v2382_v52 = vmul.f32 %v5705_v43, %v7608_v32  ;;  %v8554_v43 = vld [vmem:[#allocation63_spill] sm:$0xff]  ;;  %v8555_v18 = vld [vmem:[#allocation66_spill] sm:$0xff] }
 0x5a3   :  { %5352 = vmatprep.subr.bf16.mxu0 %v8552_v61  ;;  %5710 = vrcp.f32 %v2205_v23 }
 0x5a4   :  { %4941 = vmatprep.mubr.f32.mxu0 %v2382_v52 }
 0x5a5   :  { %4942 = vmatmul.mubr.f32.gmra.mrb[28].mxu0 %v2383_v30  ;;  %v5707_v63 = vpop.eup %5706 }
 0x5a6   :  { %5354 = vmatpush3.bf16.msra.mxu0 %v8552_v61  ;;  %v2203_v7 = vpop.xlane.xlu0 %2202  ;;  %v2385_v50 = vmul.f32 %v5707_v63, %v7614_v28  ;;  %v8556_v61 = vld [vmem:[#allocation46_spill] sm:$0xff] }
 0x5a7   :  { %5356 = vmatprep.subr.bf16.mxu0 %v8553_v22  ;;  %5712 = vrcp.f32 %v2203_v7 }
 0x5a9   :  { %v5709_v15 = vpop.eup %5708 }
 0x5aa   :  { %5358 = vmatpush3.bf16.msra.mxu0 %v8553_v22  ;;  %v2209_v20 = vpop.xlane.xlu0 %2208  ;;  %v2384_v32 = vmul.f32 %v5709_v15, %v7621_v51  ;;  %v2229_v7 = vpop.xlane.xlu1 %2228 }
 0x5ab   :  { %5360 = vmatprep.subr.bf16.mxu0 %v8554_v43  ;;  %5714 = vrcp.f32 %v2209_v20 }
 0x5ac   :  { %4944 = vmatprep.mubr.f32.mxu0 %v2384_v32 }
 0x5ad   :  { %4945 = vmatmul.mubr.f32.gmra.mrb[30].mxu0 %v2385_v50  ;;  %v5711_v41 = vpop.eup %5710 }
 0x5ae   :  { %5362 = vmatpush3.bf16.msra.mxu0 %v8554_v43  ;;  %v2207_v26 = vpop.xlane.xlu0 %2206  ;;  %v2387_v28 = vmul.f32 %v5711_v41, %v7628_v36  ;;  %v2233_v43 = vpop.xlane.xlu1 %2232 }
 0x5af   :  { %5364 = vmatprep.subr.bf16.mxu0 %v8555_v18  ;;  %5716 = vrcp.f32 %v2207_v26 }
 0x5b1   :  { %v5713_v23 = vpop.eup %5712 }
 0x5b2   :  { %5366 = vmatpush3.bf16.msra.mxu0 %v8555_v18  ;;  %v2213_v52 = vpop.xlane.xlu0 %2212  ;;  %v2386_v51 = vmul.f32 %v5713_v23, %v7633_v3  ;;  %v2237_v41 = vpop.xlane.xlu1 %2236 }
 0x5b3   :  { %5368 = vmatprep.subr.bf16.mxu0 %v8556_v61  ;;  %5718 = vrcp.f32 %v2213_v52 }
 0x5b4   :  { %4947 = vmatprep.mubr.f32.mxu0 %v2386_v51 }
 0x5b5   :  { %4948 = vmatmul.mubr.f32.gmra.mrb[32].mxu0 %v2387_v28  ;;  %v5715_v22 = vpop.eup %5714 }
 0x5b6   :  { %v2211_v30 = vpop.xlane.xlu0 %2210  ;;  %v2389_v32 = vmul.f32 %v5715_v22, %v7640_v6  ;;  %v2241_v51 = vpop.xlane.xlu1 %2240 }
 0x5b7   :  { %5720 = vrcp.f32 %v2211_v30 }
 0x5b9   :  { %v5717_v63 = vpop.eup %5716 }
 0x5ba   :  { %v2217_v15 = vpop.xlane.xlu0 %2216  ;;  %v2388_v20 = vmul.f32 %v5717_v63, %v7648_v34  ;;  %v2245_v63 = vpop.xlane.xlu1 %2244 }
 0x5bb   :  { %5722 = vrcp.f32 %v2217_v15 }
 0x5bc   :  { %4950 = vmatprep.mubr.f32.mxu0 %v2388_v20 }
 0x5bd   :  { %4951 = vmatmul.mubr.f32.gmra.mrb[34].mxu0 %v2389_v32  ;;  %v5719_v36 = vpop.eup %5718 }
 0x5be   :  { %v2215_v3 = vpop.xlane.xlu0 %2214  ;;  %v2391_v23 = vmul.f32 %v5719_v36, %v7659_v11  ;;  %v2249_v36 = vpop.xlane.xlu1 %2248 }
 0x5bf   :  { %5724 = vrcp.f32 %v2215_v3 }
 0x5c1   :  { %v5721_v50 = vpop.eup %5720 }
 0x5c2   :  { %v2221_v26 = vpop.xlane.xlu0 %2220  ;;  %v2390_v18 = vmul.f32 %v5721_v50, %v7670_v1 }
 0x5c3   :  { %5726 = vrcp.f32 %v2221_v26 }
 0x5c4   :  { %4953 = vmatprep.mubr.f32.mxu0 %v2390_v18  ;;  %v8558_v18 = vld [vmem:[#allocation51_spill] sm:$0xff] }
 0x5c5   :  { %4954 = vmatmul.mubr.f32.gmra.mrb[36].mxu0 %v2391_v23  ;;  %v5723_v6 = vpop.eup %5722 }
 0x5c6   :  { %v2219_v34 = vpop.xlane.xlu0 %2218  ;;  %v2393_v22 = vmul.f32 %v5723_v6, %v7679_v59  ;;  %v8559_v6 = vld [vmem:[#allocation54_spill] sm:$0xff] }
 0x5c7   :  { %5728 = vrcp.f32 %v2219_v34 }
 0x5c9   :  { %v5725_v52 = vpop.eup %5724 }
 0x5ca   :  { %v2225_v28 = vpop.xlane.xlu0 %2224  ;;  %v2392_v30 = vmul.f32 %v5725_v52, %v7690_v13  ;;  %v8557_v13 = vld [vmem:[#allocation49_spill] sm:$0xff] }
 0x5cb   :  { %5730 = vrcp.f32 %v2225_v28 }
 0x5cc   :  { %4956 = vmatprep.mubr.f32.mxu0 %v2392_v30 }
 0x5cd   :  { %4957 = vmatmul.mubr.f32.gmra.mrb[38].mxu0 %v2393_v22  ;;  %v5727_v11 = vpop.eup %5726  ;;  %v8560_v22 = vld [vmem:[#allocation57_spill] sm:$0xff] }
 0x5ce   :  { %v2223_v1 = vpop.xlane.xlu0 %2222  ;;  %v2395_v3 = vmul.f32 %v5727_v11, %v7699_v47  ;;  %v2253_v47 = vpop.xlane.xlu1 %2252 }
 0x5cf   :  { %5732 = vrcp.f32 %v2223_v1 }
 0x5d0   :  { %5734 = vrcp.f32 %v2229_v7 }
 0x5d1   :  { %v5729_v15 = vpop.eup %5728 }
 0x5d2   :  { %v2227_v20 = vpop.xlane.xlu0 %2226  ;;  %v2394_v32 = vmul.f32 %v5729_v15, %v7708_v25  ;;  %v2257_v30 = vpop.xlane.xlu1 %2256 }
 0x5d3   :  { %5736 = vrcp.f32 %v2227_v20  ;;  %v8561_v20 = vld [vmem:[#allocation60_spill] sm:$0xff] }
 0x5d4   :  { %4991 = vmatprep.mubr.f32.mxu0 %v2394_v32  ;;  %5738 = vrcp.f32 %v2233_v43 }
 0x5d5   :  { %4992 = vmatmul.mubr.f32.vlgmr.msra.gmra.mrb[24].mxu0 %v2395_v3  ;;  %v5731_v50 = vpop.eup %5730 }
 0x5d6   :  { %5370 = vmatpush3.bf16.msra.mxu0 %v8556_v61  ;;  %v2231_v59 = vpop.xlane.xlu0 %2230  ;;  %v2397_v43 = vmul.f32 %v5731_v50, %v7717_v46  ;;  %v2261_v15 = vpop.xlane.xlu1 %2260 }
 0x5d7   :  { %5372 = vmatprep.subr.bf16.mxu0 %v8557_v13  ;;  %5740 = vrcp.f32 %v2231_v59  ;;  %v8562_v59 = vld [vmem:[#allocation64_spill] sm:$0xff] }
 0x5d8   :  { %5742 = vrcp.f32 %v2237_v41 }
 0x5d9   :  { %v5733_v26 = vpop.eup %5732 }
 0x5da   :  { %5374 = vmatpush3.bf16.msra.mxu0 %v8557_v13  ;;  %v2235_v7 = vpop.xlane.xlu0 %2234  ;;  %v2396_v25 = vmul.f32 %v5733_v26, %v7726_v4  ;;  %v5735_v23 = vpop.eup %5734 }
 0x5db   :  { %5376 = vmatprep.subr.bf16.mxu0 %v8558_v18  ;;  %5744 = vrcp.f32 %v2235_v7  ;;  %v2399_v4 = vmul.f32 %v5735_v23, %v7642_v39  ;;  %v2265_v26 = vpop.xlane.xlu1 %2264 }
 0x5dc   :  { %4994 = vmatprep.mubr.f32.mxu0 %v2396_v25  ;;  %5746 = vrcp.f32 %v2241_v51  ;;  %v8563_v25 = vld [vmem:[#allocation67_spill] sm:$0xff] }
 0x5dd   :  { %v5737_v61 = vpop.eup %5736  ;;  %4995 = vmatmul.mubr.f32.gmra.mrb[26].mxu0 %v2397_v43 }
 0x5de   :  { %5378 = vmatpush3.bf16.msra.mxu0 %v8558_v18  ;;  %v2239_v34 = vpop.xlane.xlu0 %2238  ;;  %v2398_v41 = vmul.f32 %v5737_v61, %v7735_v54  ;;  %v5739_v52 = vpop.eup %5738  ;;  %v8564_v61 = vld [vmem:[#allocation47_spill] sm:$0xff] }
 0x5df   :  { %5380 = vmatprep.subr.bf16.mxu0 %v8559_v6  ;;  %5748 = vrcp.f32 %v2239_v34  ;;  %v2401_v54 = vmul.f32 %v5739_v52, %v7652_v27  ;;  %v2269_v23 = vpop.xlane.xlu1 %2268 }
 0x5e0   :  { %4997 = vmatprep.mubr.f32.mxu0 %v2398_v41  ;;  %5750 = vrcp.f32 %v2245_v63 }
 0x5e1   :  { %v5741_v28 = vpop.eup %5740  ;;  %4998 = vmatmul.mubr.f32.gmra.mrb[28].mxu0 %v2399_v4 }
 0x5e2   :  { %5382 = vmatpush3.bf16.msra.mxu0 %v8559_v6  ;;  %v2243_v46 = vpop.xlane.xlu0 %2242  ;;  %v2400_v51 = vmul.f32 %v5741_v28, %v7743_v2  ;;  %v5743_v1 = vpop.eup %5742 }
 0x5e3   :  { %5384 = vmatprep.subr.bf16.mxu0 %v8560_v22  ;;  %5752 = vrcp.f32 %v2243_v46  ;;  %v2403_v2 = vmul.f32 %v5743_v1, %v7661_v19  ;;  %v2273_v28 = vpop.xlane.xlu1 %2272  ;;  %v8565_v46 = vld [vmem:[#allocation52_spill] sm:$0xff] }
 0x5e4   :  { %5000 = vmatprep.mubr.f32.mxu0 %v2400_v51  ;;  %5754 = vrcp.f32 %v2249_v36 }
 0x5e5   :  { %v5745_v11 = vpop.eup %5744  ;;  %5001 = vmatmul.mubr.f32.gmra.mrb[30].mxu0 %v2401_v54 }
 0x5e6   :  { %5386 = vmatpush3.bf16.msra.mxu0 %v8560_v22  ;;  %v2247_v39 = vpop.xlane.xlu0 %2246  ;;  %v2402_v63 = vmul.f32 %v5745_v11, %v7752_v14  ;;  %v5747_v32 = vpop.eup %5746  ;;  %v8566_v11 = vld [vmem:[#allocation55_spill] sm:$0xff] }
 0x5e7   :  { %5388 = vmatprep.subr.bf16.mxu0 %v8561_v20  ;;  %5756 = vrcp.f32 %v2247_v39  ;;  %v2405_v14 = vmul.f32 %v5747_v32, %v7672_v49  ;;  %v2277_v1 = vpop.xlane.xlu1 %2276 }
 0x5e8   :  { %5003 = vmatprep.mubr.f32.mxu0 %v2402_v63  ;;  %5758 = vrcp.f32 %v2253_v47 }
 0x5e9   :  { %v5749_v3 = vpop.eup %5748  ;;  %5004 = vmatmul.mubr.f32.gmra.mrb[32].mxu0 %v2403_v2  ;;  %v8567_v2 = vld [vmem:[#allocation58_spill] sm:$0xff] }
 0x5ea   :  { %5390 = vmatpush3.bf16.msra.mxu0 %v8561_v20  ;;  %v2251_v27 = vpop.xlane.xlu0 %2250  ;;  %v2404_v36 = vmul.f32 %v5749_v3, %v7760_v9  ;;  %v5751_v13 = vpop.eup %5750 }
 0x5eb   :  { %5392 = vmatprep.subr.bf16.mxu0 %v8562_v59  ;;  %5760 = vrcp.f32 %v2251_v27  ;;  %v2407_v9 = vmul.f32 %v5751_v13, %v7683_v57  ;;  %v2281_v20 = vpop.xlane.xlu1 %2280  ;;  %v8568_v27 = vld [vmem:[#allocation35_spill] sm:$0xff] }
 0x5ec   :  { %5006 = vmatprep.mubr.f32.mxu0 %v2404_v36  ;;  %5762 = vrcp.f32 %v2257_v30 }
 0x5ed   :  { %v5753_v50 = vpop.eup %5752  ;;  %5007 = vmatmul.mubr.f32.gmra.mrb[34].mxu0 %v2405_v14  ;;  %v8569_v14 = vld [vmem:[#allocation61_spill] sm:$0xff] }
 0x5ee   :  { %5394 = vmatpush3.bf16.msra.mxu0 %v8562_v59  ;;  %v2255_v19 = vpop.xlane.xlu0 %2254  ;;  %v2406_v7 = vmul.f32 %v5753_v50, %v7764_v10  ;;  %v5755_v47 = vpop.eup %5754 }
 0x5ef   :  { %5396 = vmatprep.subr.bf16.mxu0 %v8563_v25  ;;  %5764 = vrcp.f32 %v2255_v19  ;;  %v2409_v10 = vmul.f32 %v5755_v47, %v7692_v0  ;;  %v2285_v59 = vpop.xlane.xlu1 %2284 }
 0x5f0   :  { %5009 = vmatprep.mubr.f32.mxu0 %v2406_v7  ;;  %5766 = vrcp.f32 %v2261_v15 }
 0x5f1   :  { %v5757_v18 = vpop.eup %5756  ;;  %5010 = vmatmul.mubr.f32.gmra.mrb[36].mxu0 %v2407_v9  ;;  %v8572_v9 = vld [vmem:[#allocation75_spill] sm:$0xff] }
 0x5f2   :  { %5398 = vmatpush3.bf16.msra.mxu0 %v8563_v25  ;;  %v2259_v49 = vpop.xlane.xlu0 %2258  ;;  %v2408_v43 = vmul.f32 %v5757_v18, %v7772_v56  ;;  %v5759_v34 = vpop.eup %5758  ;;  %v8571_v25 = vld [vmem:[#allocation62_spill] sm:$0xff] }
 0x5f3   :  { %5400 = vmatprep.subr.bf16.mxu0 %v8564_v61  ;;  %5768 = vrcp.f32 %v2259_v49  ;;  %v2411_v4 = vmul.f32 %v5759_v34, %v7701_v48  ;;  %v2289_v7 = vpop.xlane.xlu1 %2288 }
 0x5f4   :  { %5012 = vmatprep.mubr.f32.mxu0 %v2408_v43  ;;  %5770 = vrcp.f32 %v2265_v26 }
 0x5f5   :  { %v5761_v41 = vpop.eup %5760  ;;  %5013 = vmatmul.mubr.f32.gmra.mrb[38].mxu0 %v2409_v10  ;;  %v8573_v10 = vld [vmem:[#allocation65_spill] sm:$0xff] }
 0x5f6   :  { %v2263_v57 = vpop.xlane.xlu0 %2262  ;;  %v2410_v6 = vmul.f32 %v5761_v41, %v7776_v40  ;;  %v5763_v52 = vpop.eup %5762 }
 0x5f7   :  { %5772 = vrcp.f32 %v2263_v57  ;;  %v2413_v51 = vmul.f32 %v5763_v52, %v7710_v31  ;;  %v3134_v57 = vld [vmem:[%s8380_s11] sm:$0xff] }
 0x5f8   :  { %5047 = vmatprep.mubr.f32.mxu0 %v2410_v6  ;;  %5774 = vrcp.f32 %v2269_v23  ;;  %v3135_v6 = vld [vmem:[%s8380_s11 + $0x8] sm:$0xff] }
 0x5f9   :  { %v5765_v56 = vpop.eup %5764  ;;  %5048 = vmatmul.mubr.f32.vlgmr.msra.gmra.mrb[24].mxu0 %v2411_v4 }
 0x5fa   :  { %5402 = vmatpush3.bf16.msra.mxu0 %v8564_v61  ;;  %v2267_v0 = vpop.xlane.xlu0 %2266  ;;  %v2412_v30 = vmul.f32 %v5765_v56, %v7784_v58  ;;  %v5767_v40 = vpop.eup %5766 }
 0x5fb   :  { %5776 = vrcp.f32 %v2267_v0  ;;  %5404 = vmatprep.subr.bf16.mxu0 %v8565_v46  ;;  %v2415_v58 = vmul.f32 %v5767_v40, %v7719_v62  ;;  %v2293_v61 = vpop.xlane.xlu1 %2292  ;;  %v8576_v0 = vld [vmem:[#allocation40_spill] sm:$0xff]  ;;  %v3136_v40 = vld [vmem:[%s8380_s11 + $0x10] sm:$0xff] }
 0x5fc   :  { %5050 = vmatprep.mubr.f32.mxu0 %v2412_v30  ;;  %5778 = vrcp.f32 %v2273_v28  ;;  %v8575_v28 = vld [vmem:[#allocation68_spill] sm:$0xff] }
 0x5fd   :  { %v5769_v48 = vpop.eup %5768  ;;  %5051 = vmatmul.mubr.f32.gmra.mrb[26].mxu0 %v2413_v51 }
 0x5fe   :  { %5406 = vmatpush3.bf16.msra.mxu0 %v8565_v46  ;;  %v2271_v22 = vpop.xlane.xlu0 %2270  ;;  %v2414_v54 = vmul.f32 %v5769_v48, %v7789_v8  ;;  %v5771_v39 = vpop.eup %5770  ;;  %v5431_v46 = vpack.c.bf16 %v3135_v6, %v3134_v57  ;;  %v3137_v48 = vld [vmem:[%s8380_s11 + $0x18] sm:$0xff] }
 0x5ff   :  { %5780 = vrcp.f32 %v2271_v22  ;;  %5408 = vmatprep.subr.bf16.mxu0 %v8566_v11  ;;  %v2417_v8 = vmul.f32 %v5771_v39, %v7728_v12  ;;  %v5435_v39 = vpack.c.bf16 %v3137_v48, %v3136_v40 }
 0x600   :  { %5053 = vmatprep.mubr.f32.mxu0 %v2414_v54  ;;  %5782 = vrcp.f32 %v2277_v1  ;;  %v8577_v1 = vld [vmem:[#allocation44_spill] sm:$0xff] }
 0x601   :  { %v5773_v63 = vpop.eup %5772  ;;  %5054 = vmatmul.mubr.f32.gmra.mrb[28].mxu0 %v2415_v58 }
 0x602   :  { %5410 = vmatpush3.bf16.msra.mxu0 %v8566_v11  ;;  %v2275_v31 = vpop.xlane.xlu0 %2274  ;;  %v2416_v15 = vmul.f32 %v5773_v63, %v7798_v53  ;;  %v5775_v32 = vpop.eup %5774  ;;  %v8570_v53 = vld [vmem:[#allocation74_spill] sm:$0xff] }
 0x603   :  { %5784 = vrcp.f32 %v2275_v31  ;;  %5412 = vmatprep.subr.bf16.mxu0 %v8567_v2  ;;  %v2419_v13 = vmul.f32 %v5775_v32, %v8570_v53  ;;  %v2297_v56 = vpop.xlane.xlu1 %2296 }
 0x604   :  { %5056 = vmatprep.mubr.f32.mxu0 %v2416_v15  ;;  %5786 = vrcp.f32 %v2281_v20 }
 0x605   :  { %v5777_v3 = vpop.eup %5776  ;;  %5057 = vmatmul.mubr.f32.gmra.mrb[30].mxu0 %v2417_v8  ;;  %v8578_v8 = vld [vmem:[#allocation43_spill] sm:$0xff] }
 0x606   :  { %5414 = vmatpush3.bf16.msra.mxu0 %v8567_v2  ;;  %v2279_v62 = vpop.xlane.xlu0 %2278  ;;  %v2418_v36 = vmul.f32 %v5777_v3, %v8568_v27  ;;  %v5779_v50 = vpop.eup %5778 }
 0x607   :  { %5788 = vrcp.f32 %v2279_v62  ;;  %5416 = vmatprep.subr.bf16.mxu0 %v8569_v14  ;;  %v2421_v47 = vmul.f32 %v5779_v50, %v8572_v9 }
 0x608   :  { %5059 = vmatprep.mubr.f32.mxu0 %v2418_v36  ;;  %5790 = vrcp.f32 %v2285_v59  ;;  %v8579_v59 = vld [vmem:[#allocation42_spill] sm:$0xff] }
 0x609   :  { %v5781_v26 = vpop.eup %5780  ;;  %5060 = vmatmul.mubr.f32.gmra.mrb[32].mxu0 %v2419_v13 }
 0x60a   :  { %5418 = vmatpush3.bf16.msra.mxu0 %v8569_v14  ;;  %v2283_v12 = vpop.xlane.xlu0 %2282  ;;  %v2420_v19 = vmul.f32 %v5781_v26, %v7810_v42  ;;  %v5783_v18 = vpop.eup %5782  ;;  %v8574_v42 = vld [vmem:[#allocation76_spill] sm:$0xff] }
 0x60b   :  { %5792 = vrcp.f32 %v2283_v12  ;;  %5420 = vmatprep.subr.bf16.mxu0 %v8571_v25  ;;  %v2423_v34 = vmul.f32 %v5783_v18, %v8574_v42  ;;  %v2301_v58 = vpop.xlane.xlu1 %2300  ;;  %v8580_v42 = vld [vmem:[#allocation37_spill] sm:$0xff] }
 0x60c   :  { %5062 = vmatprep.mubr.f32.mxu0 %v2420_v19  ;;  %5794 = vrcp.f32 %v2289_v7 }
 0x60d   :  { %v5785_v49 = vpop.eup %5784  ;;  %5063 = vmatmul.mubr.f32.gmra.mrb[34].mxu0 %v2421_v47 }
 0x60e   :  { %5422 = vmatpush3.bf16.msra.mxu0 %v8571_v25  ;;  %v2287_v43 = vpop.xlane.xlu0 %2286  ;;  %v2422_v23 = vmul.f32 %v5785_v49, %v7814_v5  ;;  %v5787_v41 = vpop.eup %5786 }
 0x60f   :  { %5796 = vrcp.f32 %v2287_v43  ;;  %5424 = vmatprep.subr.bf16.mxu0 %v8573_v10  ;;  %v2425_v30 = vmul.f32 %v5787_v41, %v8576_v0 }
 0x610   :  { %5065 = vmatprep.mubr.f32.mxu0 %v2422_v23  ;;  %5798 = vrcp.f32 %v2293_v61 }
 0x611   :  { %v5789_v4 = vpop.eup %5788  ;;  %5066 = vmatmul.mubr.f32.gmra.mrb[36].mxu0 %v2423_v34 }
 0x612   :  { %5426 = vmatpush3.bf16.msra.mxu0 %v8573_v10  ;;  %v2291_v5 = vpop.xlane.xlu0 %2290  ;;  %v2424_v52 = vmul.f32 %v5789_v4, %v7822_v33  ;;  %v5791_v51 = vpop.eup %5790 }
 0x613   :  { %5800 = vrcp.f32 %v2291_v5  ;;  %5428 = vmatprep.subr.bf16.mxu0 %v8575_v28  ;;  %v2427_v11 = vmul.f32 %v5791_v51, %v8577_v1  ;;  %v2305_v2 = vpop.xlane.xlu1 %2304  ;;  %v8006_v51 = vld [vmem:[#allocation16] ss:$0 sm:$0xff] }
 0x614   :  { %5068 = vmatprep.mubr.f32.mxu0 %v2424_v52  ;;  %5802 = vrcp.f32 %v2297_v56 }
 0x615   :  { %v5793_v22 = vpop.eup %5792  ;;  %5069 = vmatmul.mubr.f32.gmra.mrb[38].mxu0 %v2425_v30 }
 0x616   :  { %5430 = vmatpush3.bf16.msra.mxu0 %v8575_v28  ;;  %v2295_v33 = vpop.xlane.xlu0 %2294  ;;  %v2426_v54 = vmul.f32 %v5793_v22, %v7826_v44  ;;  %v5795_v63 = vpop.eup %5794 }
 0x617   :  { %5804 = vrcp.f32 %v2295_v33  ;;  %5432 = vmatprep.subr.bf16.mxu0 %v5431_v46  ;;  %v2429_v32 = vmul.f32 %v5795_v63, %v8578_v8  ;;  %v5888_v8 = vld [vmem:[#allocation2 + $0x18] sm:$0xff] }
 0x618   :  { %5103 = vmatprep.mubr.f32.mxu0 %v2426_v54  ;;  %5806 = vrcp.f32 %v2301_v58  ;;  %v5886_v54 = vld [vmem:[#allocation2 + $0x8] sm:$0xff] }
 0x619   :  { %v5797_v31 = vpop.eup %5796  ;;  %5104 = vmatmul.mubr.f32.vlgmr.msra.gmra.mrb[24].mxu0 %v2427_v11  ;;  %v5887_v11 = vld [vmem:[#allocation2] sm:$0xff] }
 0x61a   :  { %v2299_v15 = vpop.xlane.xlu0 %2298  ;;  %v2428_v20 = vmul.f32 %v5797_v31, %v7834_v55  ;;  %5434 = vmatpush3.bf16.msra.mxu0 %v5431_v46  ;;  %v5799_v44 = vpop.eup %5798 }
 0x61b   :  { %5808 = vrcp.f32 %v2299_v15  ;;  %5436 = vmatprep.subr.bf16.mxu0 %v5435_v39  ;;  %v2309_v36 = vpop.xlane.xlu1 %2308  ;;  %v2431_v14 = vmul.f32 %v5799_v44, %v8579_v59  ;;  %v5889_v44 = vld [vmem:[#allocation2 + $0x10] sm:$0xff] }
 0x61c   :  { %5106 = vmatprep.mubr.f32.mxu0 %v2428_v20  ;;  %5810 = vrcp.f32 %v2305_v2 }
 0x61d   :  { %v5801_v3 = vpop.eup %5800  ;;  %5107 = vmatmul.mubr.f32.gmra.mrb[26].mxu0 %v2429_v32 }
 0x61e   :  { %v2303_v62 = vpop.xlane.xlu0 %2302  ;;  %v2430_v27 = vmul.f32 %v5801_v3, %v7838_v37  ;;  %5438 = vmatpush3.bf16.msra.mxu0 %v5435_v39  ;;  %v5803_v55 = vpop.eup %5802 }
 0x61f   :  { %5812 = vrcp.f32 %v2303_v62  ;;  %v2433_v12 = vmul.f32 %v5803_v55, %v7816_v45 }
 0x620   :  { %5109 = vmatprep.mubr.f32.mxu0 %v2430_v27  ;;  %5814 = vrcp.f32 %v2309_v36 }
 0x621   :  { %v5805_v53 = vpop.eup %5804  ;;  %5110 = vmatmul.mubr.f32.gmra.mrb[28].mxu0 %v2431_v14 }
 0x622   :  { %v2307_v13 = vpop.xlane.xlu0 %2306  ;;  %v2432_v50 = vmul.f32 %v5805_v53, %v7845_v60  ;;  %v5807_v19 = vpop.eup %5806  ;;  %v5890_v53 = vld [vmem:[#allocation2 + $0x28] sm:$0xff] }
 0x623   :  { %5816 = vrcp.f32 %v2307_v13  ;;  %v2313_v26 = vpop.xlane.xlu1 %2312  ;;  %v2435_v9 = vmul.f32 %v5807_v19, %v7828_v16 }
 0x624   :  { %5112 = vmatprep.mubr.f32.mxu0 %v2432_v50  ;;  %5818 = vrcp.f32 %v2313_v26  ;;  %v5891_v50 = vld [vmem:[#allocation2 + $0x20] sm:$0xff] }
 0x625   :  { %v5809_v37 = vpop.eup %5808  ;;  %5113 = vmatmul.mubr.f32.gmra.mrb[30].mxu0 %v2433_v12 }
 0x626   :  { %v2311_v7 = vpop.xlane.xlu0 %2310  ;;  %v2434_v25 = vmul.f32 %v5809_v37, %v7849_v29  ;;  %v5811_v47 = vpop.eup %5810 }
 0x627   :  { %5820 = vrcp.f32 %v2311_v7  ;;  %v2437_v49 = vmul.f32 %v5811_v47, %v7840_v24  ;;  %v5892_v47 = vld [vmem:[#allocation2 + $0x38] sm:$0xff] }
 0x628   :  { %5115 = vmatprep.mubr.f32.mxu0 %v2434_v25 }
 0x629   :  { %v5813_v18 = vpop.eup %5812  ;;  %5116 = vmatmul.mubr.f32.gmra.mrb[32].mxu0 %v2435_v9 }
 0x62a   :  { %v2436_v60 = vmul.f32 %v5813_v18, %v7855_v17  ;;  %v5815_v45 = vpop.eup %5814 }
 0x62b   :  { %v2439_v61 = vmul.f32 %v5815_v45, %v7851_v38 }
 0x62c   :  { %5118 = vmatprep.mubr.f32.mxu0 %v2436_v60  ;;  %v5893_v60 = vld [vmem:[#allocation2 + $0x30] sm:$0xff] }
 0x62d   :  { %v5817_v43 = vpop.eup %5816  ;;  %5119 = vmatmul.mubr.f32.gmra.mrb[34].mxu0 %v2437_v49 }
 0x62e   :  { %v2438_v23 = vmul.f32 %v5817_v43, %v7859_v21  ;;  %v5819_v29 = vpop.eup %5818 }
 0x62f   :  { %v2441_v34 = vmul.f32 %v5819_v29, %v8580_v42 }
 0x630   :  { %5121 = vmatprep.mubr.f32.mxu0 %v2438_v23 }
 0x631   :  { %v5821_v10 = vpop.eup %5820  ;;  %5122 = vmatmul.mubr.f32.gmra.mrb[36].mxu0 %v2439_v61 }
 0x632   :  { %v2440_v16 = vmul.f32 %v5821_v10, %v7868_v35 }
 0x634   :  { %5124 = vmatprep.mubr.f32.mxu0 %v2440_v16  ;;  %v5894_v16 = vld [vmem:[#allocation2 + $0x48] sm:$0xff] }
 0x635   :  { %5125 = vmatmul.mubr.f32.gmra.mrb[38].mxu0 %v2441_v34  ;;  %v5895_v34 = vld [vmem:[#allocation2 + $0x40] sm:$0xff] }
 0x6ec   :  { %v5105_v17 = vpop.f32.mrb[24].mxu0 }
 0x6ed   :  { %v3007_v24 = vpop.f32.mrb[25].mxu0 }
 0x6ee   :  { %5135 = vmatprep.mubr.msk.f32.mxu0 %vm249_vm0, %v3007_v24 }
 0x6ef   :  { %5136 = vmatmul.mubr.msk.f32.vlgmr.msra.gmra.mrb[40].mxu0 %vm249_vm0, %v5105_v17 }
 0x6f0   :  { %v5108_v41 = vpop.f32.mrb[26].mxu0 }
 0x6f1   :  { %v3017_v21 = vpop.f32.mrb[27].mxu0 }
 0x6f2   :  { %5138 = vmatprep.mubr.msk.f32.mxu0 %vm249_vm0, %v3017_v21 }
 0x6f3   :  { %5139 = vmatmul.mubr.msk.f32.gmra.mrb[42].mxu0 %vm249_vm0, %v5108_v41 }
 0x6f4   :  { %v5111_v38 = vpop.f32.mrb[28].mxu0 }
 0x6f5   :  { %v3027_v57 = vpop.f32.mrb[29].mxu0 }
 0x6f6   :  { %5141 = vmatprep.mubr.msk.f32.mxu0 %vm249_vm0, %v3027_v57 }
 0x6f7   :  { %5142 = vmatmul.mubr.msk.f32.gmra.mrb[44].mxu0 %vm249_vm0, %v5111_v38 }
 0x6f8   :  { %v5114_v35 = vpop.f32.mrb[30].mxu0 }
 0x6f9   :  { %v3037_v6 = vpop.f32.mrb[31].mxu0 }
 0x6fa   :  { %5144 = vmatprep.mubr.msk.f32.mxu0 %vm249_vm0, %v3037_v6  ;;  %v5896_v6 = vld [vmem:[#allocation2 + $0x58] sm:$0xff] }
 0x6fb   :  { %5145 = vmatmul.mubr.msk.f32.gmra.mrb[46].mxu0 %vm249_vm0, %v5114_v35 }
 0x6fc   :  { %v5117_v4 = vpop.f32.mrb[32].mxu0 }
 0x6fd   :  { %v3047_v5 = vpop.f32.mrb[33].mxu0 }
 0x6fe   :  { %5147 = vmatprep.mubr.msk.f32.mxu0 %vm249_vm0, %v3047_v5  ;;  %v5897_v5 = vld [vmem:[#allocation2 + $0x50] sm:$0xff] }
 0x6ff   :  { %5148 = vmatmul.mubr.msk.f32.gmra.mrb[48].mxu0 %vm249_vm0, %v5117_v4 }
 0x700   :  { %v5120_v52 = vpop.f32.mrb[34].mxu0 }
 0x701   :  { %v3057_v56 = vpop.f32.mrb[35].mxu0 }
 0x702   :  { %5150 = vmatprep.mubr.msk.f32.mxu0 %vm249_vm0, %v3057_v56 }
 0x703   :  { %5151 = vmatmul.mubr.msk.f32.gmra.mrb[50].mxu0 %vm249_vm0, %v5120_v52 }
 0x704   :  { %v5123_v28 = vpop.f32.mrb[36].mxu0 }
 0x705   :  { %v3067_v0 = vpop.f32.mrb[37].mxu0 }
 0x706   :  { %5153 = vmatprep.mubr.msk.f32.mxu0 %vm249_vm0, %v3067_v0 }
 0x707   :  { %5154 = vmatmul.mubr.msk.f32.gmra.mrb[52].mxu0 %vm249_vm0, %v5123_v28 }
 0x708   :  { %v5126_v30 = vpop.f32.mrb[38].mxu0 }
 0x709   :  { %v3077_v46 = vpop.f32.mrb[39].mxu0 }
 0x70a   :  { %5156 = vmatprep.mubr.msk.f32.mxu0 %vm249_vm0, %v3077_v46 }
 0x70b   :  { %5157 = vmatmul.mubr.msk.f32.gmra.mrb[54].mxu0 %vm249_vm0, %v5126_v30 }
 0x7c2   :  { %v5137_v40 = vpop.f32.mrb[40].mxu0 }
 0x7c3   :  { %v3265_v48 = vadd.f32 %v5137_v40, %v8006_v51  ;;  %v3259_v22 = vpop.f32.mrb[41].mxu0 }
 0x7c4   :  { %v3260_v33 = vadd.f32 %v8006_v51, %v3259_v22 }
 0x7c5   :  { %v8010_v1 = vadd.f32 %v5886_v54, %v3265_v48  ;;  %v5898_v48 = vld [vmem:[#allocation2 + $0x68] sm:$0xff] }
 0x7c6   :  { %v8012_v58 = vadd.f32 %v5887_v11, %v3260_v33  ;;  %v5140_v39 = vpop.f32.mrb[42].mxu0  ;;  %v5899_v33 = vld [vmem:[#allocation2 + $0x60] sm:$0xff] }
 0x7c7   :  { %v3275_v63 = vadd.f32 %v5140_v39, %v8006_v51  ;;  %v3269_v31 = vpop.f32.mrb[43].mxu0  ;;  %v3357_v15 = vsel %vm249_vm0, %v8010_v1, 0.0 }
 0x7c8   :  { %v3270_v20 = vadd.f32 %v8006_v51, %v3269_v31  ;;  %3358 = vadd.xlane.f32.xlu1 %v3357_v15  ;;  %v3354_v2 = vsel %vm249_vm0, %v8012_v58, 0.0 }
 0x7c9   :  { %v8020_v32 = vadd.f32 %v5888_v8, %v3275_v63  ;;  %3355 = vadd.xlane.f32.xlu0 %v3354_v2  ;;  %v5900_v2 = vld [vmem:[#allocation2 + $0x78] sm:$0xff] }
 0x7ca   :  { %v8022_v3 = vadd.f32 %v5889_v44, %v3270_v20  ;;  %v5143_v62 = vpop.f32.mrb[44].mxu0  ;;  %v5901_v44 = vld [vmem:[#allocation2 + $0x70] sm:$0xff] }
 0x7cb   :  { %v3285_v27 = vadd.f32 %v5143_v62, %v8006_v51  ;;  %v3279_v36 = vpop.f32.mrb[45].mxu0  ;;  %v3363_v59 = vsel %vm249_vm0, %v8020_v32, 0.0 }
 0x7cc   :  { %v3280_v14 = vadd.f32 %v8006_v51, %v3279_v36  ;;  %3364 = vadd.xlane.f32.xlu1 %v3363_v59  ;;  %v3360_v55 = vsel %vm249_vm0, %v8022_v3, 0.0  ;;  %v3609_v59 = vld [vmem:[#allocation20 + $0x8] sm:$0xff] }
 0x7cd   :  { %v8030_v13 = vadd.f32 %v5890_v53, %v3285_v27  ;;  %3361 = vadd.xlane.f32.xlu0 %v3360_v55  ;;  %v3611_v53 = vld [vmem:[#allocation20 + $0x18] sm:$0xff] }
 0x7ce   :  { %v8032_v26 = vadd.f32 %v5891_v50, %v3280_v14  ;;  %v5146_v12 = vpop.f32.mrb[46].mxu0  ;;  %v3610_v14 = vld [vmem:[#allocation20 + $0x10] sm:$0xff] }
 0x7cf   :  { %v3295_v19 = vadd.f32 %v5146_v12, %v8006_v51  ;;  %v3289_v37 = vpop.f32.mrb[47].mxu0  ;;  %v3369_v7 = vsel %vm249_vm0, %v8030_v13, 0.0  ;;  %v5443_v50 = vpack.c.bf16 %v3611_v53, %v3610_v14 }
 0x7d0   :  { %v3290_v25 = vadd.f32 %v8006_v51, %v3289_v37  ;;  %3370 = vadd.xlane.f32.xlu1 %v3369_v7  ;;  %v3366_v9 = vsel %vm249_vm0, %v8032_v26, 0.0 }
 0x7d1   :  { %v8040_v18 = vadd.f32 %v5892_v47, %v3295_v19  ;;  %3367 = vadd.xlane.f32.xlu0 %v3366_v9 }
 0x7d2   :  { %v8042_v49 = vadd.f32 %v5893_v60, %v3290_v25  ;;  %v5149_v45 = vpop.f32.mrb[48].mxu0 }
 0x7d3   :  { %v3305_v43 = vadd.f32 %v5149_v45, %v8006_v51  ;;  %v3299_v23 = vpop.f32.mrb[49].mxu0  ;;  %v3375_v61 = vsel %vm249_vm0, %v8040_v18, 0.0 }
 0x7d4   :  { %v3300_v29 = vadd.f32 %v8006_v51, %v3299_v23  ;;  %3376 = vadd.xlane.f32.xlu1 %v3375_v61  ;;  %v3372_v10 = vsel %vm249_vm0, %v8042_v49, 0.0 }
 0x7d5   :  { %v8050_v42 = vadd.f32 %v5894_v16, %v3305_v43  ;;  %3373 = vadd.xlane.f32.xlu0 %v3372_v10 }
 0x7d6   :  { %v8052_v17 = vadd.f32 %v5895_v34, %v3300_v29  ;;  %v5152_v24 = vpop.f32.mrb[50].mxu0 }
 0x7d7   :  { %v3315_v41 = vadd.f32 %v5152_v24, %v8006_v51  ;;  %v3309_v21 = vpop.f32.mrb[51].mxu0  ;;  %v3381_v38 = vsel %vm249_vm0, %v8050_v42, 0.0 }
 0x7d8   :  { %v3310_v57 = vadd.f32 %v8006_v51, %v3309_v21  ;;  %3382 = vadd.xlane.f32.xlu1 %v3381_v38  ;;  %v3378_v35 = vsel %vm249_vm0, %v8052_v17, 0.0 }
 0x7d9   :  { %v8060_v4 = vadd.f32 %v5896_v6, %v3315_v41  ;;  %3379 = vadd.xlane.f32.xlu0 %v3378_v35 }
 0x7da   :  { %v8062_v52 = vadd.f32 %v5897_v5, %v3310_v57  ;;  %v5155_v56 = vpop.f32.mrb[52].mxu0 }
 0x7db   :  { %v3325_v28 = vadd.f32 %v5155_v56, %v8006_v51  ;;  %v3319_v0 = vpop.f32.mrb[53].mxu0  ;;  %v3387_v30 = vsel %vm249_vm0, %v8060_v4, 0.0 }
 0x7dc   :  { %v3320_v46 = vadd.f32 %v8006_v51, %v3319_v0  ;;  %3388 = vadd.xlane.f32.xlu1 %v3387_v30  ;;  %v3384_v40 = vsel %vm249_vm0, %v8062_v52, 0.0 }
 0x7dd   :  { %v8070_v22 = vadd.f32 %v5898_v48, %v3325_v28  ;;  %3385 = vadd.xlane.f32.xlu0 %v3384_v40 }
 0x7de   :  { %v8072_v54 = vadd.f32 %v5899_v33, %v3320_v46  ;;  %v5158_v11 = vpop.f32.mrb[54].mxu0 }
 0x7df   :  { %v3335_v39 = vadd.f32 %v5158_v11, %v8006_v51  ;;  %v3329_v63 = vpop.f32.mrb[55].mxu0  ;;  %v3393_v31 = vsel %vm249_vm0, %v8070_v22, 0.0 }
 0x7e0   :  { %v3330_v15 = vadd.f32 %v8006_v51, %v3329_v63  ;;  %3394 = vadd.xlane.f32.xlu1 %v3393_v31  ;;  %v3390_v20 = vsel %vm249_vm0, %v8072_v54, 0.0  ;;  %v3608_v51 = vld [vmem:[#allocation20] sm:$0xff] }
 0x7e1   :  { %v8080_v8 = vadd.f32 %v5900_v2, %v3335_v39  ;;  %3391 = vadd.xlane.f32.xlu0 %v3390_v20  ;;  %v5439_v55 = vpack.c.bf16 %v3609_v59, %v3608_v51 }
 0x7e2   :  { %v8082_v62 = vadd.f32 %v5901_v44, %v3330_v15 }
 0x7e3   :  { %v3399_v27 = vsel %vm249_vm0, %v8080_v8, 0.0  ;;  %5440 = vmatprep.subr.bf16.mxu1 %v5439_v55 }
 0x7e4   :  { %3400 = vadd.xlane.f32.xlu1 %v3399_v27  ;;  %v3396_v36 = vsel %vm249_vm0, %v8082_v62, 0.0  ;;  %5442 = vmatpush3.bf16.msra.mxu1 %v5439_v55 }
 0x7e5   :  { %3397 = vadd.xlane.f32.xlu0 %v3396_v36  ;;  %5444 = vmatprep.subr.bf16.mxu1 %v5443_v50 }
 0x7e8   :  { %5446 = vmatpush3.bf16.msra.mxu1 %v5443_v50 }
 0x855   :  { %v3359_v12 = vpop.xlane.xlu1 %3358 }
 0x856   :  { %v3403_v19 = vmul.f32 0.03125, %v3359_v12  ;;  %v3356_v37 = vpop.xlane.xlu0 %3355 }
 0x857   :  { %v3402_v7 = vmul.f32 0.03125, %v3356_v37 }
 0x858   :  { %v8089_v25 = vsub.f32 %v8010_v1, %v3403_v19 }
 0x859   :  { %v8092_v9 = vsub.f32 %v8012_v58, %v3402_v7  ;;  %v3365_v47 = vpop.xlane.xlu1 %3364 }
 0x85a   :  { %v3405_v60 = vmul.f32 0.03125, %v3365_v47  ;;  %v3362_v45 = vpop.xlane.xlu0 %3361  ;;  %v3435_v43 = vmul.f32 %v8089_v25, %v8089_v25 }
 0x85b   :  { %v3404_v23 = vmul.f32 0.03125, %v3362_v45  ;;  %v3434_v61 = vmul.f32 %v8092_v9, %v8092_v9 }
 0x85c   :  { %v8099_v29 = vsub.f32 %v8020_v32, %v3405_v60  ;;  %v3453_v10 = vsel %vm249_vm0, %v3435_v43, 0.0 }
 0x85d   :  { %v8103_v16 = vsub.f32 %v8022_v3, %v3404_v23  ;;  %v3371_v34 = vpop.xlane.xlu1 %3370  ;;  %3454 = vadd.xlane.f32.xlu1 %v3453_v10  ;;  %v3450_v24 = vsel %vm249_vm0, %v3434_v61, 0.0 }
 0x85e   :  { %v3407_v41 = vmul.f32 0.03125, %v3371_v34  ;;  %3451 = vadd.xlane.f32.xlu0 %v3450_v24  ;;  %v3368_v21 = vpop.xlane.xlu0 %3367  ;;  %v3437_v38 = vmul.f32 %v8099_v29, %v8099_v29 }
 0x85f   :  { %v3406_v57 = vmul.f32 0.03125, %v3368_v21  ;;  %v3436_v35 = vmul.f32 %v8103_v16, %v8103_v16 }
 0x860   :  { %v8111_v6 = vsub.f32 %v8030_v13, %v3407_v41  ;;  %v3459_v5 = vsel %vm249_vm0, %v3437_v38, 0.0 }
 0x861   :  { %v8115_v56 = vsub.f32 %v8032_v26, %v3406_v57  ;;  %v3377_v28 = vpop.xlane.xlu1 %3376  ;;  %3460 = vadd.xlane.f32.xlu1 %v3459_v5  ;;  %v3456_v0 = vsel %vm249_vm0, %v3436_v35, 0.0 }
 0x862   :  { %v3409_v30 = vmul.f32 0.03125, %v3377_v28  ;;  %3457 = vadd.xlane.f32.xlu0 %v3456_v0  ;;  %v3374_v46 = vpop.xlane.xlu0 %3373  ;;  %v3439_v40 = vmul.f32 %v8111_v6, %v8111_v6 }
 0x863   :  { %v3408_v48 = vmul.f32 0.03125, %v3374_v46  ;;  %v3438_v33 = vmul.f32 %v8115_v56, %v8115_v56 }
 0x864   :  { %v8123_v11 = vsub.f32 %v8040_v18, %v3409_v30  ;;  %v3465_v39 = vsel %vm249_vm0, %v3439_v40, 0.0 }
 0x865   :  { %v8127_v63 = vsub.f32 %v8042_v49, %v3408_v48  ;;  %v3383_v31 = vpop.xlane.xlu1 %3382  ;;  %3466 = vadd.xlane.f32.xlu1 %v3465_v39  ;;  %v3462_v15 = vsel %vm249_vm0, %v3438_v33, 0.0 }
 0x866   :  { %v3411_v20 = vmul.f32 0.03125, %v3383_v31  ;;  %3463 = vadd.xlane.f32.xlu0 %v3462_v15  ;;  %v3380_v2 = vpop.xlane.xlu0 %3379  ;;  %v3441_v44 = vmul.f32 %v8123_v11, %v8123_v11 }
 0x867   :  { %v3410_v27 = vmul.f32 0.03125, %v3380_v2  ;;  %v3440_v36 = vmul.f32 %v8127_v63, %v8127_v63 }
 0x868   :  { %v8135_v51 = vsub.f32 %v8050_v42, %v3411_v20  ;;  %v3471_v59 = vsel %vm249_vm0, %v3441_v44, 0.0 }
 0x869   :  { %v8139_v14 = vsub.f32 %v8052_v17, %v3410_v27  ;;  %v3389_v55 = vpop.xlane.xlu1 %3388  ;;  %3472 = vadd.xlane.f32.xlu1 %v3471_v59  ;;  %v3468_v53 = vsel %vm249_vm0, %v3440_v36, 0.0  ;;  %v3892_v27 = vld [vmem:[%s8386_s17] sm:$0xff]  ;;  %v3893_v36 = vld [vmem:[%s8386_s17 + $0x8] sm:$0xff]  ;;  %v3894_v59 = vld [vmem:[%s8386_s17 + $0x10] sm:$0xff] }
 0x86a   :  { %v3413_v50 = vmul.f32 0.03125, %v3389_v55  ;;  %3469 = vadd.xlane.f32.xlu0 %v3468_v53  ;;  %v3386_v12 = vpop.xlane.xlu0 %3385  ;;  %v3443_v19 = vmul.f32 %v8135_v51, %v8135_v51  ;;  %v5447_v55 = vpack.c.bf16 %v3893_v36, %v3892_v27  ;;  %v3895_v53 = vld [vmem:[%s8386_s17 + $0x18] sm:$0xff] }
 0x86b   :  { %v3412_v37 = vmul.f32 0.03125, %v3386_v12  ;;  %v3442_v7 = vmul.f32 %v8139_v14, %v8139_v14 }
 0x86c   :  { %v8147_v47 = vsub.f32 %v8060_v4, %v3413_v50  ;;  %v3477_v60 = vsel %vm249_vm0, %v3443_v19, 0.0  ;;  %v5451_v50 = vpack.c.bf16 %v3895_v53, %v3894_v59  ;;  %5448 = vmatprep.subr.bf16.mxu0 %v5447_v55 }
 0x86d   :  { %v8151_v45 = vsub.f32 %v8062_v52, %v3412_v37  ;;  %v3395_v43 = vpop.xlane.xlu1 %3394  ;;  %3478 = vadd.xlane.f32.xlu1 %v3477_v60  ;;  %v3474_v23 = vsel %vm249_vm0, %v3442_v7, 0.0  ;;  %5450 = vmatpush3.bf16.msra.mxu0 %v5447_v55 }
 0x86e   :  { %v3415_v61 = vmul.f32 0.03125, %v3395_v43  ;;  %3475 = vadd.xlane.f32.xlu0 %v3474_v23  ;;  %v3392_v10 = vpop.xlane.xlu0 %3391  ;;  %v3445_v34 = vmul.f32 %v8147_v47, %v8147_v47  ;;  %5452 = vmatprep.subr.bf16.mxu0 %v5451_v50 }
 0x86f   :  { %v3414_v24 = vmul.f32 0.03125, %v3392_v10  ;;  %v3444_v41 = vmul.f32 %v8151_v45, %v8151_v45 }
 0x870   :  { %v8159_v21 = vsub.f32 %v8070_v22, %v3415_v61  ;;  %v3483_v38 = vsel %vm249_vm0, %v3445_v34, 0.0 }
 0x871   :  { %v8163_v57 = vsub.f32 %v8072_v54, %v3414_v24  ;;  %3484 = vadd.xlane.f32.xlu1 %v3483_v38  ;;  %v3401_v35 = vpop.xlane.xlu1 %3400  ;;  %v3480_v5 = vsel %vm249_vm0, %v3444_v41, 0.0  ;;  %5454 = vmatpush3.bf16.msra.mxu0 %v5451_v50 }
 0x872   :  { %v3417_v28 = vmul.f32 0.03125, %v3401_v35  ;;  %3481 = vadd.xlane.f32.xlu0 %v3480_v5  ;;  %v3398_v0 = vpop.xlane.xlu0 %3397  ;;  %v3447_v30 = vmul.f32 %v8159_v21, %v8159_v21 }
 0x873   :  { %v3416_v46 = vmul.f32 0.03125, %v3398_v0  ;;  %v3446_v40 = vmul.f32 %v8163_v57, %v8163_v57 }
 0x874   :  { %v8171_v48 = vsub.f32 %v8080_v8, %v3417_v28  ;;  %v3489_v33 = vsel %vm249_vm0, %v3447_v30, 0.0 }
 0x875   :  { %v8175_v39 = vsub.f32 %v8082_v62, %v3416_v46  ;;  %3490 = vadd.xlane.f32.xlu1 %v3489_v33  ;;  %v3486_v31 = vsel %vm249_vm0, %v3446_v40, 0.0 }
 0x876   :  { %3487 = vadd.xlane.f32.xlu0 %v3486_v31  ;;  %v3449_v15 = vmul.f32 %v8171_v48, %v8171_v48 }
 0x877   :  { %v3448_v20 = vmul.f32 %v8175_v39, %v8175_v39 }
 0x878   :  { %v3495_v2 = vsel %vm249_vm0, %v3449_v15, 0.0 }
 0x879   :  { %3496 = vadd.xlane.f32.xlu1 %v3495_v2  ;;  %v3492_v44 = vsel %vm249_vm0, %v3448_v20, 0.0  ;;  %v8196_v20 = vld [vmem:[#allocation17] ss:$0 sm:$0xff] }
 0x87a   :  { %3493 = vadd.xlane.f32.xlu0 %v3492_v44 }
 0x8ea   :  { %v3455_v12 = vpop.xlane.xlu1 %3454 }
 0x8eb   :  { %v3499_v19 = vmul.f32 0.03125, %v3455_v12  ;;  %v3452_v37 = vpop.xlane.xlu0 %3451  ;;  %v8200_v12 = vld [vmem:[#allocation19] ss:$0 sm:$0xff] }
 0x8ec   :  { %v3498_v7 = vmul.f32 0.03125, %v3452_v37 }
 0x8ed   :  { %v3515_v60 = vadd.f32 1e-05, %v3499_v19 }
 0x8ee   :  { %v3514_v43 = vadd.f32 1e-05, %v3498_v7  ;;  %v3461_v23 = vpop.xlane.xlu1 %3460 }
 0x8ef   :  { %5822 = vrsqrt.f32 %v3515_v60  ;;  %v3501_v61 = vmul.f32 0.03125, %v3461_v23  ;;  %v3458_v10 = vpop.xlane.xlu0 %3457 }
 0x8f0   :  { %5824 = vrsqrt.f32 %v3514_v43  ;;  %v3500_v34 = vmul.f32 0.03125, %v3458_v10 }
 0x8f1   :  { %v3517_v24 = vadd.f32 1e-05, %v3501_v61 }
 0x8f2   :  { %v3516_v41 = vadd.f32 1e-05, %v3500_v34  ;;  %v3467_v38 = vpop.xlane.xlu1 %3466 }
 0x8f3   :  { %5826 = vrsqrt.f32 %v3517_v24  ;;  %v3503_v35 = vmul.f32 0.03125, %v3467_v38  ;;  %v3464_v5 = vpop.xlane.xlu0 %3463 }
 0x8f4   :  { %5828 = vrsqrt.f32 %v3516_v41  ;;  %v3502_v28 = vmul.f32 0.03125, %v3464_v5 }
 0x8f5   :  { %v3519_v0 = vadd.f32 1e-05, %v3503_v35 }
 0x8f6   :  { %v3518_v30 = vadd.f32 1e-05, %v3502_v28  ;;  %v3473_v46 = vpop.xlane.xlu1 %3472 }
 0x8f7   :  { %5830 = vrsqrt.f32 %v3519_v0  ;;  %v3505_v40 = vmul.f32 0.03125, %v3473_v46  ;;  %v3470_v33 = vpop.xlane.xlu0 %3469 }
 0x8f8   :  { %5832 = vrsqrt.f32 %v3518_v30  ;;  %v3504_v31 = vmul.f32 0.03125, %v3470_v33 }
 0x8f9   :  { %v5823_v15 = vpop.eup %5822  ;;  %v3521_v2 = vadd.f32 1e-05, %v3505_v40 }
 0x8fa   :  { %v5825_v44 = vpop.eup %5824  ;;  %v3547_v27 = vmul.f32 %v5823_v15, %v8089_v25  ;;  %v3520_v36 = vadd.f32 1e-05, %v3504_v31  ;;  %v3479_v59 = vpop.xlane.xlu1 %3478 }
 0x8fb   :  { %5834 = vrsqrt.f32 %v3521_v2  ;;  %v3507_v55 = vmul.f32 0.03125, %v3479_v59  ;;  %v3476_v53 = vpop.xlane.xlu0 %3475  ;;  %v3546_v50 = vmul.f32 %v5825_v44, %v8092_v9 }
 0x8fc   :  { %v3570_v19 = vmul.f32 %v8196_v20, %v3547_v27  ;;  %5836 = vrsqrt.f32 %v3520_v36  ;;  %v3506_v37 = vmul.f32 0.03125, %v3476_v53 }
 0x8fd   :  { %v5827_v7 = vpop.eup %5826  ;;  %v3523_v60 = vadd.f32 1e-05, %v3507_v55  ;;  %v3569_v43 = vmul.f32 %v8196_v20, %v3546_v50 }
 0x8fe   :  { %v5829_v23 = vpop.eup %5828  ;;  %v3522_v61 = vadd.f32 1e-05, %v3506_v37  ;;  %v3485_v25 = vpop.xlane.xlu1 %3484  ;;  %v3549_v10 = vmul.f32 %v5827_v7, %v8099_v29  ;;  %v3593_v38 = vadd.f32 %v8200_v12, %v3570_v19 }
 0x8ff   :  { %5838 = vrsqrt.f32 %v3523_v60  ;;  %v3509_v34 = vmul.f32 0.03125, %v3485_v25  ;;  %v3482_v24 = vpop.xlane.xlu0 %3481  ;;  %v3592_v9 = vadd.f32 %v8200_v12, %v3569_v43  ;;  %v3548_v41 = vmul.f32 %v5829_v23, %v8103_v16 }
 0x900   :  { %5840 = vrsqrt.f32 %v3522_v61  ;;  %v3508_v35 = vmul.f32 0.03125, %v3482_v24  ;;  %v3572_v5 = vmul.f32 %v8196_v20, %v3549_v10 }
 0x901   :  { %v5831_v28 = vpop.eup %5830  ;;  %v3525_v0 = vadd.f32 1e-05, %v3509_v34  ;;  %5167 = vmatprep.mubr.msk.f32.mxu1 %vm249_vm0, %v3592_v9  ;;  %v3571_v30 = vmul.f32 %v8196_v20, %v3548_v41 }
 0x902   :  { %v5833_v29 = vpop.eup %5832  ;;  %v3524_v46 = vadd.f32 1e-05, %v3508_v35  ;;  %v3491_v40 = vpop.xlane.xlu1 %3490  ;;  %5168 = vmatmul.mubr.msk.f32.vlgmr.msra.gmra.mrb[88].mxu1 %vm249_vm0, %v3593_v38  ;;  %v3551_v33 = vmul.f32 %v5831_v28, %v8111_v6  ;;  %v3595_v27 = vadd.f32 %v8200_v12, %v3572_v5 }
 0x903   :  { %5842 = vrsqrt.f32 %v3525_v0  ;;  %v3511_v16 = vmul.f32 0.03125, %v3491_v40  ;;  %v3488_v31 = vpop.xlane.xlu0 %3487  ;;  %v3594_v15 = vadd.f32 %v8200_v12, %v3571_v30  ;;  %v3550_v2 = vmul.f32 %v5833_v29, %v8115_v56 }
 0x904   :  { %5844 = vrsqrt.f32 %v3524_v46  ;;  %v3510_v44 = vmul.f32 0.03125, %v3488_v31  ;;  %v3574_v36 = vmul.f32 %v8196_v20, %v3551_v33 }
 0x905   :  { %v5835_v59 = vpop.eup %5834  ;;  %v3527_v55 = vadd.f32 1e-05, %v3511_v16  ;;  %5170 = vmatprep.mubr.msk.f32.mxu1 %vm249_vm0, %v3594_v15  ;;  %v3573_v53 = vmul.f32 %v8196_v20, %v3550_v2 }
 0x906   :  { %v5837_v6 = vpop.eup %5836  ;;  %v3526_v50 = vadd.f32 1e-05, %v3510_v44  ;;  %v3497_v19 = vpop.xlane.xlu1 %3496  ;;  %5171 = vmatmul.mubr.msk.f32.gmra.mrb[90].mxu1 %vm249_vm0, %v3595_v27  ;;  %v3553_v37 = vmul.f32 %v5835_v59, %v8123_v11  ;;  %v3597_v61 = vadd.f32 %v8200_v12, %v3574_v36 }
 0x907   :  { %5846 = vrsqrt.f32 %v3527_v55  ;;  %v3513_v56 = vmul.f32 0.03125, %v3497_v19  ;;  %v3494_v7 = vpop.xlane.xlu0 %3493  ;;  %v3596_v60 = vadd.f32 %v8200_v12, %v3573_v53  ;;  %v3552_v43 = vmul.f32 %v5837_v6, %v8127_v63 }
 0x908   :  { %5848 = vrsqrt.f32 %v3526_v50  ;;  %v3512_v23 = vmul.f32 0.03125, %v3494_v7  ;;  %v3576_v25 = vmul.f32 %v8196_v20, %v3553_v37 }
 0x909   :  { %v5839_v10 = vpop.eup %5838  ;;  %v3529_v34 = vadd.f32 1e-05, %v3513_v56  ;;  %5173 = vmatprep.mubr.msk.f32.mxu1 %vm249_vm0, %v3596_v60  ;;  %v3575_v24 = vmul.f32 %v8196_v20, %v3552_v43  ;;  %v8276_v60 = vld [vmem:[#allocation22] ss:$0 sm:$0xff] }
 0x90a   :  { %v5841_v11 = vpop.eup %5840  ;;  %v3528_v9 = vadd.f32 1e-05, %v3512_v23  ;;  %5174 = vmatmul.mubr.msk.f32.gmra.mrb[92].mxu1 %vm249_vm0, %v3597_v61  ;;  %v3555_v41 = vmul.f32 %v5839_v10, %v8135_v51  ;;  %v3599_v35 = vadd.f32 %v8200_v12, %v3576_v25 }
 0x90b   :  { %5850 = vrsqrt.f32 %v3529_v34  ;;  %v3598_v63 = vadd.f32 %v8200_v12, %v3575_v24  ;;  %v3554_v38 = vmul.f32 %v5841_v11, %v8139_v14 }
 0x90c   :  { %5852 = vrsqrt.f32 %v3528_v9  ;;  %v3578_v5 = vmul.f32 %v8196_v20, %v3555_v41 }
 0x90d   :  { %v5843_v28 = vpop.eup %5842  ;;  %5176 = vmatprep.mubr.msk.f32.mxu1 %vm249_vm0, %v3598_v63  ;;  %v3577_v0 = vmul.f32 %v8196_v20, %v3554_v38 }
 0x90e   :  { %v5845_v30 = vpop.eup %5844  ;;  %5177 = vmatmul.mubr.msk.f32.gmra.mrb[94].mxu1 %vm249_vm0, %v3599_v35  ;;  %v3557_v51 = vmul.f32 %v5843_v28, %v8147_v47  ;;  %v3601_v14 = vadd.f32 %v8200_v12, %v3578_v5 }
 0x90f   :  { %v3600_v29 = vadd.f32 %v8200_v12, %v3577_v0  ;;  %v3556_v46 = vmul.f32 %v5845_v30, %v8151_v45 }
 0x910   :  { %v3580_v40 = vmul.f32 %v8196_v20, %v3557_v51 }
 0x911   :  { %v5847_v33 = vpop.eup %5846  ;;  %5179 = vmatprep.mubr.msk.f32.mxu1 %vm249_vm0, %v3600_v29  ;;  %v3579_v16 = vmul.f32 %v8196_v20, %v3556_v46 }
 0x912   :  { %v5849_v31 = vpop.eup %5848  ;;  %5180 = vmatmul.mubr.msk.f32.gmra.mrb[96].mxu1 %vm249_vm0, %v3601_v14  ;;  %v3559_v15 = vmul.f32 %v5847_v33, %v8159_v21  ;;  %v3603_v45 = vadd.f32 %v8200_v12, %v3580_v40 }
 0x913   :  { %v3602_v47 = vadd.f32 %v8200_v12, %v3579_v16  ;;  %v3558_v2 = vmul.f32 %v5849_v31, %v8163_v57 }
 0x914   :  { %v3582_v44 = vmul.f32 %v8196_v20, %v3559_v15 }
 0x915   :  { %v5851_v27 = vpop.eup %5850  ;;  %5182 = vmatprep.mubr.msk.f32.mxu1 %vm249_vm0, %v3602_v47  ;;  %v3581_v36 = vmul.f32 %v8196_v20, %v3558_v2 }
 0x916   :  { %v5853_v59 = vpop.eup %5852  ;;  %5183 = vmatmul.mubr.msk.f32.gmra.mrb[98].mxu1 %vm249_vm0, %v3603_v45  ;;  %v3561_v55 = vmul.f32 %v5851_v27, %v8171_v48  ;;  %v3605_v57 = vadd.f32 %v8200_v12, %v3582_v44  ;;  %v3896_v48 = vld [vmem:[%s8386_s17 + $0x20] sm:$0xff] }
 0x917   :  { %v3604_v21 = vadd.f32 %v8200_v12, %v3581_v36  ;;  %v3560_v53 = vmul.f32 %v5853_v59, %v8175_v39  ;;  %v3897_v39 = vld [vmem:[%s8386_s17 + $0x28] sm:$0xff] }
 0x918   :  { %v3584_v6 = vmul.f32 %v8196_v20, %v3561_v55  ;;  %v5455_v56 = vpack.c.bf16 %v3897_v39, %v3896_v48 }
 0x919   :  { %5185 = vmatprep.mubr.msk.f32.mxu1 %vm249_vm0, %v3604_v21  ;;  %v3583_v50 = vmul.f32 %v8196_v20, %v3560_v53  ;;  %v3898_v20 = vld [vmem:[%s8386_s17 + $0x30] sm:$0xff] }
 0x91a   :  { %5186 = vmatmul.mubr.msk.f32.gmra.mrb[100].mxu1 %vm249_vm0, %v3605_v57  ;;  %v3607_v37 = vadd.f32 %v8200_v12, %v3584_v6  ;;  %5456 = vmatprep.subr.bf16.mxu0 %v5455_v56 }
 0x91b   :  { %v3606_v19 = vadd.f32 %v8200_v12, %v3583_v50  ;;  %5458 = vmatpush3.bf16.msra.mxu0 %v5455_v56  ;;  %v3899_v12 = vld [vmem:[%s8386_s17 + $0x38] sm:$0xff]  ;;  %s6268_s17 = smov [#allocation25]  }
 0x91c   :  { %v5459_v7 = vpack.c.bf16 %v3899_v12, %v3898_v20  ;;  %s4138_s2 = sshll.u32 %s6268_s17, 4  ;;  %s4139_s2 = int_to_ptr.vmem [resolvable:$true] %s4138_s2 }
 0x91d   :  { %5188 = vmatprep.mubr.msk.f32.mxu1 %vm249_vm0, %v3606_v19  ;;  %s6210_s16 = scalar_lea.vmem %s4139_s2, 2048  ;;  %p6215_p1 = scmp.lt.s32.totalorder %s4139_s2, %s4139_s2 }
 0x91e   :  { %5189 = vmatmul.mubr.msk.f32.gmra.mrb[102].mxu1 %vm249_vm0, %v3607_v37  ;;  %5460 = vmatprep.subr.bf16.mxu0 %v5459_v7  ;;  %p6211_p0 = scmp.ne.s32.totalorder %s4139_s2, %s6210_s16  ;;  %p6216_p2 = scmp.lt.s32.totalorder %s6210_s16, %s6210_s16 }
 0x91f   :  { %5462 = vmatpush3.bf16.msra.mxu0 %v5459_v7 }
 0x920   :  { %p6217_p3 = por %p6216_p2, %p6215_p1 }
 0x922   :  { %p6218_p4 = pnand %p6217_p3, %p6211_p0 }
 0x9d5   :  { %v5169_v43 = vpop.f32.mrb[88].mxu1 }
 0x9d6   :  { %v3739_v23 = vadd.f32 %v5169_v43, %v8276_v60  ;;  %v3733_v61 = vpop.f32.mrb[89].mxu1 }
 0x9d7   :  { %v3734_v25 = vadd.f32 %v8276_v60, %v3733_v61 }
 0x9d8   :  { %v3829_v10 = vmul.f32 0.70710677, %v3739_v23  ;;  %v3813_v59 = vmul.f32 0.5, %v3739_v23 }
 0x9d9   :  { %v3828_v34 = vmul.f32 0.70710677, %v3734_v25  ;;  %v5172_v24 = vpop.f32.mrb[90].mxu1  ;;  %v3812_v45 = vmul.f32 0.5, %v3734_v25 }
 0x9da   :  { %5854 = verf.f32 %v3829_v10  ;;  %v3749_v11 = vadd.f32 %v5172_v24, %v8276_v60  ;;  %v3743_v9 = vpop.f32.mrb[91].mxu1 }
 0x9db   :  { %5856 = verf.f32 %v3828_v34  ;;  %v3744_v41 = vadd.f32 %v8276_v60, %v3743_v9 }
 0x9dc   :  { %v3831_v63 = vmul.f32 0.70710677, %v3749_v11  ;;  %v3815_v7 = vmul.f32 0.5, %v3749_v11 }
 0x9dd   :  { %v3830_v38 = vmul.f32 0.70710677, %v3744_v41  ;;  %v5175_v35 = vpop.f32.mrb[92].mxu1  ;;  %v3814_v39 = vmul.f32 0.5, %v3744_v41 }
 0x9de   :  { %5858 = verf.f32 %v3831_v63  ;;  %v3759_v5 = vadd.f32 %v5175_v35, %v8276_v60  ;;  %v3753_v28 = vpop.f32.mrb[93].mxu1 }
 0x9df   :  { %5860 = verf.f32 %v3830_v38  ;;  %v3754_v0 = vadd.f32 %v8276_v60, %v3753_v28 }
 0x9e0   :  { %v3833_v30 = vmul.f32 0.70710677, %v3759_v5  ;;  %v3817_v28 = vmul.f32 0.5, %v3759_v5 }
 0x9e1   :  { %v3832_v51 = vmul.f32 0.70710677, %v3754_v0  ;;  %v5178_v29 = vpop.f32.mrb[94].mxu1  ;;  %v3816_v63 = vmul.f32 0.5, %v3754_v0 }
 0x9e2   :  { %5862 = verf.f32 %v3833_v30  ;;  %v8285_v46 = vadd.f32 %v5178_v29, %v8276_v60  ;;  %v3763_v14 = vpop.f32.mrb[95].mxu1 }
 0x9e3   :  { %5864 = verf.f32 %v3832_v51  ;;  %v3764_v40 = vadd.f32 %v8276_v60, %v3763_v14 }
 0x9e4   :  { %v5855_v33 = vpop.eup %5854  ;;  %v3835_v16 = vmul.f32 0.70710677, %v8285_v46  ;;  %v3819_v5 = vmul.f32 0.5, %v8285_v46 }
 0x9e5   :  { %v5857_v31 = vpop.eup %5856  ;;  %v3861_v15 = vadd.f32 1.0, %v5855_v33  ;;  %v3834_v47 = vmul.f32 0.70710677, %v3764_v40  ;;  %v5181_v2 = vpop.f32.mrb[96].mxu1 }
 0x9e6   :  { %v3860_v44 = vadd.f32 1.0, %v5857_v31  ;;  %5866 = verf.f32 %v3835_v16  ;;  %v8290_v27 = vadd.f32 %v5181_v2, %v8276_v60  ;;  %v3773_v36 = vpop.f32.mrb[97].mxu1 }
 0x9e7   :  { %5868 = verf.f32 %v3834_v47  ;;  %v3774_v55 = vadd.f32 %v8276_v60, %v3773_v36  ;;  %v3877_v50 = vmul.f32 %v3861_v15, %v3813_v59  ;;  %v3818_v47 = vmul.f32 0.5, %v3764_v40 }
 0x9e8   :  { %v5859_v21 = vpop.eup %5858  ;;  %v3876_v53 = vmul.f32 %v3860_v44, %v3812_v45  ;;  %v3837_v57 = vmul.f32 0.70710677, %v8290_v27 }
 0x9e9   :  { %v5861_v6 = vpop.eup %5860  ;;  %v3863_v19 = vadd.f32 1.0, %v5859_v21  ;;  %v3836_v37 = vmul.f32 0.70710677, %v3774_v55  ;;  %v5184_v48 = vpop.f32.mrb[98].mxu1 }
 0x9ea   :  { %v3862_v56 = vadd.f32 1.0, %v5861_v6  ;;  %5870 = verf.f32 %v3837_v57  ;;  %v8295_v20 = vadd.f32 %v5184_v48, %v8276_v60  ;;  %v3783_v12 = vpop.f32.mrb[99].mxu1  ;;  %5207 = vmatprep.mubr.msk.f32.mxu0 %vm3907_vm2, %v3876_v53  ;;  %v3821_v48 = vmul.f32 0.5, %v8290_v27 }
 0x9eb   :  { %5872 = verf.f32 %v3836_v37  ;;  %v3784_v43 = vadd.f32 %v8276_v60, %v3783_v12  ;;  %5208 = vmatmul.mubr.msk.f32.vlgmr.msra.gmra.mrb[56].mxu0 %vm3907_vm2, %v3877_v50  ;;  %v3879_v34 = vmul.f32 %v3863_v19, %v3815_v7  ;;  %v3820_v19 = vmul.f32 0.5, %v3774_v55 }
 0x9ec   :  { %v5863_v23 = vpop.eup %5862  ;;  %v3878_v61 = vmul.f32 %v3862_v56, %v3814_v39  ;;  %v3839_v25 = vmul.f32 0.70710677, %v8295_v20  ;;  %v3823_v55 = vmul.f32 0.5, %v8295_v20 }
 0x9ed   :  { %v5865_v10 = vpop.eup %5864  ;;  %v3865_v24 = vadd.f32 1.0, %v5863_v23  ;;  %v3838_v9 = vmul.f32 0.70710677, %v3784_v43  ;;  %v5187_v41 = vpop.f32.mrb[100].mxu1  ;;  %v3822_v7 = vmul.f32 0.5, %v3784_v43 }
 0x9ee   :  { %v3864_v38 = vadd.f32 1.0, %v5865_v10  ;;  %5874 = verf.f32 %v3839_v25  ;;  %v3799_v35 = vadd.f32 %v5187_v41, %v8276_v60  ;;  %v3793_v11 = vpop.f32.mrb[101].mxu1  ;;  %5210 = vmatprep.mubr.msk.f32.mxu0 %vm3907_vm2, %v3878_v61 }
 0x9ef   :  { %5876 = verf.f32 %v3838_v9  ;;  %v3794_v30 = vadd.f32 %v8276_v60, %v3793_v11  ;;  %5211 = vmatmul.mubr.msk.f32.gmra.mrb[58].mxu0 %vm3907_vm2, %v3879_v34  ;;  %v3881_v16 = vmul.f32 %v3865_v24, %v3817_v28 }
 0x9f0   :  { %v5867_v51 = vpop.eup %5866  ;;  %v3880_v29 = vmul.f32 %v3864_v38, %v3816_v63  ;;  %v3841_v14 = vmul.f32 0.70710677, %v3799_v35  ;;  %v3825_v41 = vmul.f32 0.5, %v3799_v35  ;;  %v4330_v35 = vld [vmem:[#allocation23] ss:$0 sm:$0xff] }
 0x9f1   :  { %v5869_v33 = vpop.eup %5868  ;;  %v3867_v31 = vadd.f32 1.0, %v5867_v51  ;;  %v3840_v0 = vmul.f32 0.70710677, %v3794_v30  ;;  %v5190_v15 = vpop.f32.mrb[102].mxu1  ;;  %v3824_v24 = vmul.f32 0.5, %v3794_v30 }
 0x9f2   :  { %v3866_v2 = vadd.f32 1.0, %v5869_v33  ;;  %5878 = verf.f32 %v3841_v14  ;;  %v3809_v45 = vadd.f32 %v5190_v15, %v8276_v60  ;;  %v3803_v44 = vpop.f32.mrb[103].mxu1  ;;  %5213 = vmatprep.mubr.msk.f32.mxu0 %vm3907_vm2, %v3880_v29 }
 0x9f3   :  { %5880 = verf.f32 %v3840_v0  ;;  %v3804_v36 = vadd.f32 %v8276_v60, %v3803_v44  ;;  %5214 = vmatmul.mubr.msk.f32.gmra.mrb[60].mxu0 %vm3907_vm2, %v3881_v16  ;;  %v3883_v6 = vmul.f32 %v3867_v31, %v3819_v5 }
 0x9f4   :  { %v5871_v59 = vpop.eup %5870  ;;  %v3882_v21 = vmul.f32 %v3866_v2, %v3818_v47  ;;  %v3843_v53 = vmul.f32 0.70710677, %v3809_v45  ;;  %v3827_v29 = vmul.f32 0.5, %v3809_v45 }
 0x9f5   :  { %v5873_v57 = vpop.eup %5872  ;;  %v3869_v40 = vadd.f32 1.0, %v5871_v59  ;;  %v3842_v50 = vmul.f32 0.70710677, %v3804_v36  ;;  %v3826_v20 = vmul.f32 0.5, %v3804_v36 }
 0x9f6   :  { %v3868_v37 = vadd.f32 1.0, %v5873_v57  ;;  %5882 = verf.f32 %v3843_v53  ;;  %5216 = vmatprep.mubr.msk.f32.mxu0 %vm3907_vm2, %v3882_v21 }
 0x9f7   :  { %5884 = verf.f32 %v3842_v50  ;;  %5217 = vmatmul.mubr.msk.f32.gmra.mrb[62].mxu0 %vm3907_vm2, %v3883_v6  ;;  %v3885_v56 = vmul.f32 %v3869_v40, %v3821_v48 }
 0x9f8   :  { %v5875_v60 = vpop.eup %5874  ;;  %v3884_v46 = vmul.f32 %v3868_v37, %v3820_v19 }
 0x9f9   :  { %v5877_v39 = vpop.eup %5876  ;;  %v3871_v12 = vadd.f32 1.0, %v5875_v60 }
 0x9fa   :  { %v3870_v23 = vadd.f32 1.0, %v5877_v39  ;;  %5219 = vmatprep.mubr.msk.f32.mxu0 %vm3907_vm2, %v3884_v46 }
 0x9fb   :  { %5220 = vmatmul.mubr.msk.f32.gmra.mrb[64].mxu0 %vm3907_vm2, %v3885_v56  ;;  %v3887_v27 = vmul.f32 %v3871_v12, %v3823_v55 }
 0x9fc   :  { %v5879_v61 = vpop.eup %5878  ;;  %v3886_v25 = vmul.f32 %v3870_v23, %v3822_v7 }
 0x9fd   :  { %v5881_v10 = vpop.eup %5880  ;;  %v3873_v34 = vadd.f32 1.0, %v5879_v61 }
 0x9fe   :  { %v3872_v9 = vadd.f32 1.0, %v5881_v10  ;;  %5222 = vmatprep.mubr.msk.f32.mxu0 %vm3907_vm2, %v3886_v25 }
 0x9ff   :  { %5223 = vmatmul.mubr.msk.f32.gmra.mrb[66].mxu0 %vm3907_vm2, %v3887_v27  ;;  %v3889_v11 = vmul.f32 %v3873_v34, %v3825_v41 }
 0xa00   :  { %v5883_v43 = vpop.eup %5882  ;;  %v3888_v63 = vmul.f32 %v3872_v9, %v3824_v24 }
 0xa01   :  { %v5885_v38 = vpop.eup %5884  ;;  %v3875_v28 = vadd.f32 1.0, %v5883_v43 }
 0xa02   :  { %v3874_v51 = vadd.f32 1.0, %v5885_v38  ;;  %5225 = vmatprep.mubr.msk.f32.mxu0 %vm3907_vm2, %v3888_v63 }
 0xa03   :  { %5226 = vmatmul.mubr.msk.f32.gmra.mrb[68].mxu0 %vm3907_vm2, %v3889_v11  ;;  %v3891_v30 = vmul.f32 %v3875_v28, %v3827_v29 }
 0xa04   :  { %v3890_v14 = vmul.f32 %v3874_v51, %v3826_v20 }
 0xa06   :  { %5228 = vmatprep.mubr.msk.f32.mxu0 %vm3907_vm2, %v3890_v14 }
 0xa07   :  { %5229 = vmatmul.mubr.msk.f32.gmra.mrb[70].mxu0 %vm3907_vm2, %v3891_v30 }
 0xabe   :  { %v5209_v33 = vpop.f32.mrb[56].mxu0 }
 0xabf   :  { %v4028_v16 = vadd.f32 %v5209_v33, %v4330_v35  ;;  %v4022_v31 = vpop.f32.mrb[57].mxu0 }
 0xac0   :  { %v4023_v0 = vadd.f32 %v4330_v35, %v4022_v31 }
 0xac1   :  { %v4102_v15 = vadd.f32 %v4028_v16, %v8010_v1 }
 0xac2   :  { %v4101_v47 = vadd.f32 %v4023_v0, %v8012_v58  ;;  %v5212_v2 = vpop.f32.mrb[58].mxu0 }
 0xac3   :  { %4118 = vst.msk [vmem:[#allocation25 + $0x8] sm:$0xff] %vm249_vm0, %v4102_v15  ;;  %v4038_v45 = vadd.f32 %v5212_v2, %v4330_v35  ;;  %v4032_v44 = vpop.f32.mrb[59].mxu0 }
 0xac4   :  { %4117 = vst.msk [vmem:[#allocation25] sm:$0xff] %vm249_vm0, %v4101_v47  ;;  %v4033_v5 = vadd.f32 %v4330_v35, %v4032_v44 }
 0xac5   :  { %v4104_v36 = vadd.f32 %v4038_v45, %v8020_v32 }
 0xac6   :  { %v4103_v59 = vadd.f32 %v4033_v5, %v8022_v3  ;;  %v5215_v21 = vpop.f32.mrb[60].mxu0 }
 0xac7   :  { %4120 = vst.msk [vmem:[#allocation25 + $0x18] sm:$0xff] %vm249_vm0, %v4104_v36  ;;  %v4048_v53 = vadd.f32 %v5215_v21, %v4330_v35  ;;  %v4042_v57 = vpop.f32.mrb[61].mxu0 }
 0xac8   :  { %4119 = vst.msk [vmem:[#allocation25 + $0x10] sm:$0xff] %vm249_vm0, %v4103_v59  ;;  %v4043_v1 = vadd.f32 %v4330_v35, %v4042_v57 }
 0xac9   :  { %v4106_v58 = vadd.f32 %v4048_v53, %v8030_v13 }
 0xaca   :  { %v4105_v6 = vadd.f32 %v4043_v1, %v8032_v26  ;;  %v5218_v40 = vpop.f32.mrb[62].mxu0 }
 0xacb   :  { %4122 = vst.msk [vmem:[#allocation25 + $0x28] sm:$0xff] %vm249_vm0, %v4106_v58  ;;  %v4058_v50 = vadd.f32 %v5218_v40, %v4330_v35  ;;  %v4052_v19 = vpop.f32.mrb[63].mxu0 }
 0xacc   :  { %4121 = vst.msk [vmem:[#allocation25 + $0x20] sm:$0xff] %vm249_vm0, %v4105_v6  ;;  %v4053_v32 = vadd.f32 %v4330_v35, %v4052_v19 }
 0xacd   :  { %v4108_v3 = vadd.f32 %v4058_v50, %v8040_v18 }
 0xace   :  { %v4107_v37 = vadd.f32 %v4053_v32, %v8042_v49  ;;  %v5221_v48 = vpop.f32.mrb[64].mxu0 }
 0xacf   :  { %4124 = vst.msk [vmem:[#allocation25 + $0x38] sm:$0xff] %vm249_vm0, %v4108_v3  ;;  %v4068_v60 = vadd.f32 %v5221_v48, %v4330_v35  ;;  %v4062_v46 = vpop.f32.mrb[65].mxu0 }
 0xad0   :  { %4123 = vst.msk [vmem:[#allocation25 + $0x30] sm:$0xff] %vm249_vm0, %v4107_v37  ;;  %v4063_v13 = vadd.f32 %v4330_v35, %v4062_v46 }
 0xad1   :  { %v4110_v26 = vadd.f32 %v4068_v60, %v8050_v42 }
 0xad2   :  { %v4109_v39 = vadd.f32 %v4063_v13, %v8052_v17  ;;  %v5224_v56 = vpop.f32.mrb[66].mxu0 }
 0xad3   :  { %4126 = vst.msk [vmem:[#allocation25 + $0x48] sm:$0xff] %vm249_vm0, %v4110_v26  ;;  %v4078_v12 = vadd.f32 %v5224_v56, %v4330_v35  ;;  %v4072_v7 = vpop.f32.mrb[67].mxu0 }
 0xad4   :  { %4125 = vst.msk [vmem:[#allocation25 + $0x40] sm:$0xff] %vm249_vm0, %v4109_v39  ;;  %v4073_v18 = vadd.f32 %v4330_v35, %v4072_v7 }
 0xad5   :  { %v4112_v49 = vadd.f32 %v4078_v12, %v8060_v4 }
 0xad6   :  { %v4111_v23 = vadd.f32 %v4073_v18, %v8062_v52  ;;  %v5227_v55 = vpop.f32.mrb[68].mxu0 }
 0xad7   :  { %4128 = vst.msk [vmem:[#allocation25 + $0x58] sm:$0xff] %vm249_vm0, %v4112_v49  ;;  %v4088_v61 = vadd.f32 %v5227_v55, %v4330_v35  ;;  %v4082_v25 = vpop.f32.mrb[69].mxu0 }
 0xad8   :  { %4127 = vst.msk [vmem:[#allocation25 + $0x50] sm:$0xff] %vm249_vm0, %v4111_v23  ;;  %v4083_v42 = vadd.f32 %v4330_v35, %v4082_v25 }
 0xad9   :  { %v4114_v17 = vadd.f32 %v4088_v61, %v8070_v22 }
 0xada   :  { %v4113_v10 = vadd.f32 %v4083_v42, %v8072_v54  ;;  %v5230_v27 = vpop.f32.mrb[70].mxu0 }
 0xadb   :  { %4130 = vst.msk [vmem:[#allocation25 + $0x68] sm:$0xff] %vm249_vm0, %v4114_v17  ;;  %v4098_v34 = vadd.f32 %v5230_v27, %v4330_v35  ;;  %v4092_v24 = vpop.f32.mrb[71].mxu0 }
 0xadc   :  { %4129 = vst.msk [vmem:[#allocation25 + $0x60] sm:$0xff] %vm249_vm0, %v4113_v10  ;;  %v4093_v4 = vadd.f32 %v4330_v35, %v4092_v24 }
 0xadd   :  { %v4116_v52 = vadd.f32 %v4098_v34, %v8080_v8 }
 0xade   :  { %v4115_v9 = vadd.f32 %v4093_v4, %v8082_v62 }
 0xadf   :  { %4132 = vst.msk [vmem:[#allocation25 + $0x78] sm:$0xff] %vm249_vm0, %v4116_v52 }
 0xae0   :  { %4131 = vst.msk [vmem:[#allocation25 + $0x70] sm:$0xff] %vm249_vm0, %v4115_v9 }
 0xae1   :  { %6221 = shalt.err (!%p6218_p4)
}
 0xae2   :  { %s6222_s18 = scalar_lea.hbm %s8388_s19, 2048 }
 0xae3   :  { %p6223_p5 = scmp.ne.s32.totalorder %s8388_s19, %s6222_s18  ;;  %p6226_p6 = scmp.lt.u32.totalorder %s6222_s18, %s8388_s19 }
 0xae5   :  { %p6228_p7 = pnand %p6226_p6, %p6223_p5 }
 0xae7   :  { %6231 = shalt.err (!%p6228_p7)
}
 0xae8   :  { %4144 = dma.vmem_to_hbm [thread:$0]  %s4139_s2, 2048, %s8388_s19, [#allocation4], %s6255_s29, %s6255_s29, %s6256_s3  }
 0xae9   :  { %6248 = dma.done.wait [#allocation4], 2048  }
 0xaea   :  { %6249 = vsyncadd [#allocation4], 4294965248 }
 0xaeb   :  { %4148 = vsyncpa [#allocation3], 1 }
 0xaec   :  { %4149 = vsyncpa [#allocation6], 1 }
 0xaed   :  { %4150 = vsyncpa [#allocation9], 1 }
 0xaee   :  { %4151 = vsyncpa [#allocation12], 1 }
 0xaef   :  { %4152 = vsyncpa [#allocation15], 1 }
 0xaf0   :  { %4153 = vsyncpa [#allocation18], 1 }
 0xaf1   :  { %4154 = vsyncpa [#allocation21], 1 }
 0xaf2   :  { %4155 = vsyncpa [#allocation24], 1 }
 0xaf3   :  { %4156 = vsyncpa [#allocation4], 1 }

</bundles_post_ra>
